<compile_context>
chip_gen: v6e
topology: v6e:2x2x1
jax: 0.10.0
libtpu: 0.0.40
codegen_flags: <defaults>
</compile_context>

<pallas_src>
import jax
import jax.numpy as jnp
from jax.experimental import pallas as pl
from jax.experimental.pallas import tpu as pltpu

HIDDEN = (256, 512, 1024)
LANE = 128
TB_CAP = 512   # keep <= 256 on v5e if you drop the vmem_limit_bytes override


def _round_up(x, m):
    return (x + m - 1) // m * m


def _leaky_relu(x, slope=0.2):
    # max-form: 2 VALU ops (mul+max) instead of cmp+select (valid for 0<slope<1).
    return jnp.maximum(x, slope * x)


def generator_kernel(x_ref,
                     w1_ref, b1_ref,
                     w2_ref, b2_ref,
                     w3_ref, b3_ref,
                     w4_ref, b4_ref,
                     out_ref):
    # bf16 matmuls on the MXU with f32 accumulation; bias + activation in f32,
    # recast to bf16 before the next matmul.
    h = jnp.dot(x_ref[...], w1_ref[...], preferred_element_type=jnp.float32)
    h = _leaky_relu(h + b1_ref[...]).astype(jnp.bfloat16)

    h = jnp.dot(h, w2_ref[...], preferred_element_type=jnp.float32)
    h = _leaky_relu(h + b2_ref[...]).astype(jnp.bfloat16)

    h = jnp.dot(h, w3_ref[...], preferred_element_type=jnp.float32)
    h = _leaky_relu(h + b3_ref[...]).astype(jnp.bfloat16)

    h = jnp.dot(h, w4_ref[...], preferred_element_type=jnp.float32)
    out_ref[...] = jnp.tanh(h + b4_ref[...])


def generator_forward(x, params, g_output_dim, tb=None):
    """x: [B, g_input_dim] f32.  params = (w1,b1,...,w4,b4);
    wi: [in, out] bf16 (w4 lane-padded), bi: [1, out] f32 (b4 lane-padded)."""
    w1, b1, w2, b2, w3, b3, w4, b4 = params
    B, g_in = x.shape
    out_pad = w4.shape[1]                     # lane-padded output width

    # Batch tile: for B <= TB_CAP the whole (8-rounded) batch is a single tile
    # (grid=(1,)); otherwise tile at TB_CAP (multiple of the MXU row count).
    if tb is None:
        tb = min(_round_up(B, 8), TB_CAP)
    tb = _round_up(tb, 8)
    b_pad = _round_up(B, tb)
    if b_pad != B:
        x = jnp.pad(x, ((0, b_pad - B), (0, 0)))
    x = x.astype(jnp.bfloat16)

    grid = (b_pad // tb,)

    # Weights/biases: grid-invariant index_maps -> DMA'd once, VMEM-resident.
    const_spec = lambda a: pl.BlockSpec(a.shape, lambda i: (0, 0))
    in_specs = [pl.BlockSpec((tb, g_in), lambda i: (i, 0))]      # streamed x tile
    in_specs += [const_spec(p) for p in params]                  # resident weights/biases
    out_specs = pl.BlockSpec((tb, out_pad), lambda i: (i, 0))    # streamed, lane-dense out

    dims = [g_in] + list(HIDDEN) + [out_pad]
    flops = 2 * b_pad * sum(dims[i] * dims[i + 1] for i in range(4))
    # Weight bytes counted once: their BlockSpecs are grid-invariant.
    bytes_accessed = (sum(p.size * p.dtype.itemsize for p in params)
                      + x.size * 2 + b_pad * out_pad * 4)
    cost = pl.CostEstimate(flops=flops,
                           transcendentals=b_pad * out_pad,
                           bytes_accessed=bytes_accessed)

    out = pl.pallas_call(
        generator_kernel,
        out_shape=jax.ShapeDtypeStruct((b_pad, out_pad), jnp.float32),
        grid_spec=pltpu.PrefetchScalarGridSpec(
            num_scalar_prefetch=0,
            grid=grid,
            in_specs=in_specs,
            out_specs=out_specs,
        ),
        compiler_params=pltpu.CompilerParams(
            dimension_semantics=("parallel",),
            vmem_limit_bytes=32 * 1024 * 1024,
        ),
        cost_estimate=cost,
    )(x, *params)

    # Slice only the dims that were actually padded (avoids a copy when possible).
    if b_pad != B or out_pad != g_output_dim:
        out = out[:B, :g_output_dim]
    return out


def init_generator_params(key, g_input_dim, g_output_dim):
    """Deterministic synthetic parameters matching nn.Linear shapes, stored as
    [in, out].  Weights bf16 (w4 zero-padded to a lane multiple), biases f32."""
    dims = [g_input_dim] + list(HIDDEN) + [g_output_dim]
    out_pad = _round_up(g_output_dim, LANE)
    params = []
    for i in range(4):
        key, kw, kb = jax.random.split(key, 3)
        fan_in, fan_out = dims[i], dims[i + 1]
        bound = 1.0 / (fan_in ** 0.5)
        w = jax.random.uniform(kw, (fan_in, fan_out), jnp.float32, -bound, bound)
        b = jax.random.uniform(kb, (1, fan_out), jnp.float32, -bound, bound)
        if i == 3 and fan_out != out_pad:
            w = jnp.pad(w, ((0, 0), (0, out_pad - fan_out)))   # zero-pad padded lanes
            b = jnp.pad(b, ((0, 0), (0, out_pad - fan_out)))
        params += [w.astype(jnp.bfloat16), b]
    return tuple(params)


def generator_reference_f32(x, params, g_output_dim):
    """Pure f32 reference (original module semantics)."""
    w1, b1, w2, b2, w3, b3, w4, b4 = [p.astype(jnp.float32) for p in params]
    h = jax.nn.leaky_relu(x @ w1 + b1, 0.2)
    h = jax.nn.leaky_relu(h @ w2 + b2, 0.2)
    h = jax.nn.leaky_relu(h @ w3 + b3, 0.2)
    return jnp.tanh(h @ w4 + b4)[:, :g_output_dim]


def generator_reference_bf16(x, params, g_output_dim):
    """Reference with the same bf16-in / f32-accumulate mixed precision as the kernel."""
    w1, b1, w2, b2, w3, b3, w4, b4 = params
    h = x.astype(jnp.bfloat16)
    h = jax.nn.leaky_relu(jnp.dot(h, w1, preferred_element_type=jnp.float32) + b1, 0.2)
    h = jax.nn.leaky_relu(jnp.dot(h.astype(jnp.bfloat16), w2,
                                  preferred_element_type=jnp.float32) + b2, 0.2)
    h = jax.nn.leaky_relu(jnp.dot(h.astype(jnp.bfloat16), w3,
                                  preferred_element_type=jnp.float32) + b3, 0.2)
    out = jnp.tanh(jnp.dot(h.astype(jnp.bfloat16), w4,
                           preferred_element_type=jnp.float32) + b4)
    return out[:, :g_output_dim]


if __name__ == "__main__":
    key = jax.random.PRNGKey(0)

    # Module-consistent small shapes: latent dim 128, output 784 (28x28 image).
    # B=64 <= TB_CAP -> single batch tile, grid=(1,), MXU M-dim fully used.
    B, G_IN, G_OUT = 64, 128, 784

    key, kx, kp = jax.random.split(key, 3)
    x = jax.random.normal(kx, (B, G_IN), jnp.float32)
    params = init_generator_params(kp, G_IN, G_OUT)

    out = generator_forward(x, params, G_OUT)     # default tb -> single tile
    out = jax.block_until_ready(out)
    assert out.shape == (B, G_OUT), out.shape

    # Tight check against a reference using identical mixed precision.
    ref_mixed = generator_reference_bf16(x, params, G_OUT)
    assert jnp.allclose(out, ref_mixed, atol=1e-3, rtol=1e-3), \
        float(jnp.max(jnp.abs(out - ref_mixed)))

    # Loose sanity check against the pure-f32 forward pass (bf16 quantization error).
    ref_f32 = generator_reference_f32(x, params, G_OUT)
    assert jnp.allclose(out, ref_f32, atol=5e-2), \
        float(jnp.max(jnp.abs(out - ref_f32)))

    print("KERNEL_OK")
</pallas_src>

<mosaic_0001>
module attributes {stable_mosaic.version = 11 : i64} {
  func.func @generator_kernel(%arg0: i32, %arg1: memref<64x128xbf16, #tpu.memory_space<vmem>>, %arg2: memref<128x256xbf16, #tpu.memory_space<vmem>>, %arg3: memref<1x256xf32, #tpu.memory_space<vmem>>, %arg4: memref<256x512xbf16, #tpu.memory_space<vmem>>, %arg5: memref<1x512xf32, #tpu.memory_space<vmem>>, %arg6: memref<512x1024xbf16, #tpu.memory_space<vmem>>, %arg7: memref<1x1024xf32, #tpu.memory_space<vmem>>, %arg8: memref<1024x896xbf16, #tpu.memory_space<vmem>>, %arg9: memref<1x896xf32, #tpu.memory_space<vmem>>, %arg10: memref<64x896xf32, #tpu.memory_space<vmem>>) attributes {dimension_semantics = [#tpu.dimension_semantics<parallel>], iteration_bounds = array<i64: 1>, scalar_prefetch = 0 : i64, scratch_operands = 0 : i64, tpu.core_type = #tpu.core_type<tc>, window_params = [{transform_indices = @transform_0, window_bounds = array<i64: 64, 128>}, {pipeline_mode = #tpu.pipeline_mode<synchronous>, transform_indices = @transform_1, window_bounds = array<i64: 128, 256>}, {pipeline_mode = #tpu.pipeline_mode<synchronous>, transform_indices = @transform_2, window_bounds = array<i64: 1, 256>}, {pipeline_mode = #tpu.pipeline_mode<synchronous>, transform_indices = @transform_3, window_bounds = array<i64: 256, 512>}, {pipeline_mode = #tpu.pipeline_mode<synchronous>, transform_indices = @transform_4, window_bounds = array<i64: 1, 512>}, {pipeline_mode = #tpu.pipeline_mode<synchronous>, transform_indices = @transform_5, window_bounds = array<i64: 512, 1024>}, {pipeline_mode = #tpu.pipeline_mode<synchronous>, transform_indices = @transform_6, window_bounds = array<i64: 1, 1024>}, {pipeline_mode = #tpu.pipeline_mode<synchronous>, transform_indices = @transform_7, window_bounds = array<i64: 1024, 896>}, {pipeline_mode = #tpu.pipeline_mode<synchronous>, transform_indices = @transform_8, window_bounds = array<i64: 1, 896>}, {transform_indices = @transform_9, window_bounds = array<i64: 64, 896>}]} {
    %c0 = arith.constant 0 : index
    %c0_0 = arith.constant 0 : index
    %0 = vector.load %arg1[%c0, %c0_0] : memref<64x128xbf16, #tpu.memory_space<vmem>>, vector<64x128xbf16>
    %c0_1 = arith.constant 0 : index
    %c0_2 = arith.constant 0 : index
    %1 = vector.load %arg2[%c0_1, %c0_2] : memref<128x256xbf16, #tpu.memory_space<vmem>>, vector<128x256xbf16>
    %cst = arith.constant dense<0.000000e+00> : vector<64x256xf32>
    %2 = tpu.matmul %0, %1, %cst {dimension_numbers = #tpu.dot_dimension_numbers<[1], [0], [0], [1], [0, 0, 1, 1], [], []>} : vector<64x128xbf16>, vector<128x256xbf16>, vector<64x256xf32> -> vector<64x256xf32>
    %c0_3 = arith.constant 0 : index
    %c0_4 = arith.constant 0 : index
    %3 = vector.load %arg3[%c0_3, %c0_4] : memref<1x256xf32, #tpu.memory_space<vmem>>, vector<1x256xf32>
    %4 = vector.broadcast %3 : vector<1x256xf32> to vector<64x256xf32>
    %5 = arith.addf %2, %4 : vector<64x256xf32>
    %cst_5 = arith.constant 2.000000e-01 : f32
    %6 = vector.broadcast %cst_5 : f32 to vector<64x256xf32>
    %7 = arith.mulf %6, %5 : vector<64x256xf32>
    %8 = arith.maximumf %5, %7 : vector<64x256xf32>
    %9 = arith.truncf %8 : vector<64x256xf32> to vector<64x256xbf16>
    %c0_6 = arith.constant 0 : index
    %c0_7 = arith.constant 0 : index
    %10 = vector.load %arg4[%c0_6, %c0_7] : memref<256x512xbf16, #tpu.memory_space<vmem>>, vector<256x512xbf16>
    %cst_8 = arith.constant dense<0.000000e+00> : vector<64x512xf32>
    %11 = tpu.matmul %9, %10, %cst_8 {dimension_numbers = #tpu.dot_dimension_numbers<[1], [0], [0], [1], [0, 0, 1, 1], [], []>} : vector<64x256xbf16>, vector<256x512xbf16>, vector<64x512xf32> -> vector<64x512xf32>
    %c0_9 = arith.constant 0 : index
    %c0_10 = arith.constant 0 : index
    %12 = vector.load %arg5[%c0_9, %c0_10] : memref<1x512xf32, #tpu.memory_space<vmem>>, vector<1x512xf32>
    %13 = vector.broadcast %12 : vector<1x512xf32> to vector<64x512xf32>
    %14 = arith.addf %11, %13 : vector<64x512xf32>
    %cst_11 = arith.constant 2.000000e-01 : f32
    %15 = vector.broadcast %cst_11 : f32 to vector<64x512xf32>
    %16 = arith.mulf %15, %14 : vector<64x512xf32>
    %17 = arith.maximumf %14, %16 : vector<64x512xf32>
    %18 = arith.truncf %17 : vector<64x512xf32> to vector<64x512xbf16>
    %c0_12 = arith.constant 0 : index
    %c0_13 = arith.constant 0 : index
    %19 = vector.load %arg6[%c0_12, %c0_13] : memref<512x1024xbf16, #tpu.memory_space<vmem>>, vector<512x1024xbf16>
    %cst_14 = arith.constant dense<0.000000e+00> : vector<64x1024xf32>
    %20 = tpu.matmul %18, %19, %cst_14 {dimension_numbers = #tpu.dot_dimension_numbers<[1], [0], [0], [1], [0, 0, 1, 1], [], []>} : vector<64x512xbf16>, vector<512x1024xbf16>, vector<64x1024xf32> -> vector<64x1024xf32>
    %c0_15 = arith.constant 0 : index
    %c0_16 = arith.constant 0 : index
    %21 = vector.load %arg7[%c0_15, %c0_16] : memref<1x1024xf32, #tpu.memory_space<vmem>>, vector<1x1024xf32>
    %22 = vector.broadcast %21 : vector<1x1024xf32> to vector<64x1024xf32>
    %23 = arith.addf %20, %22 : vector<64x1024xf32>
    %cst_17 = arith.constant 2.000000e-01 : f32
    %24 = vector.broadcast %cst_17 : f32 to vector<64x1024xf32>
    %25 = arith.mulf %24, %23 : vector<64x1024xf32>
    %26 = arith.maximumf %23, %25 : vector<64x1024xf32>
    %27 = arith.truncf %26 : vector<64x1024xf32> to vector<64x1024xbf16>
    %c0_18 = arith.constant 0 : index
    %c0_19 = arith.constant 0 : index
    %28 = vector.load %arg8[%c0_18, %c0_19] : memref<1024x896xbf16, #tpu.memory_space<vmem>>, vector<1024x896xbf16>
    %cst_20 = arith.constant dense<0.000000e+00> : vector<64x896xf32>
    %29 = tpu.matmul %27, %28, %cst_20 {dimension_numbers = #tpu.dot_dimension_numbers<[1], [0], [0], [1], [0, 0, 1, 1], [], []>} : vector<64x1024xbf16>, vector<1024x896xbf16>, vector<64x896xf32> -> vector<64x896xf32>
    %c0_21 = arith.constant 0 : index
    %c0_22 = arith.constant 0 : index
    %30 = vector.load %arg9[%c0_21, %c0_22] : memref<1x896xf32, #tpu.memory_space<vmem>>, vector<1x896xf32>
    %31 = vector.broadcast %30 : vector<1x896xf32> to vector<64x896xf32>
    %32 = arith.addf %29, %31 : vector<64x896xf32>
    %33 = math.tanh %32 : vector<64x896xf32>
    %c0_23 = arith.constant 0 : index
    %c0_24 = arith.constant 0 : index
    %34 = vector.load %arg10[%c0_23, %c0_24] : memref<64x896xf32, #tpu.memory_space<vmem>>, vector<64x896xf32>
    tpu.vector_store %arg10[%c0_23, %c0_24], %33 {strides = array<i32>} : memref<64x896xf32, #tpu.memory_space<vmem>>, vector<64x896xf32>,
    return
  }
  func.func @transform_0(%arg0: i32) -> (i32, i32) {
    %c0_i32 = arith.constant 0 : i32
    %c0_i32_0 = arith.constant 0 : i32
    return %arg0, %c0_i32 : i32, i32
  }
  func.func @transform_1(%arg0: i32) -> (i32, i32) {
    %c0_i32 = arith.constant 0 : i32
    %c0_i32_0 = arith.constant 0 : i32
    %c0_i32_1 = arith.constant 0 : i32
    return %c0_i32, %c0_i32_0 : i32, i32
  }
  func.func @transform_2(%arg0: i32) -> (i32, i32) {
    %c0_i32 = arith.constant 0 : i32
    %c0_i32_0 = arith.constant 0 : i32
    %c0_i32_1 = arith.constant 0 : i32
    return %c0_i32, %c0_i32_0 : i32, i32
  }
  func.func @transform_3(%arg0: i32) -> (i32, i32) {
    %c0_i32 = arith.constant 0 : i32
    %c0_i32_0 = arith.constant 0 : i32
    %c0_i32_1 = arith.constant 0 : i32
    return %c0_i32, %c0_i32_0 : i32, i32
  }
  func.func @transform_4(%arg0: i32) -> (i32, i32) {
    %c0_i32 = arith.constant 0 : i32
    %c0_i32_0 = arith.constant 0 : i32
    %c0_i32_1 = arith.constant 0 : i32
    return %c0_i32, %c0_i32_0 : i32, i32
  }
  func.func @transform_5(%arg0: i32) -> (i32, i32) {
    %c0_i32 = arith.constant 0 : i32
    %c0_i32_0 = arith.constant 0 : i32
    %c0_i32_1 = arith.constant 0 : i32
    return %c0_i32, %c0_i32_0 : i32, i32
  }
  func.func @transform_6(%arg0: i32) -> (i32, i32) {
    %c0_i32 = arith.constant 0 : i32
    %c0_i32_0 = arith.constant 0 : i32
    %c0_i32_1 = arith.constant 0 : i32
    return %c0_i32, %c0_i32_0 : i32, i32
  }
  func.func @transform_7(%arg0: i32) -> (i32, i32) {
    %c0_i32 = arith.constant 0 : i32
    %c0_i32_0 = arith.constant 0 : i32
    %c0_i32_1 = arith.constant 0 : i32
    return %c0_i32, %c0_i32_0 : i32, i32
  }
  func.func @transform_8(%arg0: i32) -> (i32, i32) {
    %c0_i32 = arith.constant 0 : i32
    %c0_i32_0 = arith.constant 0 : i32
    %c0_i32_1 = arith.constant 0 : i32
    return %c0_i32, %c0_i32_0 : i32, i32
  }
  func.func @transform_9(%arg0: i32) -> (i32, i32) {
    %c0_i32 = arith.constant 0 : i32
    %c0_i32_0 = arith.constant 0 : i32
    return %arg0, %c0_i32 : i32, i32
  }
}

</mosaic_0001>

<bundles_post_ra>
// kernel: tpu_custom_call.1
= control target key start
LH: loop header
LB: loop body
LE: loop exit
PB: predicated region body
PF: predicated region fallthrough
CT: control target
= control target key end

     0   :  { %14 = vsyncpa [#allocation3], 0  ;;  %s11117_s0 = inlined_call_operand.hbm [shape: bf16[64,128], index: 0, kind: input, shape index: {}]   ;;  %s11118_s1 = inlined_call_operand.hbm [shape: bf16[128,256], index: 1, kind: input, shape index: {}]   ;;  %s11119_s2 = inlined_call_operand.hbm [shape: f32[1,256], index: 2, kind: input, shape index: {}]   ;;  %s11120_s3 = inlined_call_operand.hbm [shape: bf16[256,512], index: 3, kind: input, shape index: {}]   ;;  %s11121_s4 = inlined_call_operand.hbm [shape: f32[1,512], index: 4, kind: input, shape index: {}]   ;;  %s11122_s5 = inlined_call_operand.hbm [shape: bf16[512,1024], index: 5, kind: input, shape index: {}]   ;;  %s11123_s6 = inlined_call_operand.hbm [shape: f32[1,1024], index: 6, kind: input, shape index: {}]   ;;  %s11124_s7 = inlined_call_operand.hbm [shape: bf16[1024,896], index: 7, kind: input, shape index: {}]   ;;  %s11125_s8 = inlined_call_operand.hbm [shape: f32[1,896], index: 8, kind: input, shape index: {}]   ;;  %s11126_s9 = inlined_call_operand.hbm [shape: f32[64,896], index: 9, kind: output, shape index: {}]  }
   0x1   :  { %15 = vsyncpa [#allocation6], 0 }
   0x2   :  { %16 = vsyncpa [#allocation9], 0 }
   0x3   :  { %17 = vsyncpa [#allocation12], 0 }
   0x4   :  { %18 = vsyncpa [#allocation15], 0 }
   0x5   :  { %19 = vsyncpa [#allocation4], 0  ;;  %s9554_s30 = smov [#allocation5]  }
   0x6   :  { %s37_s10 = sshll.u32 %s9554_s30, 4  ;;  %s38_s10 = int_to_ptr.vmem [resolvable:$true] %s37_s10 }
   0x7   :  { %s9350_s11 = scalar_lea.vmem %s38_s10, 2048  ;;  %p9355_p1 = scmp.lt.s32.totalorder %s38_s10, %s38_s10 }
   0x8   :  { %p9351_p0 = scmp.ne.s32.totalorder %s38_s10, %s9350_s11  ;;  %p9356_p2 = scmp.lt.s32.totalorder %s9350_s11, %s9350_s11 }
   0xa   :  { %p9357_p3 = por %p9356_p2, %p9355_p1 }
   0xc   :  { %p9358_p4 = pnand %p9357_p3, %p9351_p0 }
   0xe   :  { %9361 = shalt.err (!%p9358_p4)
}
   0xf   :  { %s9555_s12 = smov 128   ;;  %s9556_s13 = smov 8  }
  0x10   :  { %43 = dma.hbm_to_vmem [thread:$0]  %s11118_s1, 2048, %s38_s10, [#allocation6], %s9555_s12, %s9555_s12, %s9556_s13  }
  0x11   :  { %s9557_s16 = smov [#allocation8]  }
  0x12   :  { %s59_s17 = sshll.u32 %s9557_s16, 4  ;;  %s60_s17 = int_to_ptr.vmem [resolvable:$true] %s59_s17 }
  0x13   :  { %s9370_s18 = scalar_lea.vmem %s60_s17, 8192  ;;  %p9375_p6 = scmp.lt.s32.totalorder %s60_s17, %s60_s17 }
  0x14   :  { %p9371_p5 = scmp.ne.s32.totalorder %s60_s17, %s9370_s18  ;;  %p9376_p7 = scmp.lt.s32.totalorder %s9370_s18, %s9370_s18 }
  0x16   :  { %p9377_p8 = por %p9376_p7, %p9375_p6 }
  0x18   :  { %p9378_p9 = pnand %p9377_p8, %p9371_p5 }
  0x1a   :  { %9381 = shalt.err (!%p9378_p9)
}
  0x1b   :  { %s9558_s19 = smov 256   ;;  %s9559_s20 = smov 16  }
  0x1c   :  { %65 = dma.hbm_to_vmem [thread:$0]  %s11120_s3, 8192, %s60_s17, [#allocation9], %s9558_s19, %s9558_s19, %s9559_s20  }
  0x1d   :  { %s9560_s23 = smov [#allocation11]  }
  0x1e   :  { %s81_s24 = sshll.u32 %s9560_s23, 4  ;;  %s82_s24 = int_to_ptr.vmem [resolvable:$true] %s81_s24 }
  0x1f   :  { %s9390_s1 = scalar_lea.vmem %s82_s24, 32768  ;;  %p9395_p11 = scmp.lt.s32.totalorder %s82_s24, %s82_s24 }
  0x20   :  { %p9391_p10 = scmp.ne.s32.totalorder %s82_s24, %s9390_s1  ;;  %p9396_p12 = scmp.lt.s32.totalorder %s9390_s1, %s9390_s1 }
  0x22   :  { %p9397_p13 = por %p9396_p12, %p9395_p11 }
  0x24   :  { %p9398_p0 = pnand %p9397_p13, %p9391_p10 }
  0x26   :  { %9401 = shalt.err (!%p9398_p0)
}
  0x27   :  { %s9561_s25 = smov 512   ;;  %s9562_s26 = smov 32  }
  0x28   :  { %87 = dma.hbm_to_vmem [thread:$0]  %s11122_s5, 32768, %s82_s24, [#allocation12], %s9561_s25, %s9561_s25, %s9562_s26  }
  0x29   :  { %s9563_s29 = smov [#allocation14]  }
  0x2a   :  { %s103_s30 = sshll.u32 %s9563_s29, 4  ;;  %s104_s30 = int_to_ptr.vmem [resolvable:$true] %s103_s30 }
  0x2b   :  { %s9410_s3 = scalar_lea.vmem %s104_s30, 57344  ;;  %p9415_p2 = scmp.lt.s32.totalorder %s104_s30, %s104_s30 }
  0x2c   :  { %p9411_p1 = scmp.ne.s32.totalorder %s104_s30, %s9410_s3  ;;  %p9416_p3 = scmp.lt.s32.totalorder %s9410_s3, %s9410_s3 }
  0x2e   :  { %p9417_p4 = por %p9416_p3, %p9415_p2 }
  0x30   :  { %p9418_p5 = pnand %p9417_p4, %p9411_p1 }
  0x32   :  { %9421 = shalt.err (!%p9418_p5)
}
  0x33   :  { %s9564_s10 = smov 448   ;;  %s9565_s11 = smov 28  }
  0x34   :  { %109 = dma.hbm_to_vmem [thread:$0]  %s11124_s7, 57344, %s104_s30, [#allocation15], %s9564_s10, %s9564_s10, %s9565_s11  }
  0x35   :  { %s9566_s14 = smov [#allocation2]  }
  0x36   :  { %s25_s15 = sshll.u32 %s9566_s14, 4  ;;  %s26_s15 = int_to_ptr.vmem [resolvable:$true] %s25_s15 }
  0x37   :  { %s9430_s5 = scalar_lea.vmem %s26_s15, 512  ;;  %p9435_p7 = scmp.lt.s32.totalorder %s26_s15, %s26_s15 }
  0x38   :  { %p9431_p6 = scmp.ne.s32.totalorder %s26_s15, %s9430_s5  ;;  %p9436_p8 = scmp.lt.s32.totalorder %s9430_s5, %s9430_s5 }
  0x3a   :  { %p9437_p9 = por %p9436_p8, %p9435_p7 }
  0x3c   :  { %p9438_p10 = pnand %p9437_p9, %p9431_p6 }
  0x3e   :  { %9441 = shalt.err (!%p9438_p10)
}
  0x3f   :  { %s9567_s16 = smov 64   ;;  %s9568_s17 = smov 4  }
  0x40   :  { %31 = dma.hbm_to_vmem [thread:$0]  %s11117_s0, 512, %s26_s15, [#allocation3], %s9567_s16, %s9567_s16, %s9568_s17  }
  0x41   :  { %s9569_s20 = smov [#allocation7]   ;;  %s9570_s7 = smov [#allocation10]  }
  0x42   :  { %s50_s21 = sshll.u32 %s9569_s20, 4  ;;  %s72_s22 = sshll.u32 %s9570_s7, 4  ;;  %s51_s21 = int_to_ptr.vmem [resolvable:$true] %s50_s21  ;;  %s73_s22 = int_to_ptr.vmem [resolvable:$true] %s72_s22 }
  0x43   :  { %s9450_s23 = scalar_lea.vmem %s51_s21, 32  ;;  %p9455_p12 = scmp.lt.s32.totalorder %s51_s21, %s51_s21 }
  0x44   :  { %p9451_p11 = scmp.ne.s32.totalorder %s51_s21, %s9450_s23  ;;  %p9456_p13 = scmp.lt.s32.totalorder %s9450_s23, %s9450_s23 }
  0x46   :  { %p9457_p0 = por %p9456_p13, %p9455_p12 }
  0x48   :  { %p9458_p1 = pnand %p9457_p0, %p9451_p11 }
  0x4a   :  { %9461 = shalt.err (!%p9458_p1)
}
  0x4b   :  { %53 = dma.hbm_to_vmem [thread:$0]  %s11119_s2, 32, %s51_s21, [#allocation6]  }
  0x4c   :  { %s9470_s25 = scalar_lea.vmem %s73_s22, 64  ;;  %p9475_p3 = scmp.lt.s32.totalorder %s73_s22, %s73_s22 }
  0x4d   :  { %p9471_p2 = scmp.ne.s32.totalorder %s73_s22, %s9470_s25  ;;  %p9476_p4 = scmp.lt.s32.totalorder %s9470_s25, %s9470_s25 }
  0x4f   :  { %p9477_p5 = por %p9476_p4, %p9475_p3 }
  0x51   :  { %p9478_p6 = pnand %p9477_p5, %p9471_p2 }
  0x53   :  { %9481 = shalt.err (!%p9478_p6)
}
  0x54   :  { %75 = dma.hbm_to_vmem [thread:$0]  %s11121_s4, 64, %s73_s22, [#allocation9]  }
  0x55   :  { %s9571_s27 = smov [#allocation13]   ;;  %s9572_s29 = smov [#allocation16]  }
  0x56   :  { %s94_s28 = sshll.u32 %s9571_s27, 4  ;;  %s116_s30 = sshll.u32 %s9572_s29, 4  ;;  %s95_s28 = int_to_ptr.vmem [resolvable:$true] %s94_s28  ;;  %s117_s30 = int_to_ptr.vmem [resolvable:$true] %s116_s30 }
  0x57   :  { %s9490_s3 = scalar_lea.vmem %s95_s28, 128  ;;  %p9495_p8 = scmp.lt.s32.totalorder %s95_s28, %s95_s28 }
  0x58   :  { %p9491_p7 = scmp.ne.s32.totalorder %s95_s28, %s9490_s3  ;;  %p9496_p9 = scmp.lt.s32.totalorder %s9490_s3, %s9490_s3 }
  0x5a   :  { %p9497_p10 = por %p9496_p9, %p9495_p8 }
  0x5c   :  { %p9498_p11 = pnand %p9497_p10, %p9491_p7 }
  0x5e   :  { %9501 = shalt.err (!%p9498_p11)
}
  0x5f   :  { %97 = dma.hbm_to_vmem [thread:$0]  %s11123_s6, 128, %s95_s28, [#allocation12]  }
  0x60   :  { %s9510_s11 = scalar_lea.vmem %s117_s30, 112  ;;  %s9514_s4 = scalar_lea.vmem %s117_s30, 128 }
  0x61   :  { %p9511_p12 = scmp.ne.s32.totalorder %s117_s30, %s9510_s11  ;;  %p9515_p13 = scmp.lt.s32.totalorder %s117_s30, %s117_s30 }
  0x62   :  { %p9516_p0 = scmp.lt.s32.totalorder %s9514_s4, %s9510_s11 }
  0x64   :  { %p9517_p1 = por %p9516_p0, %p9515_p13 }
  0x66   :  { %p9518_p2 = pnand %p9517_p1, %p9511_p12 }
  0x68   :  { %9521 = shalt.err (!%p9518_p2)
}
  0x69   :  { %119 = dma.hbm_to_vmem [thread:$0]  %s11125_s8, 112, %s117_s30, [#allocation15]  }
  0x6a   :  { %9542 = dma.done.wait [#allocation3], 512  }
  0x6b   :  { %9543 = vsyncadd [#allocation3], 4294966784 }
  0x6c   :  { %9544 = dma.done.wait [#allocation6], 2080  }
  0x6d   :  { %9545 = vsyncadd [#allocation6], 4294965216 }
  0x6e   :  { %9546 = dma.done.wait [#allocation9], 8256  }
  0x6f   :  { %9547 = vsyncadd [#allocation9], 4294959040 }
  0x70   :  { %9548 = dma.done.wait [#allocation12], 32896  }
  0x71   :  { %9549 = vsyncadd [#allocation12], 4294934400 }
  0x72   :  { %9550 = dma.done.wait [#allocation15], 57456  }
  0x73   :  { %9551 = vsyncadd [#allocation15], 4294909840  ;;  %v9573_v0 = vmov 0   ;;  %v8464_v1 = vld [vmem:[#allocation5 + $0x74] ss:$8 sps:$4 sm:$0xff]   ;;  %v8488_v27 = vld [vmem:[#allocation2] sm:$0xff]  }
  0x74   :  { %320 = vmatprep.mubr.bf16.mxu0 %v9573_v0  ;;  %v8466_v2 = vld [vmem:[#allocation5 + $0x70] ss:$8 sps:$4 sm:$0xff]   ;;  %288 = vmatprep.subr.bf16.mxu0 %v8464_v1  ;;  %v8467_v3 = vld [vmem:[#allocation5 + $0x64] ss:$8 sps:$4 sm:$0xff]   ;;  %v8469_v4 = vld [vmem:[#allocation5 + $0x60] ss:$8 sps:$4 sm:$0xff]  }
  0x75   :  { %289 = vmatpush1.bf16.msra.mxu0 %v8466_v2  ;;  %v8470_v5 = vld [vmem:[#allocation5 + $0x54] ss:$8 sps:$4 sm:$0xff]   ;;  %v8472_v6 = vld [vmem:[#allocation5 + $0x50] ss:$8 sps:$4 sm:$0xff]   ;;  %v8473_v7 = vld [vmem:[#allocation5 + $0x44] ss:$8 sps:$4 sm:$0xff]  }
  0x76   :  { %290 = vmatprep.subr.bf16.mxu0 %v8467_v3  ;;  %v8475_v8 = vld [vmem:[#allocation5 + $0x40] ss:$8 sps:$4 sm:$0xff]   ;;  %v8476_v9 = vld [vmem:[#allocation5 + $0x34] ss:$8 sps:$4 sm:$0xff]   ;;  %v8478_v10 = vld [vmem:[#allocation5 + $0x30] ss:$8 sps:$4 sm:$0xff]  }
  0x77   :  { %v8492_v11 = vld [vmem:[#allocation8 + $0xe4] ss:$16 sps:$4 sm:$0xff]   ;;  %v8497_v13 = vld [vmem:[#allocation8 + $0xe0] ss:$16 sps:$4 sm:$0xff]   ;;  %v8496_v24 = vld [vmem:[#allocation8 + $0xec] ss:$16 sps:$4 sm:$0xff]  }
  0x78   :  { %v8479_v12 = vld [vmem:[#allocation5 + $0x24] ss:$8 sps:$4 sm:$0xff]   ;;  %807 = vmatprep.subr.bf16.mxu1 %v8492_v11  ;;  %v8481_v15 = vld [vmem:[#allocation5 + $0x20] ss:$8 sps:$4 sm:$0xff]   ;;  %v8482_v16 = vld [vmem:[#allocation5 + $0x14] ss:$8 sps:$4 sm:$0xff]  }
  0x79   :  { %291 = vmatpush1.bf16.msra.mxu0 %v8469_v4  ;;  %v8498_v14 = vld [vmem:[#allocation8 + $0xc4] ss:$16 sps:$4 sm:$0xff]   ;;  %808 = vmatpush1.bf16.msra.mxu1 %v8497_v13  ;;  %v8503_v17 = vld [vmem:[#allocation8 + $0xc0] ss:$16 sps:$4 sm:$0xff]   ;;  %v8494_v28 = vld [vmem:[#allocation8 + $0xe8] ss:$16 sps:$4 sm:$0xff]  }
  0x7a   :  { %292 = vmatprep.subr.bf16.mxu0 %v8470_v5  ;;  %809 = vmatprep.subr.bf16.mxu1 %v8498_v14  ;;  %v8504_v18 = vld [vmem:[#allocation8 + $0xa4] ss:$16 sps:$4 sm:$0xff]   ;;  %v8509_v20 = vld [vmem:[#allocation8 + $0xa0] ss:$16 sps:$4 sm:$0xff]   ;;  %v8502_v29 = vld [vmem:[#allocation8 + $0xcc] ss:$16 sps:$4 sm:$0xff]  }
  0x7b   :  { %v8484_v19 = vld [vmem:[#allocation5 + $0x10] ss:$8 sps:$4 sm:$0xff]   ;;  %v8485_v21 = vld [vmem:[#allocation5 + $0x4] ss:$8 sps:$4 sm:$0xff]   ;;  %v8487_v23 = vld [vmem:[#allocation5] ss:$8 sps:$4 sm:$0xff]  }
  0x7c   :  { %v8510_v22 = vld [vmem:[#allocation8 + $0x84] ss:$16 sps:$4 sm:$0xff]   ;;  %v8515_v25 = vld [vmem:[#allocation8 + $0x80] ss:$16 sps:$4 sm:$0xff]   ;;  %v8500_v32 = vld [vmem:[#allocation8 + $0xc8] ss:$16 sps:$4 sm:$0xff]  }
  0x7d   :  { %293 = vmatpush1.bf16.msra.mxu0 %v8472_v6  ;;  %810 = vmatpush1.bf16.msra.mxu1 %v8503_v17  ;;  %v8516_v26 = vld [vmem:[#allocation8 + $0x64] ss:$16 sps:$4 sm:$0xff]   ;;  %v8521_v30 = vld [vmem:[#allocation8 + $0x60] ss:$16 sps:$4 sm:$0xff]   ;;  %v8508_v33 = vld [vmem:[#allocation8 + $0xac] ss:$16 sps:$4 sm:$0xff]  }
  0x7e   :  { %294 = vmatprep.subr.bf16.mxu0 %v8473_v7  ;;  %811 = vmatprep.subr.bf16.mxu1 %v8504_v18  ;;  %v8522_v31 = vld [vmem:[#allocation8 + $0x44] ss:$16 sps:$4 sm:$0xff]   ;;  %v8527_v34 = vld [vmem:[#allocation8 + $0x40] ss:$16 sps:$4 sm:$0xff]   ;;  %v8506_v37 = vld [vmem:[#allocation8 + $0xa8] ss:$16 sps:$4 sm:$0xff]  }
  0x7f   :  { %v8528_v35 = vld [vmem:[#allocation8 + $0x24] ss:$16 sps:$4 sm:$0xff]   ;;  %v8514_v38 = vld [vmem:[#allocation8 + $0x8c] ss:$16 sps:$4 sm:$0xff]   ;;  %v8533_v39 = vld [vmem:[#allocation8 + $0x20] ss:$16 sps:$4 sm:$0xff]  }
  0x80   :  { %v8489_v36 = vld [vmem:[#allocation2 + $0x8] sm:$0xff]   ;;  %v8490_v43 = vld [vmem:[#allocation2 + $0x10] sm:$0xff]   ;;  %v8491_v54 = vld [vmem:[#allocation2 + $0x18] sm:$0xff]   ;;  %s9574_s6 = smov [#allocation17]  }
  0x81   :  { %295 = vmatpush1.bf16.msra.mxu0 %v8475_v8  ;;  %812 = vmatpush1.bf16.msra.mxu1 %v8509_v20  ;;  %v8534_v40 = vld [vmem:[#allocation8 + $0x4] ss:$16 sps:$4 sm:$0xff]   ;;  %v8512_v41 = vld [vmem:[#allocation8 + $0x88] ss:$16 sps:$4 sm:$0xff]   ;;  %v8520_v42 = vld [vmem:[#allocation8 + $0x6c] ss:$16 sps:$4 sm:$0xff]  }
  0x82   :  { %296 = vmatprep.subr.bf16.mxu0 %v8476_v9  ;;  %813 = vmatprep.subr.bf16.mxu1 %v8510_v22  ;;  %v8539_v44 = vld [vmem:[#allocation8] ss:$16 sps:$4 sm:$0xff]   ;;  %v8540_v45 = vld [vmem:[#allocation8 + $0x1e4] ss:$16 sps:$4 sm:$0xff]   ;;  %v8518_v46 = vld [vmem:[#allocation8 + $0x68] ss:$16 sps:$4 sm:$0xff]  }
  0x83   :  { %v8526_v47 = vld [vmem:[#allocation8 + $0x4c] ss:$16 sps:$4 sm:$0xff]   ;;  %v8545_v48 = vld [vmem:[#allocation8 + $0x1e0] ss:$16 sps:$4 sm:$0xff]   ;;  %v8546_v49 = vld [vmem:[#allocation8 + $0x1c4] ss:$16 sps:$4 sm:$0xff]  }
  0x84   :  { %v8524_v50 = vld [vmem:[#allocation8 + $0x48] ss:$16 sps:$4 sm:$0xff]   ;;  %v8532_v51 = vld [vmem:[#allocation8 + $0x2c] ss:$16 sps:$4 sm:$0xff]   ;;  %v8551_v52 = vld [vmem:[#allocation8 + $0x1c0] ss:$16 sps:$4 sm:$0xff]  }
  0x85   :  { %297 = vmatpush1.bf16.msra.mxu0 %v8478_v10  ;;  %814 = vmatpush1.bf16.msra.mxu1 %v8515_v25  ;;  %v8552_v53 = vld [vmem:[#allocation8 + $0x1a4] ss:$16 sps:$4 sm:$0xff]   ;;  %v8530_v55 = vld [vmem:[#allocation8 + $0x28] ss:$16 sps:$4 sm:$0xff]   ;;  %v8538_v56 = vld [vmem:[#allocation8 + $0xc] ss:$16 sps:$4 sm:$0xff]  }
  0x86   :  { %298 = vmatprep.subr.bf16.mxu0 %v8479_v12  ;;  %815 = vmatprep.subr.bf16.mxu1 %v8516_v26  ;;  %v8557_v57 = vld [vmem:[#allocation8 + $0x1a0] ss:$16 sps:$4 sm:$0xff]   ;;  %v8558_v58 = vld [vmem:[#allocation8 + $0x184] ss:$16 sps:$4 sm:$0xff]   ;;  %v8536_v59 = vld [vmem:[#allocation8 + $0x8] ss:$16 sps:$4 sm:$0xff]  }
  0x87   :  { %v8544_v60 = vld [vmem:[#allocation8 + $0x1ec] ss:$16 sps:$4 sm:$0xff]   ;;  %v8563_v61 = vld [vmem:[#allocation8 + $0x180] ss:$16 sps:$4 sm:$0xff]   ;;  %v8542_v62 = vld [vmem:[#allocation8 + $0x1e8] ss:$16 sps:$4 sm:$0xff]  }
  0x88   :  { %v8550_v63 = vld [vmem:[#allocation8 + $0x1cc] ss:$16 sps:$4 sm:$0xff]   ;;  %v8554_v2 = vld [vmem:[#allocation8 + $0x1a8] ss:$16 sps:$4 sm:$0xff]   ;;  %v8564_v5 = vld [vmem:[#allocation8 + $0x164] ss:$16 sps:$4 sm:$0xff]  }
  0x89   :  { %299 = vmatpush1.bf16.msra.mxu0 %v8481_v15  ;;  %816 = vmatpush1.bf16.msra.mxu1 %v8521_v30  ;;  %v8556_v1 = vld [vmem:[#allocation8 + $0x1ac] ss:$16 sps:$4 sm:$0xff]   ;;  %v8560_v4 = vld [vmem:[#allocation8 + $0x188] ss:$16 sps:$4 sm:$0xff]   ;;  %v8569_v8 = vld [vmem:[#allocation8 + $0x160] ss:$16 sps:$4 sm:$0xff]  }
  0x8a   :  { %300 = vmatprep.subr.bf16.mxu0 %v8482_v16  ;;  %817 = vmatprep.subr.bf16.mxu1 %v8522_v31  ;;  %v8562_v3 = vld [vmem:[#allocation8 + $0x18c] ss:$16 sps:$4 sm:$0xff]   ;;  %v8566_v7 = vld [vmem:[#allocation8 + $0x168] ss:$16 sps:$4 sm:$0xff]   ;;  %v8570_v9 = vld [vmem:[#allocation8 + $0x144] ss:$16 sps:$4 sm:$0xff]  }
  0x8b   :  { %v8568_v6 = vld [vmem:[#allocation8 + $0x16c] ss:$16 sps:$4 sm:$0xff]   ;;  %v8572_v11 = vld [vmem:[#allocation8 + $0x148] ss:$16 sps:$4 sm:$0xff]   ;;  %v8575_v12 = vld [vmem:[#allocation8 + $0x140] ss:$16 sps:$4 sm:$0xff]  }
  0x8c   :  { %v8574_v10 = vld [vmem:[#allocation8 + $0x14c] ss:$16 sps:$4 sm:$0xff]   ;;  %v8576_v13 = vld [vmem:[#allocation8 + $0x124] ss:$16 sps:$4 sm:$0xff]   ;;  %v8578_v15 = vld [vmem:[#allocation8 + $0x128] ss:$16 sps:$4 sm:$0xff]  }
  0x8d   :  { %301 = vmatpush1.bf16.msra.mxu0 %v8484_v19  ;;  %818 = vmatpush1.bf16.msra.mxu1 %v8527_v34  ;;  %v8580_v14 = vld [vmem:[#allocation8 + $0x12c] ss:$16 sps:$4 sm:$0xff]   ;;  %v8581_v16 = vld [vmem:[#allocation8 + $0x120] ss:$16 sps:$4 sm:$0xff]   ;;  %v8582_v17 = vld [vmem:[#allocation8 + $0x104] ss:$16 sps:$4 sm:$0xff]  }
  0x8e   :  { %302 = vmatprep.subr.bf16.mxu0 %v8485_v21  ;;  %819 = vmatprep.subr.bf16.mxu1 %v8528_v35  ;;  %v8586_v18 = vld [vmem:[#allocation8 + $0x10c] ss:$16 sps:$4 sm:$0xff]   ;;  %v8584_v19 = vld [vmem:[#allocation8 + $0x108] ss:$16 sps:$4 sm:$0xff]   ;;  %v8587_v20 = vld [vmem:[#allocation8 + $0x100] ss:$16 sps:$4 sm:$0xff]  }
  0x8f   :  { %v9658_v21 = vld [vmem:[#allocation11 + $0x1c0] sm:$0xff]  ;;  %v172_v31 = vld [vmem:[#allocation7] sm:$0x3]  ;;  %s7461_s8 = sshll.u32 %s9574_s6, 4  ;;  %s7462_s8 = int_to_ptr.vmem [resolvable:$true] %s7461_s8 }
  0x90   :  { %v9660_v22 = vld [vmem:[#allocation11 + $0x1e0] sm:$0xff]  ;;  %s9522_s14 = scalar_lea.vmem %s7462_s8, 7168  ;;  %p9527_p4 = scmp.lt.s32.totalorder %s7462_s8, %s7462_s8 }
  0x91   :  { %303 = vmatpush1.bf16.msra.mxu0 %v8487_v23  ;;  %820 = vmatpush1.bf16.msra.mxu1 %v8533_v39  ;;  %v9662_v23 = vld [vmem:[#allocation11 + $0x5c0] sm:$0xff]  ;;  %v7618_v25 = vcombine.high %v9658_v21, %v9660_v22  ;;  %p9523_p3 = scmp.ne.s32.totalorder %s7462_s8, %s9522_s14  ;;  %p9528_p5 = scmp.lt.s32.totalorder %s9522_s14, %s9522_s14 }
  0x92   :  { %880 = vmatprep.subr.bf16.mxu0 %v8496_v24  ;;  %821 = vmatprep.subr.bf16.mxu1 %v8534_v40  ;;  %v7617_v24 = vcombine.low %v9658_v21, %v9660_v22  ;;  %v9668_v26 = vld [vmem:[#allocation11 + $0x5e0] sm:$0xff] }
  0x93   :  { %p9529_p6 = por %p9528_p5, %p9527_p4 }
  0x94   :  { %321 = vmatmul.mubr.bf16.vlgmr.msra.gmra.mxu0 %v8488_v27  ;;  %v7745_v27 = vcombine.low %v9662_v23, %v9668_v26 }
  0x95   :  { %330 = vmatprep.mubr.bf16.mxu0 %v9573_v0  ;;  %881 = vmatpush1.bf16.msra.mxu0 %v8494_v28  ;;  %v7746_v28 = vcombine.high %v9662_v23, %v9668_v26  ;;  %v9714_v23 = vld [vmem:[#allocation11 + $0x500] sm:$0xff]  ;;  %p9530_p7 = pnand %p9529_p6, %p9523_p3 }
  0x96   :  { %882 = vmatprep.subr.bf16.mxu0 %v8502_v29  ;;  %822 = vmatpush1.bf16.msra.mxu1 %v8539_v44  ;;  %v174_v29 = vlaneseq }
  0x97   :  { %823 = vmatprep.subr.bf16.mxu1 %v8540_v45 }
  0x98   :  { %v9674_v30 = vshrl.u32 %v174_v29, 7 }
  0x99   :  { %883 = vmatpush1.bf16.msra.mxu0 %v8500_v32 }
  0x9a   :  { %884 = vmatprep.subr.bf16.mxu0 %v8508_v33  ;;  %824 = vmatpush2.bf16.msra.mxu1 %v8545_v48  ;;  %11167 = vst [vmem:[#allocation24_spill] sm:$0xff] %v9674_v30  ;;  %v9677_v32 = vsub.s32 0, %v9674_v30  ;;  %v9680_v33 = vsub.s32 1, %v9674_v30 }
  0x9b   :  { %825 = vmatprep.subr.bf16.mxu1 %v8546_v49 }
  0x9c   :  { %331 = vmatmul.mubr.bf16.gmra.mxu0 %v8489_v36  ;;  %v9683_v34 = vrot.slane %v172_v31, %v9677_v32  ;;  %v9686_v35 = vrot.slane %v172_v31, %v9680_v33 }
  0x9d   :  { %340 = vmatprep.mubr.bf16.mxu0 %v9573_v0  ;;  %885 = vmatpush1.bf16.msra.mxu0 %v8506_v37 }
  0x9e   :  { %886 = vmatprep.subr.bf16.mxu0 %v8514_v38  ;;  %826 = vmatpush2.bf16.msra.mxu1 %v8551_v52  ;;  %v1209_v52 = vld [vmem:[#allocation11 + $0x580] sm:$0xff] }
  0x9f   :  { %827 = vmatprep.subr.bf16.mxu1 %v8552_v53  ;;  %v1213_v53 = vld [vmem:[#allocation11 + $0x5a0] sm:$0xff] }
  0xa1   :  { %887 = vmatpush1.bf16.msra.mxu0 %v8512_v41 }
  0xa2   :  { %888 = vmatprep.subr.bf16.mxu0 %v8520_v42  ;;  %828 = vmatpush2.bf16.msra.mxu1 %v8557_v57 }
  0xa3   :  { %829 = vmatprep.subr.bf16.mxu1 %v8558_v58 }
  0xa4   :  { %341 = vmatmul.mubr.bf16.gmra.mxu0 %v8490_v43 }
  0xa5   :  { %350 = vmatprep.mubr.bf16.mxu0 %v9573_v0  ;;  %889 = vmatpush1.bf16.msra.mxu0 %v8518_v46  ;;  %v8548_v0 = vld [vmem:[#allocation8 + $0x1c8] ss:$16 sps:$4 sm:$0xff]  }
  0xa6   :  { %890 = vmatprep.subr.bf16.mxu0 %v8526_v47  ;;  %830 = vmatpush2.bf16.msra.mxu1 %v8563_v61 }
  0xa7   :  { %831 = vmatprep.subr.bf16.mxu1 %v8564_v5 }
  0xa9   :  { %891 = vmatpush1.bf16.msra.mxu0 %v8524_v50  ;;  %v1081_v50 = vld [vmem:[#allocation11 + $0x180] sm:$0xff] }
  0xaa   :  { %892 = vmatprep.subr.bf16.mxu0 %v8532_v51  ;;  %832 = vmatpush2.bf16.msra.mxu1 %v8569_v8  ;;  %v1085_v51 = vld [vmem:[#allocation11 + $0x1a0] sm:$0xff]  ;;  %v7738_v8 = vcombine.high %v1209_v52, %v1213_v53 }
  0xab   :  { %833 = vmatprep.subr.bf16.mxu1 %v8570_v9 }
  0xac   :  { %351 = vmatmul.mubr.bf16.gmra.mxu0 %v8491_v54 }
  0xad   :  { %893 = vmatpush1.bf16.msra.mxu0 %v8530_v55 }
  0xae   :  { %894 = vmatprep.subr.bf16.mxu0 %v8538_v56  ;;  %834 = vmatpush2.bf16.msra.mxu1 %v8575_v12 }
  0xaf   :  { %835 = vmatprep.subr.bf16.mxu1 %v8576_v13  ;;  %v7609_v13 = vcombine.low %v1081_v50, %v1085_v51 }
  0xb1   :  { %895 = vmatpush1.bf16.msra.mxu0 %v8536_v59 }
  0xb2   :  { %896 = vmatprep.subr.bf16.mxu0 %v8544_v60  ;;  %836 = vmatpush2.bf16.msra.mxu1 %v8581_v16 }
  0xb3   :  { %837 = vmatprep.subr.bf16.mxu1 %v8582_v17 }
  0xb5   :  { %897 = vmatpush2.bf16.msra.mxu0 %v8542_v62 }
  0xb6   :  { %898 = vmatprep.subr.bf16.mxu0 %v8550_v63  ;;  %838 = vmatpush2.bf16.msra.mxu1 %v8587_v20  ;;  %v9712_v20 = vld [vmem:[#allocation11 + $0x120] sm:$0xff] }
  0xb7   :  { %2611 = vmatprep.subr.bf16.mxu1 %v7618_v25  ;;  %v1197_v25 = vld [vmem:[#allocation11 + $0x520] sm:$0xff] }
  0xb9   :  { %899 = vmatpush2.bf16.msra.mxu0 %v8548_v0 }
  0xba   :  { %900 = vmatprep.subr.bf16.mxu0 %v8556_v1  ;;  %v9695_v1 = vld [vmem:[#allocation11 + $0x140] sm:$0xff] }
  0xbd   :  { %901 = vmatpush2.bf16.msra.mxu0 %v8554_v2  ;;  %v9697_v2 = vld [vmem:[#allocation11 + $0x160] sm:$0xff] }
  0xbe   :  { %902 = vmatprep.subr.bf16.mxu0 %v8562_v3  ;;  %v9699_v3 = vld [vmem:[#allocation11 + $0x540] sm:$0xff] }
  0xc1   :  { %903 = vmatpush2.bf16.msra.mxu0 %v8560_v4  ;;  %v9701_v4 = vld [vmem:[#allocation11 + $0x560] sm:$0xff] }
  0xc2   :  { %904 = vmatprep.subr.bf16.mxu0 %v8568_v6  ;;  %v7730_v29 = vcombine.high %v9699_v3, %v9701_v4 }
  0xc5   :  { %905 = vmatpush2.bf16.msra.mxu0 %v8566_v7  ;;  %v7610_v7 = vcombine.high %v1081_v50, %v1085_v51 }
  0xc6   :  { %906 = vmatprep.subr.bf16.mxu0 %v8574_v10 }
  0xc9   :  { %907 = vmatpush2.bf16.msra.mxu0 %v8572_v11 }
  0xca   :  { %908 = vmatprep.subr.bf16.mxu0 %v8580_v14  ;;  %v7737_v14 = vcombine.low %v1209_v52, %v1213_v53  ;;  %v7721_v53 = vcombine.low %v9714_v23, %v1197_v25 }
  0xcd   :  { %909 = vmatpush2.bf16.msra.mxu0 %v8578_v15 }
  0xce   :  { %910 = vmatprep.subr.bf16.mxu0 %v8586_v18 }
  0xd1   :  { %911 = vmatpush2.bf16.msra.mxu0 %v8584_v19  ;;  %v9710_v19 = vld [vmem:[#allocation11 + $0x100] sm:$0xff] }
  0xd2   :  { %2684 = vmatprep.subr.bf16.mxu0 %v7746_v28  ;;  %v7602_v28 = vcombine.high %v9695_v1, %v9697_v2  ;;  %v7593_v52 = vcombine.low %v9710_v19, %v9712_v20 }
 0x154   :  { %v322_v36 = vpop.f32.mrf.mxu0 }
 0x155   :  { %v323_v37 = vadd.f32 %v322_v36, %v9683_v34  ;;  %v7601_v36 = vcombine.low %v9695_v1, %v9697_v2  ;;  %v1177_v1 = vld [vmem:[#allocation11 + $0x480] sm:$0xff] }
 0x156   :  { %v324_v38 = vpop.f32.mrf.mxu0  ;;  %v1181_v2 = vld [vmem:[#allocation11 + $0x4a0] sm:$0xff] }
 0x157   :  { %v361_v39 = vmul.f32 0.2, %v323_v37  ;;  %v325_v40 = vadd.f32 %v324_v38, %v9686_v35 }
 0x158   :  { %v326_v41 = vpop.f32.mrf.mxu0 }
 0x159   :  { %v362_v42 = vmul.f32 0.2, %v325_v40  ;;  %v327_v43 = vadd.f32 %v326_v41, %v9683_v34  ;;  %v377_v60 = vmax.f32 %v323_v37, %v361_v39  ;;  %v9727_v41 = vld [vmem:[#allocation11 + $0xc0] sm:$0xff] }
 0x15a   :  { %v328_v44 = vpop.f32.mrf.mxu0 }
 0x15b   :  { %v363_v45 = vmul.f32 0.2, %v327_v43  ;;  %v329_v46 = vadd.f32 %v328_v44, %v9686_v35  ;;  %v378_v56 = vmax.f32 %v325_v40, %v362_v42  ;;  %v7729_v40 = vcombine.low %v9699_v3, %v9701_v4  ;;  %v9729_v42 = vld [vmem:[#allocation11 + $0xe0] sm:$0xff] }
 0x15c   :  { %v332_v47 = vpop.f32.mrf.mxu0  ;;  %v7594_v44 = vcombine.high %v9710_v19, %v9712_v20  ;;  %v1173_v19 = vld [vmem:[#allocation11 + $0x460] sm:$0xff] }
 0x15d   :  { %v364_v48 = vmul.f32 0.2, %v329_v46  ;;  %v333_v49 = vadd.f32 %v332_v47, %v9683_v34  ;;  %v379_v54 = vmax.f32 %v327_v43, %v363_v45  ;;  %v7722_v45 = vcombine.high %v9714_v23, %v1197_v25 }
 0x15e   :  { %v334_v55 = vpop.f32.mrf.mxu0 }
 0x15f   :  { %v365_v57 = vmul.f32 0.2, %v333_v49  ;;  %v335_v58 = vadd.f32 %v334_v55, %v9686_v35  ;;  %v380_v59 = vmax.f32 %v329_v46, %v364_v48  ;;  %v393_v6 = vpack.c.bf16 %v379_v54, %v377_v60  ;;  %v1185_v48 = vld [vmem:[#allocation11 + $0x4c0] sm:$0xff] }
 0x160   :  { %v336_v61 = vpop.f32.mrf.mxu0 }
 0x161   :  { %v366_v62 = vmul.f32 0.2, %v335_v58  ;;  %v337_v63 = vadd.f32 %v336_v61, %v9683_v34  ;;  %v394_v0 = vpack.c.bf16 %v380_v59, %v378_v56  ;;  %v381_v11 = vmax.f32 %v333_v49, %v365_v57  ;;  %v1189_v49 = vld [vmem:[#allocation11 + $0x4e0] sm:$0xff] }
 0x162   :  { %v338_v5 = vpop.f32.mrf.mxu0  ;;  %v7586_v59 = vcombine.high %v9727_v41, %v9729_v42  ;;  %v7714_v60 = vcombine.high %v1185_v48, %v1189_v49  ;;  %v1049_v61 = vld [vmem:[#allocation11 + $0x80] sm:$0xff] }
 0x163   :  { %v367_v9 = vmul.f32 0.2, %v337_v63  ;;  %v339_v10 = vadd.f32 %v338_v5, %v9686_v35  ;;  %839 = vmatprep.mubr.bf16.mxu1 %v394_v0  ;;  %912 = vmatprep.mubr.bf16.mxu0 %v394_v0  ;;  %v382_v15 = vmax.f32 %v335_v58, %v366_v62  ;;  %v1053_v0 = vld [vmem:[#allocation11 + $0xa0] sm:$0xff] }
 0x164   :  { %v342_v12 = vpop.f32.mrf.mxu0  ;;  %840 = vmatmul.mubr.bf16.vlgmr.msra.gmra.mxu1 %v393_v6  ;;  %913 = vmatmul.mubr.bf16.vlgmr.msra.gmra.mxu0 %v393_v6  ;;  %v7585_v6 = vcombine.low %v9727_v41, %v9729_v42  ;;  %v1153_v42 = vld [vmem:[#allocation11 + $0x3c0] sm:$0xff] }
 0x165   :  { %v383_v16 = vmax.f32 %v337_v63, %v367_v9  ;;  %v368_v17 = vmul.f32 0.2, %v339_v10  ;;  %v9705_v18 = vadd.f32 %v342_v12, %v9683_v34  ;;  %2612 = vmatpush1.bf16.msra.mxu1 %v7617_v24  ;;  %2685 = vmatpush1.bf16.msra.mxu0 %v7745_v27  ;;  %v7578_v12 = vcombine.high %v1049_v61, %v1053_v0 }
 0x166   :  { %v344_v26 = vpop.f32.mrf.mxu0  ;;  %2613 = vmatprep.subr.bf16.mxu1 %v7610_v7  ;;  %2686 = vmatprep.subr.bf16.mxu0 %v7738_v8 }
 0x167   :  { %v384_v31 = vmax.f32 %v339_v10, %v368_v17  ;;  %v369_v21 = vmul.f32 0.2, %v9705_v18  ;;  %v345_v22 = vadd.f32 %v344_v26, %v9686_v35  ;;  %v395_v27 = vpack.c.bf16 %v383_v16, %v381_v11  ;;  %v1045_v17 = vld [vmem:[#allocation11 + $0x60] sm:$0xff] }
 0x168   :  { %v346_v24 = vpop.f32.mrf.mxu0  ;;  %v7713_v10 = vcombine.low %v1185_v48, %v1189_v49 }
 0x169   :  { %v370_v37 = vmul.f32 0.2, %v345_v22  ;;  %v347_v38 = vadd.f32 %v346_v24, %v9683_v34  ;;  %v396_v39 = vpack.c.bf16 %v384_v31, %v382_v15  ;;  %2614 = vmatpush1.bf16.msra.mxu1 %v7609_v13  ;;  %2687 = vmatpush1.bf16.msra.mxu0 %v7737_v14  ;;  %v385_v50 = vmax.f32 %v9705_v18, %v369_v21  ;;  %v1041_v14 = vld [vmem:[#allocation11 + $0x40] sm:$0xff] }
 0x16a   :  { %v348_v43 = vpop.f32.mrf.mxu0  ;;  %2615 = vmatprep.subr.bf16.mxu1 %v7602_v28  ;;  %2688 = vmatprep.subr.bf16.mxu0 %v7730_v29  ;;  %v7706_v13 = vcombine.high %v1177_v1, %v1181_v2  ;;  %v1169_v18 = vld [vmem:[#allocation11 + $0x440] sm:$0xff]  ;;  %v7705_v28 = vcombine.low %v1177_v1, %v1181_v2  ;;  %v7570_v29 = vcombine.high %v1041_v14, %v1045_v17 }
 0x16b   :  { %v371_v46 = vmul.f32 0.2, %v347_v38  ;;  %v349_v47 = vadd.f32 %v348_v43, %v9686_v35  ;;  %849 = vmatprep.mubr.bf16.mxu1 %v396_v39  ;;  %922 = vmatprep.mubr.bf16.mxu0 %v396_v39  ;;  %v386_v54 = vmax.f32 %v345_v22, %v370_v37  ;;  %v7698_v31 = vcombine.high %v1169_v18, %v1173_v19  ;;  %v1037_v22 = vld [vmem:[#allocation11 + $0x20] sm:$0xff] }
 0x16c   :  { %v352_v51 = vpop.f32.mrf.mxu0  ;;  %850 = vmatmul.mubr.bf16.gmra.mxu1 %v395_v27  ;;  %923 = vmatmul.mubr.bf16.gmra.mxu0 %v395_v27  ;;  %v1161_v24 = vld [vmem:[#allocation11 + $0x400] sm:$0xff]  ;;  %v7697_v39 = vcombine.low %v1169_v18, %v1173_v19 }
 0x16d   :  { %v387_v55 = vmax.f32 %v347_v38, %v371_v46  ;;  %v372_v56 = vmul.f32 0.2, %v349_v47  ;;  %v353_v57 = vadd.f32 %v352_v51, %v9683_v34  ;;  %2616 = vmatpush1.bf16.msra.mxu1 %v7601_v36  ;;  %2689 = vmatpush1.bf16.msra.mxu0 %v7729_v40  ;;  %v1165_v27 = vld [vmem:[#allocation11 + $0x420] sm:$0xff]  ;;  %v7569_v38 = vcombine.low %v1041_v14, %v1045_v17 }
 0x16e   :  { %v354_v58 = vpop.f32.mrf.mxu0  ;;  %2617 = vmatprep.subr.bf16.mxu1 %v7594_v44  ;;  %2690 = vmatprep.subr.bf16.mxu0 %v7722_v45  ;;  %v7690_v41 = vcombine.high %v1161_v24, %v1165_v27  ;;  %v1157_v43 = vld [vmem:[#allocation11 + $0x3e0] sm:$0xff] }
 0x16f   :  { %v388_v62 = vmax.f32 %v349_v47, %v372_v56  ;;  %v355_v63 = vadd.f32 %v354_v58, %v9686_v35  ;;  %v373_v3 = vmul.f32 0.2, %v353_v57  ;;  %v397_v5 = vpack.c.bf16 %v387_v55, %v385_v50  ;;  %v1281_v44 = vld [vmem:[#allocation11 + $0x7c0] sm:$0xff] }
 0x170   :  { %v356_v4 = vpop.f32.mrf.mxu0  ;;  %v1285_v45 = vld [vmem:[#allocation11 + $0x7e0] sm:$0xff]  ;;  %v7689_v47 = vcombine.low %v1161_v24, %v1165_v27  ;;  %v7682_v48 = vcombine.high %v1153_v42, %v1157_v43 }
 0x171   :  { %v374_v7 = vmul.f32 0.2, %v355_v63  ;;  %v357_v8 = vadd.f32 %v356_v4, %v9683_v34  ;;  %v398_v9 = vpack.c.bf16 %v388_v62, %v386_v54  ;;  %2618 = vmatpush1.bf16.msra.mxu1 %v7593_v52  ;;  %2691 = vmatpush1.bf16.msra.mxu0 %v7721_v53  ;;  %v389_v20 = vmax.f32 %v353_v57, %v373_v3  ;;  %v1145_v50 = vld [vmem:[#allocation11 + $0x380] sm:$0xff] }
 0x172   :  { %v358_v11 = vpop.f32.mrf.mxu0  ;;  %2619 = vmatprep.subr.bf16.mxu1 %v7586_v59  ;;  %2692 = vmatprep.subr.bf16.mxu0 %v7714_v60  ;;  %v7577_v34 = vcombine.low %v1049_v61, %v1053_v0  ;;  %v7810_v49 = vcombine.high %v1281_v44, %v1285_v45  ;;  %v1149_v51 = vld [vmem:[#allocation11 + $0x3a0] sm:$0xff]  ;;  %v7681_v54 = vcombine.low %v1153_v42, %v1157_v43 }
 0x173   :  { %v375_v15 = vmul.f32 0.2, %v357_v8  ;;  %v359_v16 = vadd.f32 %v358_v11, %v9686_v35  ;;  %859 = vmatprep.mubr.bf16.mxu1 %v398_v9  ;;  %932 = vmatprep.mubr.bf16.mxu0 %v398_v9  ;;  %v390_v23 = vmax.f32 %v355_v63, %v374_v7  ;;  %v1033_v35 = vld [vmem:[#allocation11] sm:$0xff]  ;;  %v7809_v55 = vcombine.low %v1281_v44, %v1285_v45 }
 0x174   :  { %860 = vmatmul.mubr.bf16.gmra.mxu1 %v397_v5  ;;  %933 = vmatmul.mubr.bf16.gmra.mxu0 %v397_v5  ;;  %v7562_v40 = vcombine.high %v1033_v35, %v1037_v22  ;;  %v7561_v46 = vcombine.low %v1033_v35, %v1037_v22  ;;  %v1273_v52 = vld [vmem:[#allocation11 + $0x780] sm:$0xff]  ;;  %v7674_v56 = vcombine.high %v1145_v50, %v1149_v51 }
 0x175   :  { %v391_v25 = vmax.f32 %v357_v8, %v375_v15  ;;  %v376_v26 = vmul.f32 0.2, %v359_v16  ;;  %2620 = vmatpush1.bf16.msra.mxu1 %v7585_v6  ;;  %2693 = vmatpush1.bf16.msra.mxu0 %v7713_v10  ;;  %v1277_v53 = vld [vmem:[#allocation11 + $0x7a0] sm:$0xff]  ;;  %v7673_v62 = vcombine.low %v1145_v50, %v1149_v51  ;;  %v9755_v51 = vld [vmem:[#allocation11 + $0x5e8] sm:$0xff] }
 0x176   :  { %2621 = vmatprep.subr.bf16.mxu1 %v7578_v12  ;;  %2694 = vmatprep.subr.bf16.mxu0 %v7706_v13  ;;  %v7802_v57 = vcombine.high %v1273_v52, %v1277_v53  ;;  %v1137_v58 = vld [vmem:[#allocation11 + $0x340] sm:$0xff]  ;;  %v7801_v63 = vcombine.low %v1273_v52, %v1277_v53 }
 0x177   :  { %v392_v21 = vmax.f32 %v359_v16, %v376_v26  ;;  %v399_v36 = vpack.c.bf16 %v391_v25, %v389_v20  ;;  %v1141_v59 = vld [vmem:[#allocation11 + $0x360] sm:$0xff] }
 0x178   :  { %v1265_v60 = vld [vmem:[#allocation11 + $0x740] sm:$0xff]  ;;  %v7666_v0 = vcombine.high %v1137_v58, %v1141_v59  ;;  %v7665_v6 = vcombine.low %v1137_v58, %v1141_v59 }
 0x179   :  { %v400_v37 = vpack.c.bf16 %v392_v21, %v390_v23  ;;  %2622 = vmatpush1.bf16.msra.mxu1 %v7577_v34  ;;  %2695 = vmatpush1.bf16.msra.mxu0 %v7705_v28  ;;  %v1269_v61 = vld [vmem:[#allocation11 + $0x760] sm:$0xff] }
 0x17a   :  { %2623 = vmatprep.subr.bf16.mxu1 %v7570_v29  ;;  %2696 = vmatprep.subr.bf16.mxu0 %v7698_v31  ;;  %v7794_v1 = vcombine.high %v1265_v60, %v1269_v61  ;;  %v1129_v2 = vld [vmem:[#allocation11 + $0x300] sm:$0xff]  ;;  %v7793_v7 = vcombine.low %v1265_v60, %v1269_v61  ;;  %v9775_v60 = vld [vmem:[#allocation11 + $0x188] sm:$0xff] }
 0x17b   :  { %869 = vmatprep.mubr.bf16.mxu1 %v400_v37  ;;  %942 = vmatprep.mubr.bf16.mxu0 %v400_v37  ;;  %v1133_v3 = vld [vmem:[#allocation11 + $0x320] sm:$0xff] }
 0x17c   :  { %870 = vmatmul.mubr.bf16.gmra.mxu1 %v399_v36  ;;  %943 = vmatmul.mubr.bf16.gmra.mxu0 %v399_v36  ;;  %v1257_v4 = vld [vmem:[#allocation11 + $0x700] sm:$0xff]  ;;  %v7658_v8 = vcombine.high %v1129_v2, %v1133_v3  ;;  %v7657_v14 = vcombine.low %v1129_v2, %v1133_v3 }
 0x17d   :  { %2624 = vmatpush1.bf16.msra.mxu1 %v7569_v38  ;;  %2697 = vmatpush1.bf16.msra.mxu0 %v7697_v39  ;;  %v1261_v5 = vld [vmem:[#allocation11 + $0x720] sm:$0xff] }
 0x17e   :  { %2625 = vmatprep.subr.bf16.mxu1 %v7562_v40  ;;  %2698 = vmatprep.subr.bf16.mxu0 %v7690_v41  ;;  %v7786_v9 = vcombine.high %v1257_v4, %v1261_v5  ;;  %v1121_v10 = vld [vmem:[#allocation11 + $0x2c0] sm:$0xff]  ;;  %v7785_v15 = vcombine.low %v1257_v4, %v1261_v5  ;;  %v9789_v4 = vld [vmem:[#allocation11 + $0x148] sm:$0xff] }
 0x17f   :  { %v1125_v11 = vld [vmem:[#allocation11 + $0x2e0] sm:$0xff]  ;;  %v9791_v5 = vld [vmem:[#allocation11 + $0x168] sm:$0xff] }
 0x180   :  { %v1249_v12 = vld [vmem:[#allocation11 + $0x6c0] sm:$0xff]  ;;  %v7650_v16 = vcombine.high %v1121_v10, %v1125_v11  ;;  %v7649_v18 = vcombine.low %v1121_v10, %v1125_v11  ;;  %v9801_v10 = vld [vmem:[#allocation11 + $0x108] sm:$0xff] }
 0x181   :  { %2626 = vmatpush1.bf16.msra.mxu1 %v7561_v46  ;;  %2699 = vmatpush1.bf16.msra.mxu0 %v7689_v47  ;;  %v1253_v13 = vld [vmem:[#allocation11 + $0x6e0] sm:$0xff]  ;;  %v9747_v47 = vld [vmem:[#allocation11 + $0x1c8] sm:$0xff] }
 0x182   :  { %2627 = vmatprep.subr.bf16.mxu1 %v7682_v48  ;;  %2700 = vmatprep.subr.bf16.mxu0 %v7810_v49  ;;  %v7778_v17 = vcombine.high %v1249_v12, %v1253_v13  ;;  %v7777_v19 = vcombine.low %v1249_v12, %v1253_v13  ;;  %v1113_v20 = vld [vmem:[#allocation11 + $0x280] sm:$0xff]  ;;  %v9749_v48 = vld [vmem:[#allocation11 + $0x1e8] sm:$0xff] }
 0x183   :  { %v1117_v34 = vld [vmem:[#allocation11 + $0x2a0] sm:$0xff]  ;;  %v9751_v49 = vld [vmem:[#allocation11 + $0x5c8] sm:$0xff]  ;;  %v7620_v50 = vcombine.high %v9747_v47, %v9749_v48  ;;  %v7619_v52 = vcombine.low %v9747_v47, %v9749_v48 }
 0x184   :  { %v1241_v23 = vld [vmem:[#allocation11 + $0x680] sm:$0xff]  ;;  %v7642_v25 = vcombine.high %v1113_v20, %v1117_v34  ;;  %v7641_v28 = vcombine.low %v1113_v20, %v1117_v34  ;;  %v7747_v53 = vcombine.low %v9751_v49, %v9755_v51 }
 0x185   :  { %2628 = vmatpush2.bf16.msra.mxu1 %v7681_v54  ;;  %2701 = vmatpush2.bf16.msra.mxu0 %v7809_v55  ;;  %v1245_v26 = vld [vmem:[#allocation11 + $0x6a0] sm:$0xff]  ;;  %v7748_v54 = vcombine.high %v9751_v49, %v9755_v51  ;;  %v9764_v55 = vsub.s32 2, %v9674_v30 }
 0x186   :  { %2629 = vmatprep.subr.bf16.mxu1 %v7674_v56  ;;  %2702 = vmatprep.subr.bf16.mxu0 %v7802_v57  ;;  %v7769_v29 = vcombine.low %v1241_v23, %v1245_v26  ;;  %v7770_v31 = vcombine.high %v1241_v23, %v1245_v26  ;;  %v1105_v35 = vld [vmem:[#allocation11 + $0x240] sm:$0xff]  ;;  %v465_v56 = vld [vmem:[#allocation10] sm:$0xf]  ;;  %v9767_v57 = vsub.s32 3, %v9674_v30 }
 0x187   :  { %v1109_v21 = vld [vmem:[#allocation11 + $0x260] sm:$0xff]  ;;  %11168 = vst [vmem:[#allocation25_spill] sm:$0xff] %v9764_v55  ;;  %v9770_v58 = vrot.slane %v465_v56, %v9677_v32  ;;  %v9773_v59 = vrot.slane %v465_v56, %v9764_v55  ;;  %v9778_v61 = vrot.slane %v465_v56, %v9680_v33 }
 0x188   :  { %v1233_v22 = vld [vmem:[#allocation11 + $0x640] sm:$0xff]  ;;  %v7634_v24 = vcombine.high %v1105_v35, %v1109_v21  ;;  %v7633_v36 = vcombine.low %v1105_v35, %v1109_v21  ;;  %11169 = vst [vmem:[#allocation26_spill] sm:$0xff] %v9767_v57  ;;  %v9826_v21 = vld [vmem:[#allocation11 + $0xc8] sm:$0xff] }
 0x189   :  { %2630 = vmatpush2.bf16.msra.mxu1 %v7673_v62  ;;  %2703 = vmatpush2.bf16.msra.mxu0 %v7801_v63  ;;  %v1237_v27 = vld [vmem:[#allocation11 + $0x660] sm:$0xff]  ;;  %v9781_v62 = vrot.slane %v465_v56, %v9767_v57  ;;  %v9783_v63 = vld [vmem:[#allocation11 + $0x1a8] sm:$0xff] }
 0x18a   :  { %2631 = vmatprep.subr.bf16.mxu1 %v7666_v0  ;;  %2704 = vmatprep.subr.bf16.mxu0 %v7794_v1  ;;  %v7761_v37 = vcombine.low %v1233_v22, %v1237_v27  ;;  %v7762_v38 = vcombine.high %v1233_v22, %v1237_v27  ;;  %v1097_v39 = vld [vmem:[#allocation11 + $0x200] sm:$0xff]  ;;  %v9785_v0 = vld [vmem:[#allocation11 + $0x588] sm:$0xff]  ;;  %v7611_v13 = vcombine.low %v9775_v60, %v9783_v63 }
 0x18b   :  { %v1101_v40 = vld [vmem:[#allocation11 + $0x220] sm:$0xff]  ;;  %v9787_v1 = vld [vmem:[#allocation11 + $0x5a8] sm:$0xff] }
 0x18c   :  { %v1225_v41 = vld [vmem:[#allocation11 + $0x600] sm:$0xff]  ;;  %v7626_v42 = vcombine.high %v1097_v39, %v1101_v40  ;;  %v7625_v44 = vcombine.low %v1097_v39, %v1101_v40  ;;  %v7740_v34 = vcombine.high %v9785_v0, %v9787_v1  ;;  %v9828_v22 = vld [vmem:[#allocation11 + $0xe8] sm:$0xff] }
 0x18d   :  { %2632 = vmatpush2.bf16.msra.mxu1 %v7665_v6  ;;  %2705 = vmatpush2.bf16.msra.mxu0 %v7793_v7  ;;  %v1229_v43 = vld [vmem:[#allocation11 + $0x620] sm:$0xff] }
 0x18e   :  { %2633 = vmatprep.subr.bf16.mxu1 %v7658_v8  ;;  %2706 = vmatprep.subr.bf16.mxu0 %v7786_v9  ;;  %v7753_v45 = vcombine.low %v1225_v41, %v1229_v43  ;;  %v7754_v46 = vcombine.high %v1225_v41, %v1229_v43  ;;  %v9797_v8 = vld [vmem:[#allocation11 + $0x548] sm:$0xff] }
 0x18f   :  { %v9799_v9 = vld [vmem:[#allocation11 + $0x568] sm:$0xff] }
 0x191   :  { %2634 = vmatpush2.bf16.msra.mxu1 %v7657_v14  ;;  %2707 = vmatpush2.bf16.msra.mxu0 %v7785_v15  ;;  %v7612_v14 = vcombine.high %v9775_v60, %v9783_v63  ;;  %v7739_v15 = vcombine.low %v9785_v0, %v9787_v1  ;;  %v9930_v0 = vld [vmem:[#allocation11 + $0xa8] sm:$0xff] }
 0x192   :  { %2635 = vmatprep.subr.bf16.mxu1 %v7650_v16  ;;  %2708 = vmatprep.subr.bf16.mxu0 %v7778_v17  ;;  %v9809_v16 = vld [vmem:[#allocation11 + $0x128] sm:$0xff] }
 0x193   :  { %v9811_v17 = vld [vmem:[#allocation11 + $0x508] sm:$0xff] }
 0x195   :  { %2636 = vmatpush2.bf16.msra.mxu1 %v7649_v18  ;;  %2709 = vmatpush2.bf16.msra.mxu0 %v7777_v19  ;;  %v9813_v18 = vld [vmem:[#allocation11 + $0x528] sm:$0xff] }
 0x196   :  { %2637 = vmatprep.subr.bf16.mxu1 %v7642_v25  ;;  %2710 = vmatprep.subr.bf16.mxu0 %v7770_v31 }
 0x199   :  { %2638 = vmatpush2.bf16.msra.mxu1 %v7641_v28  ;;  %2711 = vmatpush2.bf16.msra.mxu0 %v7769_v29 }
 0x19a   :  { %2639 = vmatprep.subr.bf16.mxu1 %v7634_v24  ;;  %2712 = vmatprep.subr.bf16.mxu0 %v7762_v38 }
 0x19d   :  { %2640 = vmatpush2.bf16.msra.mxu1 %v7633_v36  ;;  %2713 = vmatpush2.bf16.msra.mxu0 %v7761_v37 }
 0x19e   :  { %2641 = vmatprep.subr.bf16.mxu1 %v7626_v42  ;;  %2714 = vmatprep.subr.bf16.mxu0 %v7754_v46 }
 0x1a1   :  { %2642 = vmatpush2.bf16.msra.mxu1 %v7625_v44  ;;  %2715 = vmatpush2.bf16.msra.mxu0 %v7753_v45 }
 0x1a2   :  { %2757 = vmatprep.subr.bf16.mxu1 %v7620_v50  ;;  %2830 = vmatprep.subr.bf16.mxu0 %v7748_v54 }
 0x224   :  { %v841_v2 = vpop.f32.mrf.mxu1  ;;  %v914_v3 = vpop.f32.mrf.mxu0 }
 0x225   :  { %v842_v6 = vadd.f32 %v841_v2, %v9770_v58  ;;  %v9795_v7 = vadd.f32 %v914_v3, %v9773_v59 }
 0x226   :  { %v843_v11 = vpop.f32.mrf.mxu1  ;;  %v916_v12 = vpop.f32.mrf.mxu0 }
 0x227   :  { %v844_v19 = vadd.f32 %v843_v11, %v9778_v61  ;;  %v917_v20 = vadd.f32 %v916_v12, %v9781_v62  ;;  %v953_v25 = vmul.f32 0.2, %v842_v6  ;;  %v955_v26 = vmul.f32 0.2, %v9795_v7 }
 0x228   :  { %v845_v28 = vpop.f32.mrf.mxu1  ;;  %v918_v29 = vpop.f32.mrf.mxu0 }
 0x229   :  { %v954_v38 = vmul.f32 0.2, %v844_v19  ;;  %v956_v39 = vmul.f32 0.2, %v917_v20  ;;  %v846_v40 = vadd.f32 %v845_v28, %v9770_v58  ;;  %v919_v41 = vadd.f32 %v918_v29, %v9773_v59 }
 0x22a   :  { %v847_v42 = vpop.f32.mrf.mxu1  ;;  %v920_v43 = vpop.f32.mrf.mxu0  ;;  %v985_v54 = vmax.f32 %v842_v6, %v953_v25  ;;  %v987_v56 = vmax.f32 %v9795_v7, %v955_v26 }
 0x22b   :  { %v848_v44 = vadd.f32 %v847_v42, %v9778_v61  ;;  %v921_v45 = vadd.f32 %v920_v43, %v9781_v62  ;;  %v957_v2 = vmul.f32 0.2, %v846_v40  ;;  %v959_v3 = vmul.f32 0.2, %v919_v41 }
 0x22c   :  { %v851_v11 = vpop.f32.mrf.mxu1  ;;  %v924_v12 = vpop.f32.mrf.mxu0  ;;  %v986_v43 = vmax.f32 %v844_v19, %v954_v38  ;;  %v988_v27 = vmax.f32 %v917_v20, %v956_v39  ;;  %v7587_v19 = vcombine.low %v9826_v21, %v9828_v22 }
 0x22d   :  { %v958_v28 = vmul.f32 0.2, %v848_v44  ;;  %v960_v29 = vmul.f32 0.2, %v921_v45  ;;  %v852_v37 = vadd.f32 %v851_v11, %v9770_v58  ;;  %v9849_v42 = vadd.f32 %v924_v12, %v9773_v59 }
 0x22e   :  { %v989_v46 = vmax.f32 %v846_v40, %v957_v2  ;;  %v991_v36 = vmax.f32 %v919_v41, %v959_v3  ;;  %v853_v35 = vpop.f32.mrf.mxu1  ;;  %v926_v50 = vpop.f32.mrf.mxu0 }
 0x22f   :  { %v990_v6 = vmax.f32 %v848_v44, %v958_v28  ;;  %v992_v25 = vmax.f32 %v921_v45, %v960_v29  ;;  %v961_v7 = vmul.f32 0.2, %v852_v37  ;;  %v963_v26 = vmul.f32 0.2, %v9849_v42 }
 0x230   :  { %v9852_v31 = vpack.c.bf16 %v989_v46, %v985_v54  ;;  %v854_v24 = vadd.f32 %v853_v35, %v9778_v61  ;;  %v927_v11 = vadd.f32 %v926_v50, %v9781_v62  ;;  %v855_v23 = vpop.f32.mrf.mxu1  ;;  %v928_v12 = vpop.f32.mrf.mxu0  ;;  %v9858_v20 = vpack.c.bf16 %v991_v36, %v987_v56 }
 0x231   :  { %v9860_v38 = vpack.c.bf16 %v990_v6, %v986_v43  ;;  %v9862_v39 = vpack.c.bf16 %v992_v25, %v988_v27  ;;  %v993_v40 = vmax.f32 %v852_v37, %v961_v7  ;;  %v856_v45 = vadd.f32 %v855_v23, %v9770_v58  ;;  %v9871_v27 = vld [vmem:[#allocation11 + $0x4c8] sm:$0xff] }
 0x232   :  { %v962_v41 = vmul.f32 0.2, %v854_v24  ;;  %v964_v44 = vmul.f32 0.2, %v927_v11  ;;  %v929_v35 = vadd.f32 %v928_v12, %v9773_v59  ;;  %v857_v46 = vpop.f32.mrf.mxu1  ;;  %v930_v50 = vpop.f32.mrf.mxu0  ;;  %v995_v54 = vmax.f32 %v9849_v42, %v963_v26  ;;  %v9873_v37 = vld [vmem:[#allocation11 + $0x4e8] sm:$0xff] }
 0x233   :  { %v858_v2 = vadd.f32 %v857_v46, %v9778_v61  ;;  %v931_v36 = vadd.f32 %v930_v50, %v9781_v62  ;;  %2643 = vmatprep.mubr.bf16.mxu1 %v9860_v38  ;;  %2716 = vmatprep.mubr.bf16.mxu0 %v9862_v39  ;;  %v965_v3 = vmul.f32 0.2, %v856_v45  ;;  %v7715_v47 = vcombine.low %v9871_v27, %v9873_v37 }
 0x234   :  { %v994_v56 = vmax.f32 %v854_v24, %v962_v41  ;;  %v996_v23 = vmax.f32 %v927_v11, %v964_v44  ;;  %v967_v28 = vmul.f32 0.2, %v929_v35  ;;  %v861_v29 = vpop.f32.mrf.mxu1  ;;  %v934_v43 = vpop.f32.mrf.mxu0  ;;  %2644 = vmatmul.mubr.bf16.vlgmr.msra.gmra.mxu1 %v9852_v31  ;;  %2717 = vmatmul.mubr.bf16.vlgmr.msra.gmra.mxu0 %v9858_v20 }
 0x235   :  { %v966_v42 = vmul.f32 0.2, %v858_v2  ;;  %v968_v6 = vmul.f32 0.2, %v931_v36  ;;  %v9878_v25 = vadd.f32 %v861_v29, %v9770_v58  ;;  %v9881_v7 = vadd.f32 %v934_v43, %v9773_v59  ;;  %2758 = vmatpush1.bf16.msra.mxu1 %v7619_v52  ;;  %2831 = vmatpush1.bf16.msra.mxu0 %v7747_v53 }
 0x236   :  { %v997_v24 = vmax.f32 %v856_v45, %v965_v3  ;;  %v999_v26 = vmax.f32 %v929_v35, %v967_v28  ;;  %v863_v11 = vpop.f32.mrf.mxu1  ;;  %v936_v12 = vpop.f32.mrf.mxu0  ;;  %2759 = vmatprep.subr.bf16.mxu1 %v7612_v14  ;;  %2832 = vmatprep.subr.bf16.mxu0 %v7740_v34  ;;  %v7716_v34 = vcombine.high %v9871_v27, %v9873_v37  ;;  %v1162_v27 = vld [vmem:[#allocation11 + $0x408] sm:$0xff] }
 0x237   :  { %v998_v48 = vmax.f32 %v858_v2, %v966_v42  ;;  %v1000_v52 = vmax.f32 %v931_v36, %v968_v6  ;;  %v969_v49 = vmul.f32 0.2, %v9878_v25  ;;  %v971_v51 = vmul.f32 0.2, %v9881_v7  ;;  %v1166_v37 = vld [vmem:[#allocation11 + $0x428] sm:$0xff] }
 0x238   :  { %v9899_v53 = vpack.c.bf16 %v997_v24, %v993_v40  ;;  %v864_v41 = vadd.f32 %v863_v11, %v9778_v61  ;;  %v937_v44 = vadd.f32 %v936_v12, %v9781_v62  ;;  %v865_v14 = vpop.f32.mrf.mxu1  ;;  %v938_v45 = vpop.f32.mrf.mxu0  ;;  %v9905_v35 = vpack.c.bf16 %v999_v26, %v995_v54 }
 0x239   :  { %v9907_v46 = vpack.c.bf16 %v998_v48, %v994_v56  ;;  %v9909_v50 = vpack.c.bf16 %v1000_v52, %v996_v23  ;;  %v1001_v2 = vmax.f32 %v9878_v25, %v969_v49  ;;  %2760 = vmatpush1.bf16.msra.mxu1 %v7611_v13  ;;  %v866_v3 = vadd.f32 %v865_v14, %v9770_v58  ;;  %v9928_v13 = vld [vmem:[#allocation11 + $0x88] sm:$0xff] }
 0x23a   :  { %v970_v40 = vmul.f32 0.2, %v864_v41  ;;  %v972_v36 = vmul.f32 0.2, %v937_v44  ;;  %v939_v28 = vadd.f32 %v938_v45, %v9773_v59  ;;  %2833 = vmatpush1.bf16.msra.mxu0 %v7739_v15  ;;  %v867_v54 = vpop.f32.mrf.mxu1  ;;  %v940_v56 = vpop.f32.mrf.mxu0  ;;  %v11170_v23 = vcombine.high %v9789_v4, %v9791_v5 }
 0x23b   :  { %v1003_v29 = vmax.f32 %v9881_v7, %v971_v51  ;;  %v868_v60 = vadd.f32 %v867_v54, %v9778_v61  ;;  %v941_v63 = vadd.f32 %v940_v56, %v9781_v62  ;;  %2653 = vmatprep.mubr.bf16.mxu1 %v9907_v46  ;;  %2726 = vmatprep.mubr.bf16.mxu0 %v9909_v50  ;;  %v973_v43 = vmul.f32 0.2, %v866_v3 }
 0x23c   :  { %2761 = vmatprep.subr.bf16.mxu1 %v11170_v23  ;;  %v1002_v1 = vmax.f32 %v864_v41, %v970_v40  ;;  %v1004_v15 = vmax.f32 %v937_v44, %v972_v36  ;;  %v975_v42 = vmul.f32 0.2, %v939_v28  ;;  %v11171_v6 = vcombine.high %v9797_v8, %v9799_v9  ;;  %v871_v25 = vpop.f32.mrf.mxu1  ;;  %v944_v7 = vpop.f32.mrf.mxu0  ;;  %2654 = vmatmul.mubr.bf16.gmra.mxu1 %v9899_v53  ;;  %v9954_v40 = vld [vmem:[#allocation11 + $0x488] sm:$0xff] }
 0x23d   :  { %v974_v24 = vmul.f32 0.2, %v868_v60  ;;  %v976_v26 = vmul.f32 0.2, %v941_v63  ;;  %v9937_v11 = vadd.f32 %v871_v25, %v9770_v58  ;;  %v9940_v12 = vadd.f32 %v944_v7, %v9773_v59  ;;  %2727 = vmatmul.mubr.bf16.gmra.mxu0 %v9905_v35  ;;  %v9956_v36 = vld [vmem:[#allocation11 + $0x4a8] sm:$0xff] }
 0x23e   :  { %2834 = vmatprep.subr.bf16.mxu0 %v11171_v6  ;;  %v11172_v48 = vcombine.low %v9789_v4, %v9791_v5  ;;  %v1005_v52 = vmax.f32 %v866_v3, %v973_v43  ;;  %v1007_v49 = vmax.f32 %v939_v28, %v975_v42  ;;  %v11173_v51 = vcombine.low %v9797_v8, %v9799_v9  ;;  %v873_v41 = vpop.f32.mrf.mxu1  ;;  %v946_v44 = vpop.f32.mrf.mxu0 }
 0x23f   :  { %v11174_v14 = vcombine.high %v9801_v10, %v9809_v16  ;;  %v7580_v45 = vcombine.high %v9928_v13, %v9930_v0  ;;  %v1006_v4 = vmax.f32 %v868_v60, %v974_v24  ;;  %v1008_v5 = vmax.f32 %v941_v63, %v976_v26 }
 0x240   :  { %2762 = vmatpush1.bf16.msra.mxu1 %v11172_v48  ;;  %2835 = vmatpush1.bf16.msra.mxu0 %v11173_v51  ;;  %v977_v3 = vmul.f32 0.2, %v9937_v11  ;;  %v11175_v8 = vcombine.high %v9811_v17, %v9813_v18  ;;  %v7579_v9 = vcombine.low %v9928_v13, %v9930_v0  ;;  %v9964_v28 = vpack.c.bf16 %v1005_v52, %v1001_v2  ;;  %v875_v43 = vpop.f32.mrf.mxu1  ;;  %v948_v60 = vpop.f32.mrf.mxu0 }
 0x241   :  { %2763 = vmatprep.subr.bf16.mxu1 %v11174_v14  ;;  %v979_v54 = vmul.f32 0.2, %v9940_v12  ;;  %v874_v56 = vadd.f32 %v873_v41, %v9778_v61  ;;  %v947_v23 = vadd.f32 %v946_v44, %v9781_v62  ;;  %v9969_v63 = vpack.c.bf16 %v1007_v49, %v1003_v29 }
 0x242   :  { %2836 = vmatprep.subr.bf16.mxu0 %v11175_v8  ;;  %v9971_v42 = vpack.c.bf16 %v1006_v4, %v1002_v1  ;;  %v9973_v6 = vpack.c.bf16 %v1008_v5, %v1004_v15  ;;  %v11176_v25 = vcombine.low %v9801_v10, %v9809_v16  ;;  %v7707_v2 = vcombine.low %v9954_v40, %v9956_v36  ;;  %v877_v1 = vpop.f32.mrf.mxu1  ;;  %v950_v15 = vpop.f32.mrf.mxu0  ;;  %v1038_v8 = vld [vmem:[#allocation11 + $0x28] sm:$0xff] }
 0x243   :  { %v978_v13 = vmul.f32 0.2, %v874_v56  ;;  %v980_v0 = vmul.f32 0.2, %v947_v23  ;;  %v876_v7 = vadd.f32 %v875_v43, %v9770_v58  ;;  %v949_v24 = vadd.f32 %v948_v60, %v9773_v59  ;;  %v1042_v59 = vld [vmem:[#allocation11 + $0x48] sm:$0xff] }
 0x244   :  { %2764 = vmatpush1.bf16.msra.mxu1 %v11176_v25  ;;  %v11177_v29 = vcombine.low %v9811_v17, %v9813_v18  ;;  %v11178_v26 = vcombine.high %v9826_v21, %v9828_v22  ;;  %v878_v10 = vadd.f32 %v877_v1, %v9778_v61  ;;  %v951_v16 = vadd.f32 %v950_v15, %v9781_v62  ;;  %v1046_v17 = vld [vmem:[#allocation11 + $0x68] sm:$0xff] }
 0x245   :  { %2663 = vmatprep.mubr.bf16.mxu1 %v9971_v42  ;;  %2736 = vmatprep.mubr.bf16.mxu0 %v9973_v6  ;;  %v7708_v58 = vcombine.high %v9954_v40, %v9956_v36  ;;  %v1009_v18 = vmax.f32 %v9937_v11, %v977_v3  ;;  %v1011_v48 = vmax.f32 %v9940_v12, %v979_v54  ;;  %v981_v52 = vmul.f32 0.2, %v876_v7  ;;  %v1170_v11 = vld [vmem:[#allocation11 + $0x448] sm:$0xff] }
 0x246   :  { %2837 = vmatpush1.bf16.msra.mxu0 %v11177_v29  ;;  %2765 = vmatprep.subr.bf16.mxu1 %v11178_v26  ;;  %v983_v49 = vmul.f32 0.2, %v949_v24  ;;  %v1010_v61 = vmax.f32 %v874_v56, %v978_v13  ;;  %v1012_v62 = vmax.f32 %v947_v23, %v980_v0  ;;  %v982_v51 = vmul.f32 0.2, %v878_v10  ;;  %v1174_v12 = vld [vmem:[#allocation11 + $0x468] sm:$0xff] }
 0x247   :  { %2838 = vmatprep.subr.bf16.mxu0 %v7716_v34  ;;  %2664 = vmatmul.mubr.bf16.gmra.mxu1 %v9964_v28  ;;  %v984_v41 = vmul.f32 0.2, %v951_v16  ;;  %v1013_v44 = vmax.f32 %v876_v7, %v981_v52  ;;  %v7572_v34 = vcombine.high %v1042_v59, %v1046_v17  ;;  %v7700_v5 = vcombine.high %v1170_v11, %v1174_v12  ;;  %v1034_v3 = vld [vmem:[#allocation11 + $0x8] sm:$0xff] }
 0x248   :  { %2737 = vmatmul.mubr.bf16.gmra.mxu0 %v9969_v63  ;;  %2766 = vmatpush1.bf16.msra.mxu1 %v7587_v19  ;;  %v1015_v14 = vmax.f32 %v949_v24, %v983_v49  ;;  %v1014_v40 = vmax.f32 %v878_v10, %v982_v51  ;;  %v7571_v54 = vcombine.low %v1042_v59, %v1046_v17  ;;  %v1154_v56 = vld [vmem:[#allocation11 + $0x3c8] sm:$0xff] }
 0x249   :  { %2767 = vmatprep.subr.bf16.mxu1 %v7580_v45  ;;  %v1016_v36 = vmax.f32 %v951_v16, %v984_v41  ;;  %v10007_v4 = vpack.c.bf16 %v1013_v44, %v1009_v18  ;;  %v7564_v45 = vcombine.high %v1034_v3, %v1038_v8  ;;  %v1158_v23 = vld [vmem:[#allocation11 + $0x3e8] sm:$0xff]  ;;  %v7692_v43 = vcombine.high %v1162_v27, %v1166_v37 }
 0x24a   :  { %2839 = vmatpush1.bf16.msra.mxu0 %v7715_v47  ;;  %v10009_v21 = vpack.c.bf16 %v1015_v14, %v1011_v48  ;;  %v10011_v22 = vpack.c.bf16 %v1014_v40, %v1010_v61  ;;  %v7699_v47 = vcombine.low %v1170_v11, %v1174_v12  ;;  %v1282_v60 = vld [vmem:[#allocation11 + $0x7c8] sm:$0xff]  ;;  %v7684_v13 = vcombine.high %v1154_v56, %v1158_v23 }
 0x24b   :  { %2840 = vmatprep.subr.bf16.mxu0 %v7708_v58  ;;  %v10013_v19 = vpack.c.bf16 %v1016_v36, %v1012_v62  ;;  %v1286_v25 = vld [vmem:[#allocation11 + $0x7e8] sm:$0xff]  ;;  %v7683_v15 = vcombine.low %v1154_v56, %v1158_v23 }
 0x24c   :  { %2768 = vmatpush1.bf16.msra.mxu1 %v7579_v9  ;;  %2673 = vmatprep.mubr.bf16.mxu1 %v10011_v22  ;;  %v7563_v9 = vcombine.low %v1034_v3, %v1038_v8  ;;  %v7812_v0 = vcombine.high %v1282_v60, %v1286_v25  ;;  %v1146_v7 = vld [vmem:[#allocation11 + $0x388] sm:$0xff]  ;;  %v7811_v26 = vcombine.low %v1282_v60, %v1286_v25 }
 0x24d   :  { %2769 = vmatprep.subr.bf16.mxu1 %v7572_v34  ;;  %2746 = vmatprep.mubr.bf16.mxu0 %v10013_v19  ;;  %v1150_v24 = vld [vmem:[#allocation11 + $0x3a8] sm:$0xff] }
 0x24e   :  { %2841 = vmatpush1.bf16.msra.mxu0 %v7707_v2  ;;  %v7691_v2 = vcombine.low %v1162_v27, %v1166_v37  ;;  %v1274_v29 = vld [vmem:[#allocation11 + $0x788] sm:$0xff]  ;;  %v7676_v10 = vcombine.high %v1146_v7, %v1150_v24  ;;  %v7675_v48 = vcombine.low %v1146_v7, %v1150_v24 }
 0x24f   :  { %2842 = vmatprep.subr.bf16.mxu0 %v7700_v5  ;;  %2674 = vmatmul.mubr.bf16.gmra.mxu1 %v10007_v4  ;;  %v1278_v1 = vld [vmem:[#allocation11 + $0x7a8] sm:$0xff] }
 0x250   :  { %2747 = vmatmul.mubr.bf16.gmra.mxu0 %v10009_v21  ;;  %2770 = vmatpush1.bf16.msra.mxu1 %v7571_v54  ;;  %v7804_v16 = vcombine.high %v1274_v29, %v1278_v1  ;;  %v1138_v58 = vld [vmem:[#allocation11 + $0x348] sm:$0xff]  ;;  %v7803_v52 = vcombine.low %v1274_v29, %v1278_v1 }
 0x251   :  { %2789 = vmatprep.mubr.bf16.mxu1 %v9860_v38  ;;  %2862 = vmatprep.mubr.bf16.mxu0 %v9862_v39  ;;  %v1142_v59 = vld [vmem:[#allocation11 + $0x368] sm:$0xff] }
 0x252   :  { %2843 = vmatpush1.bf16.msra.mxu0 %v7699_v47  ;;  %2771 = vmatprep.subr.bf16.mxu1 %v7564_v45  ;;  %v1266_v17 = vld [vmem:[#allocation11 + $0x748] sm:$0xff]  ;;  %v7668_v49 = vcombine.high %v1138_v58, %v1142_v59  ;;  %v7667_v12 = vcombine.low %v1138_v58, %v1142_v59 }
 0x253   :  { %2844 = vmatprep.subr.bf16.mxu0 %v7692_v43  ;;  %v1270_v18 = vld [vmem:[#allocation11 + $0x768] sm:$0xff] }
 0x254   :  { %2772 = vmatpush1.bf16.msra.mxu1 %v7563_v9  ;;  %v7796_v61 = vcombine.high %v1266_v17, %v1270_v18  ;;  %v1130_v62 = vld [vmem:[#allocation11 + $0x308] sm:$0xff]  ;;  %v7795_v44 = vcombine.low %v1266_v17, %v1270_v18 }
 0x255   :  { %2773 = vmatprep.subr.bf16.mxu1 %v7684_v13  ;;  %v1134_v51 = vld [vmem:[#allocation11 + $0x328] sm:$0xff] }
 0x256   :  { %2845 = vmatpush1.bf16.msra.mxu0 %v7691_v2  ;;  %v1258_v41 = vld [vmem:[#allocation11 + $0x708] sm:$0xff]  ;;  %v7660_v14 = vcombine.high %v1130_v62, %v1134_v51  ;;  %v7659_v8 = vcombine.low %v1130_v62, %v1134_v51  ;;  %v1223_v62 = vld [vmem:[#allocation11 + $0x5f0] sm:$0xff] }
 0x257   :  { %2846 = vmatprep.subr.bf16.mxu0 %v7812_v0  ;;  %v1262_v11 = vld [vmem:[#allocation11 + $0x728] sm:$0xff] }
 0x258   :  { %2774 = vmatpush2.bf16.msra.mxu1 %v7683_v15  ;;  %v7788_v34 = vcombine.high %v1258_v41, %v1262_v11  ;;  %v1122_v40 = vld [vmem:[#allocation11 + $0x2c8] sm:$0xff]  ;;  %v7787_v54 = vcombine.low %v1258_v41, %v1262_v11 }
 0x259   :  { %2775 = vmatprep.subr.bf16.mxu1 %v7676_v10  ;;  %v1126_v36 = vld [vmem:[#allocation11 + $0x2e8] sm:$0xff] }
 0x25a   :  { %2847 = vmatpush2.bf16.msra.mxu0 %v7811_v26  ;;  %v1250_v5 = vld [vmem:[#allocation11 + $0x6c8] sm:$0xff]  ;;  %v7652_v27 = vcombine.high %v1122_v40, %v1126_v36  ;;  %v7651_v43 = vcombine.low %v1122_v40, %v1126_v36  ;;  %v1215_v40 = vld [vmem:[#allocation11 + $0x5b0] sm:$0xff] }
 0x25b   :  { %2848 = vmatprep.subr.bf16.mxu0 %v7804_v16  ;;  %v1254_v3 = vld [vmem:[#allocation11 + $0x6e8] sm:$0xff] }
 0x25c   :  { %2776 = vmatpush2.bf16.msra.mxu1 %v7675_v48  ;;  %v7780_v37 = vcombine.high %v1250_v5, %v1254_v3  ;;  %v1114_v47 = vld [vmem:[#allocation11 + $0x288] sm:$0xff]  ;;  %v7779_v60 = vcombine.low %v1250_v5, %v1254_v3 }
 0x25d   :  { %2777 = vmatprep.subr.bf16.mxu1 %v7668_v49  ;;  %v1118_v45 = vld [vmem:[#allocation11 + $0x2a8] sm:$0xff]  ;;  %v1095_v49 = vld [vmem:[#allocation11 + $0x1f0] sm:$0xff] }
 0x25e   :  { %2849 = vmatpush2.bf16.msra.mxu0 %v7803_v52  ;;  %v1242_v56 = vld [vmem:[#allocation11 + $0x688] sm:$0xff]  ;;  %v7644_v25 = vcombine.high %v1114_v47, %v1118_v45  ;;  %v7643_v24 = vcombine.low %v1114_v47, %v1118_v45  ;;  %v1091_v52 = vld [vmem:[#allocation11 + $0x1d0] sm:$0xff] }
 0x25f   :  { %2850 = vmatprep.subr.bf16.mxu0 %v7796_v61  ;;  %v1246_v23 = vld [vmem:[#allocation11 + $0x6a8] sm:$0xff]  ;;  %v1219_v61 = vld [vmem:[#allocation11 + $0x5d0] sm:$0xff]  ;;  %v7622_v11 = vcombine.high %v1091_v52, %v1095_v49  ;;  %v7621_v36 = vcombine.low %v1091_v52, %v1095_v49 }
 0x260   :  { %2778 = vmatpush2.bf16.msra.mxu1 %v7667_v12  ;;  %v7772_v9 = vcombine.high %v1242_v56, %v1246_v23  ;;  %v1106_v2 = vld [vmem:[#allocation11 + $0x248] sm:$0xff]  ;;  %v7771_v29 = vcombine.low %v1242_v56, %v1246_v23  ;;  %v7750_v12 = vcombine.high %v1219_v61, %v1223_v62  ;;  %v7749_v5 = vcombine.low %v1219_v61, %v1223_v62  ;;  %v1207_v47 = vld [vmem:[#allocation11 + $0x570] sm:$0xff] }
 0x261   :  { %2779 = vmatprep.subr.bf16.mxu1 %v7660_v14  ;;  %v1110_v13 = vld [vmem:[#allocation11 + $0x268] sm:$0xff]  ;;  %v1087_v14 = vld [vmem:[#allocation11 + $0x1b0] sm:$0xff] }
 0x262   :  { %2851 = vmatpush2.bf16.msra.mxu0 %v7795_v44  ;;  %v1234_v0 = vld [vmem:[#allocation11 + $0x648] sm:$0xff]  ;;  %v7636_v1 = vcombine.high %v1106_v2, %v1110_v13  ;;  %v7635_v59 = vcombine.low %v1106_v2, %v1110_v13  ;;  %v1083_v44 = vld [vmem:[#allocation11 + $0x190] sm:$0xff] }
 0x263   :  { %2852 = vmatprep.subr.bf16.mxu0 %v7788_v34  ;;  %v1238_v7 = vld [vmem:[#allocation11 + $0x668] sm:$0xff]  ;;  %v1211_v34 = vld [vmem:[#allocation11 + $0x590] sm:$0xff]  ;;  %v7614_v3 = vcombine.high %v1083_v44, %v1087_v14  ;;  %v7613_v45 = vcombine.low %v1083_v44, %v1087_v14 }
 0x264   :  { %2780 = vmatpush2.bf16.msra.mxu1 %v7659_v8  ;;  %v7764_v15 = vcombine.high %v1234_v0, %v1238_v7  ;;  %v1098_v26 = vld [vmem:[#allocation11 + $0x208] sm:$0xff]  ;;  %v7763_v17 = vcombine.low %v1234_v0, %v1238_v7  ;;  %v7742_v8 = vcombine.high %v1211_v34, %v1215_v40  ;;  %v7741_v56 = vcombine.low %v1211_v34, %v1215_v40  ;;  %v1199_v2 = vld [vmem:[#allocation11 + $0x530] sm:$0xff] }
 0x265   :  { %2781 = vmatprep.subr.bf16.mxu1 %v7652_v27  ;;  %v1102_v10 = vld [vmem:[#allocation11 + $0x228] sm:$0xff]  ;;  %v1079_v27 = vld [vmem:[#allocation11 + $0x170] sm:$0xff] }
 0x266   :  { %2853 = vmatpush2.bf16.msra.mxu0 %v7787_v54  ;;  %v1226_v16 = vld [vmem:[#allocation11 + $0x608] sm:$0xff]  ;;  %v7628_v18 = vcombine.high %v1098_v26, %v1102_v10  ;;  %v7627_v51 = vcombine.low %v1098_v26, %v1102_v10  ;;  %v1075_v54 = vld [vmem:[#allocation11 + $0x150] sm:$0xff] }
 0x267   :  { %2854 = vmatprep.subr.bf16.mxu0 %v7780_v37  ;;  %v1230_v58 = vld [vmem:[#allocation11 + $0x628] sm:$0xff]  ;;  %v1203_v37 = vld [vmem:[#allocation11 + $0x550] sm:$0xff]  ;;  %v7606_v23 = vcombine.high %v1075_v54, %v1079_v27  ;;  %v7605_v13 = vcombine.low %v1075_v54, %v1079_v27 }
 0x268   :  { %2782 = vmatpush2.bf16.msra.mxu1 %v7651_v43  ;;  %v7756_v48 = vcombine.high %v1226_v16, %v1230_v58  ;;  %v7755_v41 = vcombine.low %v1226_v16, %v1230_v58  ;;  %v7734_v43 = vcombine.high %v1203_v37, %v1207_v47  ;;  %v7733_v0 = vcombine.low %v1203_v37, %v1207_v47  ;;  %v1191_v26 = vld [vmem:[#allocation11 + $0x4f0] sm:$0xff] }
 0x269   :  { %2783 = vmatprep.subr.bf16.mxu1 %v7644_v25  ;;  %v1071_v25 = vld [vmem:[#allocation11 + $0x130] sm:$0xff] }
 0x26a   :  { %2855 = vmatpush2.bf16.msra.mxu0 %v7779_v60  ;;  %v1067_v60 = vld [vmem:[#allocation11 + $0x110] sm:$0xff] }
 0x26b   :  { %2856 = vmatprep.subr.bf16.mxu0 %v7772_v9  ;;  %v1195_v9 = vld [vmem:[#allocation11 + $0x510] sm:$0xff]  ;;  %v7598_v7 = vcombine.high %v1067_v60, %v1071_v25  ;;  %v7597_v10 = vcombine.low %v1067_v60, %v1071_v25 }
 0x26c   :  { %2784 = vmatpush2.bf16.msra.mxu1 %v7643_v24  ;;  %v7726_v24 = vcombine.high %v1195_v9, %v1199_v2  ;;  %v7725_v16 = vcombine.low %v1195_v9, %v1199_v2  ;;  %v1183_v52 = vld [vmem:[#allocation11 + $0x4b0] sm:$0xff] }
 0x26d   :  { %2785 = vmatprep.subr.bf16.mxu1 %v7636_v1  ;;  %v1063_v1 = vld [vmem:[#allocation11 + $0xf0] sm:$0xff] }
 0x26e   :  { %2857 = vmatpush2.bf16.msra.mxu0 %v7771_v29  ;;  %v1059_v29 = vld [vmem:[#allocation11 + $0xd0] sm:$0xff] }
 0x26f   :  { %2858 = vmatprep.subr.bf16.mxu0 %v7764_v15  ;;  %v1187_v15 = vld [vmem:[#allocation11 + $0x4d0] sm:$0xff]  ;;  %v7590_v58 = vcombine.high %v1059_v29, %v1063_v1  ;;  %v7589_v49 = vcombine.low %v1059_v29, %v1063_v1 }
 0x270   :  { %2786 = vmatpush2.bf16.msra.mxu1 %v7635_v59  ;;  %v7718_v59 = vcombine.high %v1187_v15, %v1191_v26  ;;  %v7717_v61 = vcombine.low %v1187_v15, %v1191_v26  ;;  %v1175_v44 = vld [vmem:[#allocation11 + $0x470] sm:$0xff] }
 0x271   :  { %2787 = vmatprep.subr.bf16.mxu1 %v7628_v18  ;;  %v1055_v18 = vld [vmem:[#allocation11 + $0xb0] sm:$0xff] }
 0x272   :  { %2859 = vmatpush2.bf16.msra.mxu0 %v7763_v17  ;;  %v1051_v17 = vld [vmem:[#allocation11 + $0x90] sm:$0xff] }
 0x273   :  { %2860 = vmatprep.subr.bf16.mxu0 %v7756_v48  ;;  %v1179_v48 = vld [vmem:[#allocation11 + $0x490] sm:$0xff]  ;;  %v7582_v62 = vcombine.high %v1051_v17, %v1055_v18  ;;  %v7581_v14 = vcombine.low %v1051_v17, %v1055_v18 }
 0x274   :  { %2788 = vmatpush2.bf16.msra.mxu1 %v7627_v51  ;;  %v7710_v51 = vcombine.high %v1179_v48, %v1183_v52  ;;  %v7709_v34 = vcombine.low %v1179_v48, %v1183_v52  ;;  %v1167_v54 = vld [vmem:[#allocation11 + $0x430] sm:$0xff] }
 0x275   :  { %2903 = vmatprep.subr.bf16.mxu1 %v7622_v11  ;;  %v1047_v11 = vld [vmem:[#allocation11 + $0x70] sm:$0xff] }
 0x276   :  { %2861 = vmatpush2.bf16.msra.mxu0 %v7755_v41  ;;  %v1043_v41 = vld [vmem:[#allocation11 + $0x50] sm:$0xff] }
 0x277   :  { %2976 = vmatprep.subr.bf16.mxu0 %v7750_v12  ;;  %2790 = vmatmul.mubr.bf16.vlgmr.msra.gmra.mxu1 %v9852_v31  ;;  %v1171_v12 = vld [vmem:[#allocation11 + $0x450] sm:$0xff]  ;;  %v7574_v40 = vcombine.high %v1043_v41, %v1047_v11  ;;  %v7573_v27 = vcombine.low %v1043_v41, %v1047_v11 }
 0x278   :  { %2799 = vmatprep.mubr.bf16.mxu1 %v9907_v46  ;;  %2904 = vmatpush1.bf16.msra.mxu1 %v7621_v36  ;;  %v7702_v36 = vcombine.high %v1171_v12, %v1175_v44  ;;  %v7701_v37 = vcombine.low %v1171_v12, %v1175_v44  ;;  %v1287_v60 = vld [vmem:[#allocation11 + $0x7f0] sm:$0xff] }
 0x279   :  { %2863 = vmatmul.mubr.bf16.vlgmr.msra.gmra.mxu0 %v9858_v20  ;;  %2905 = vmatprep.subr.bf16.mxu1 %v7614_v3  ;;  %v1039_v3 = vld [vmem:[#allocation11 + $0x30] sm:$0xff] }
 0x27a   :  { %2872 = vmatprep.mubr.bf16.mxu0 %v9909_v50  ;;  %2977 = vmatpush1.bf16.msra.mxu0 %v7749_v5  ;;  %v1035_v5 = vld [vmem:[#allocation11 + $0x10] sm:$0xff] }
 0x27b   :  { %2978 = vmatprep.subr.bf16.mxu0 %v7742_v8  ;;  %v1163_v8 = vld [vmem:[#allocation11 + $0x410] sm:$0xff]  ;;  %v7566_v47 = vcombine.high %v1035_v5, %v1039_v3  ;;  %v7565_v25 = vcombine.low %v1035_v5, %v1039_v3 }
 0x27c   :  { %2906 = vmatpush1.bf16.msra.mxu1 %v7613_v45  ;;  %v7694_v45 = vcombine.high %v1163_v8, %v1167_v54  ;;  %v7693_v9 = vcombine.low %v1163_v8, %v1167_v54  ;;  %v1279_v29 = vld [vmem:[#allocation11 + $0x7b0] sm:$0xff] }
 0x27d   :  { %2907 = vmatprep.subr.bf16.mxu1 %v7606_v23  ;;  %v1159_v23 = vld [vmem:[#allocation11 + $0x3f0] sm:$0xff] }
 0x27e   :  { %2979 = vmatpush1.bf16.msra.mxu0 %v7741_v56  ;;  %v1155_v56 = vld [vmem:[#allocation11 + $0x3d0] sm:$0xff] }
 0x27f   :  { %2800 = vmatmul.mubr.bf16.gmra.mxu1 %v9899_v53  ;;  %2980 = vmatprep.subr.bf16.mxu0 %v7734_v43  ;;  %v1283_v43 = vld [vmem:[#allocation11 + $0x7d0] sm:$0xff]  ;;  %v7686_v2 = vcombine.high %v1155_v56, %v1159_v23  ;;  %v7685_v1 = vcombine.low %v1155_v56, %v1159_v23 }
 0x280   :  { %2809 = vmatprep.mubr.bf16.mxu1 %v9971_v42  ;;  %2908 = vmatpush1.bf16.msra.mxu1 %v7605_v13  ;;  %v7814_v13 = vcombine.high %v1283_v43, %v1287_v60  ;;  %v7813_v15 = vcombine.low %v1283_v43, %v1287_v60  ;;  %v1271_v17 = vld [vmem:[#allocation11 + $0x770] sm:$0xff] }
 0x281   :  { %2873 = vmatmul.mubr.bf16.gmra.mxu0 %v9905_v35  ;;  %2909 = vmatprep.subr.bf16.mxu1 %v7598_v7  ;;  %v1151_v7 = vld [vmem:[#allocation11 + $0x3b0] sm:$0xff] }
 0x282   :  { %2882 = vmatprep.mubr.bf16.mxu0 %v9973_v6  ;;  %2981 = vmatpush1.bf16.msra.mxu0 %v7733_v0  ;;  %v1147_v0 = vld [vmem:[#allocation11 + $0x390] sm:$0xff] }
 0x283   :  { %2982 = vmatprep.subr.bf16.mxu0 %v7726_v24  ;;  %v1275_v24 = vld [vmem:[#allocation11 + $0x790] sm:$0xff]  ;;  %v7678_v26 = vcombine.high %v1147_v0, %v1151_v7  ;;  %v7677_v18 = vcombine.low %v1147_v0, %v1151_v7 }
 0x284   :  { %2910 = vmatpush1.bf16.msra.mxu1 %v7597_v10  ;;  %v7806_v10 = vcombine.high %v1275_v24, %v1279_v29  ;;  %v7805_v48 = vcombine.low %v1275_v24, %v1279_v29  ;;  %v1263_v41 = vld [vmem:[#allocation11 + $0x730] sm:$0xff] }
 0x285   :  { %2911 = vmatprep.subr.bf16.mxu1 %v7590_v58  ;;  %v1143_v58 = vld [vmem:[#allocation11 + $0x370] sm:$0xff] }
 0x286   :  { %2983 = vmatpush1.bf16.msra.mxu0 %v7725_v16  ;;  %v1139_v16 = vld [vmem:[#allocation11 + $0x350] sm:$0xff] }
 0x287   :  { %2810 = vmatmul.mubr.bf16.gmra.mxu1 %v9964_v28  ;;  %2984 = vmatprep.subr.bf16.mxu0 %v7718_v59  ;;  %v1267_v59 = vld [vmem:[#allocation11 + $0x750] sm:$0xff]  ;;  %v7670_v52 = vcombine.high %v1139_v16, %v1143_v58  ;;  %v7669_v11 = vcombine.low %v1139_v16, %v1143_v58 }
 0x288   :  { %2819 = vmatprep.mubr.bf16.mxu1 %v10011_v22  ;;  %2912 = vmatpush1.bf16.msra.mxu1 %v7589_v49  ;;  %v7798_v49 = vcombine.high %v1267_v59, %v1271_v17  ;;  %v7797_v12 = vcombine.low %v1267_v59, %v1271_v17  ;;  %v1255_v5 = vld [vmem:[#allocation11 + $0x6f0] sm:$0xff] }
 0x289   :  { %2883 = vmatmul.mubr.bf16.gmra.mxu0 %v9969_v63  ;;  %2913 = vmatprep.subr.bf16.mxu1 %v7582_v62  ;;  %v1135_v62 = vld [vmem:[#allocation11 + $0x330] sm:$0xff] }
 0x28a   :  { %2892 = vmatprep.mubr.bf16.mxu0 %v10013_v19  ;;  %2985 = vmatpush1.bf16.msra.mxu0 %v7717_v61  ;;  %v1131_v61 = vld [vmem:[#allocation11 + $0x310] sm:$0xff] }
 0x28b   :  { %2986 = vmatprep.subr.bf16.mxu0 %v7710_v51  ;;  %v1259_v51 = vld [vmem:[#allocation11 + $0x710] sm:$0xff]  ;;  %v7662_v44 = vcombine.high %v1131_v61, %v1135_v62  ;;  %v7661_v3 = vcombine.low %v1131_v61, %v1135_v62  ;;  %v1224_v61 = vld [vmem:[#allocation11 + $0x5f8] sm:$0xff] }
 0x28c   :  { %2914 = vmatpush1.bf16.msra.mxu1 %v7581_v14  ;;  %v7790_v14 = vcombine.high %v1259_v51, %v1263_v41  ;;  %v7789_v8 = vcombine.low %v1259_v51, %v1263_v41  ;;  %v1247_v56 = vld [vmem:[#allocation11 + $0x6b0] sm:$0xff] }
 0x28d   :  { %2915 = vmatprep.subr.bf16.mxu1 %v7574_v40  ;;  %v1127_v40 = vld [vmem:[#allocation11 + $0x2f0] sm:$0xff] }
 0x28e   :  { %2987 = vmatpush1.bf16.msra.mxu0 %v7709_v34  ;;  %v1123_v34 = vld [vmem:[#allocation11 + $0x2d0] sm:$0xff] }
 0x28f   :  { %2820 = vmatmul.mubr.bf16.gmra.mxu1 %v10007_v4  ;;  %2988 = vmatprep.subr.bf16.mxu0 %v7702_v36  ;;  %v1251_v36 = vld [vmem:[#allocation11 + $0x6d0] sm:$0xff]  ;;  %v7654_v54 = vcombine.high %v1123_v34, %v1127_v40  ;;  %v7653_v23 = vcombine.low %v1123_v34, %v1127_v40  ;;  %v1216_v34 = vld [vmem:[#allocation11 + $0x5b8] sm:$0xff] }
 0x290   :  { %2935 = vmatprep.mubr.bf16.mxu1 %v9860_v38  ;;  %2916 = vmatpush1.bf16.msra.mxu1 %v7573_v27  ;;  %v7782_v27 = vcombine.high %v1251_v36, %v1255_v5  ;;  %v7781_v43 = vcombine.low %v1251_v36, %v1255_v5  ;;  %v1239_v0 = vld [vmem:[#allocation11 + $0x670] sm:$0xff] }
 0x291   :  { %2893 = vmatmul.mubr.bf16.gmra.mxu0 %v10009_v21  ;;  %2917 = vmatprep.subr.bf16.mxu1 %v7566_v47  ;;  %v1119_v47 = vld [vmem:[#allocation11 + $0x2b0] sm:$0xff] }
 0x292   :  { %3008 = vmatprep.mubr.bf16.mxu0 %v9862_v39  ;;  %2989 = vmatpush1.bf16.msra.mxu0 %v7701_v37  ;;  %v1115_v37 = vld [vmem:[#allocation11 + $0x290] sm:$0xff] }
 0x293   :  { %2990 = vmatprep.subr.bf16.mxu0 %v7694_v45  ;;  %v1243_v45 = vld [vmem:[#allocation11 + $0x690] sm:$0xff]  ;;  %v7646_v60 = vcombine.high %v1115_v37, %v1119_v47  ;;  %v7645_v7 = vcombine.low %v1115_v37, %v1119_v47  ;;  %v1208_v37 = vld [vmem:[#allocation11 + $0x578] sm:$0xff] }
 0x294   :  { %2918 = vmatpush1.bf16.msra.mxu1 %v7565_v25  ;;  %v7774_v25 = vcombine.high %v1243_v45, %v1247_v56  ;;  %v7773_v24 = vcombine.low %v1243_v45, %v1247_v56  ;;  %v1231_v16 = vld [vmem:[#allocation11 + $0x630] sm:$0xff] }
 0x295   :  { %2919 = vmatprep.subr.bf16.mxu1 %v7686_v2  ;;  %v1111_v2 = vld [vmem:[#allocation11 + $0x270] sm:$0xff] }
 0x296   :  { %2991 = vmatpush1.bf16.msra.mxu0 %v7693_v9  ;;  %v1107_v9 = vld [vmem:[#allocation11 + $0x250] sm:$0xff] }
 0x297   :  { %2992 = vmatprep.subr.bf16.mxu0 %v7814_v13  ;;  %v1235_v13 = vld [vmem:[#allocation11 + $0x650] sm:$0xff]  ;;  %v7638_v29 = vcombine.high %v1107_v9, %v1111_v2  ;;  %v7637_v58 = vcombine.low %v1107_v9, %v1111_v2  ;;  %v1200_v9 = vld [vmem:[#allocation11 + $0x538] sm:$0xff] }
 0x298   :  { %2920 = vmatpush2.bf16.msra.mxu1 %v7685_v1  ;;  %v7766_v1 = vcombine.high %v1235_v13, %v1239_v0  ;;  %v7765_v59 = vcombine.low %v1235_v13, %v1239_v0 }
 0x299   :  { %2921 = vmatprep.subr.bf16.mxu1 %v7678_v26  ;;  %v1103_v26 = vld [vmem:[#allocation11 + $0x230] sm:$0xff] }
 0x29a   :  { %2993 = vmatpush2.bf16.msra.mxu0 %v7813_v15  ;;  %v1099_v15 = vld [vmem:[#allocation11 + $0x210] sm:$0xff] }
 0x29b   :  { %2994 = vmatprep.subr.bf16.mxu0 %v7806_v10  ;;  %v1227_v10 = vld [vmem:[#allocation11 + $0x610] sm:$0xff]  ;;  %v7630_v17 = vcombine.high %v1099_v15, %v1103_v26  ;;  %v7629_v62 = vcombine.low %v1099_v15, %v1103_v26  ;;  %v1192_v15 = vld [vmem:[#allocation11 + $0x4f8] sm:$0xff] }
 0x29c   :  { %2922 = vmatpush2.bf16.msra.mxu1 %v7677_v18  ;;  %v7758_v18 = vcombine.high %v1227_v10, %v1231_v16  ;;  %v7757_v51 = vcombine.low %v1227_v10, %v1231_v16 }
 0x29d   :  { %2923 = vmatprep.subr.bf16.mxu1 %v7670_v52  ;;  %v1096_v52 = vld [vmem:[#allocation11 + $0x1f8] sm:$0xff] }
 0x29e   :  { %2995 = vmatpush2.bf16.msra.mxu0 %v7805_v48  ;;  %v1092_v48 = vld [vmem:[#allocation11 + $0x1d8] sm:$0xff] }
 0x29f   :  { %2996 = vmatprep.subr.bf16.mxu0 %v7798_v49  ;;  %v1220_v49 = vld [vmem:[#allocation11 + $0x5d8] sm:$0xff]  ;;  %v7624_v41 = vcombine.high %v1092_v48, %v1096_v52  ;;  %v7623_v40 = vcombine.low %v1092_v48, %v1096_v52 }
 0x2a0   :  { %2924 = vmatpush2.bf16.msra.mxu1 %v7669_v11  ;;  %v7752_v11 = vcombine.high %v1220_v49, %v1224_v61  ;;  %v7751_v36 = vcombine.low %v1220_v49, %v1224_v61  ;;  %v1184_v48 = vld [vmem:[#allocation11 + $0x4b8] sm:$0xff] }
 0x2a1   :  { %2925 = vmatprep.subr.bf16.mxu1 %v7662_v44  ;;  %v1088_v44 = vld [vmem:[#allocation11 + $0x1b8] sm:$0xff] }
 0x2a2   :  { %2997 = vmatpush2.bf16.msra.mxu0 %v7797_v12  ;;  %v1084_v12 = vld [vmem:[#allocation11 + $0x198] sm:$0xff] }
 0x2a3   :  { %2998 = vmatprep.subr.bf16.mxu0 %v7790_v14  ;;  %v1212_v14 = vld [vmem:[#allocation11 + $0x598] sm:$0xff]  ;;  %v7616_v5 = vcombine.high %v1084_v12, %v1088_v44  ;;  %v7615_v47 = vcombine.low %v1084_v12, %v1088_v44 }
 0x2a4   :  { %2926 = vmatpush2.bf16.msra.mxu1 %v7661_v3  ;;  %v7744_v3 = vcombine.high %v1212_v14, %v1216_v34  ;;  %v7743_v45 = vcombine.low %v1212_v14, %v1216_v34  ;;  %v1176_v12 = vld [vmem:[#allocation11 + $0x478] sm:$0xff] }
 0x2a5   :  { %2927 = vmatprep.subr.bf16.mxu1 %v7654_v54  ;;  %v1080_v54 = vld [vmem:[#allocation11 + $0x178] sm:$0xff] }
 0x2a6   :  { %2999 = vmatpush2.bf16.msra.mxu0 %v7789_v8  ;;  %v1076_v8 = vld [vmem:[#allocation11 + $0x158] sm:$0xff] }
 0x2a7   :  { %3000 = vmatprep.subr.bf16.mxu0 %v7782_v27  ;;  %v1204_v27 = vld [vmem:[#allocation11 + $0x558] sm:$0xff]  ;;  %v7608_v56 = vcombine.high %v1076_v8, %v1080_v54  ;;  %v7607_v2 = vcombine.low %v1076_v8, %v1080_v54 }
 0x2a8   :  { %2928 = vmatpush2.bf16.msra.mxu1 %v7653_v23  ;;  %v7736_v23 = vcombine.high %v1204_v27, %v1208_v37  ;;  %v7735_v13 = vcombine.low %v1204_v27, %v1208_v37  ;;  %v1168_v8 = vld [vmem:[#allocation11 + $0x438] sm:$0xff] }
 0x2a9   :  { %2929 = vmatprep.subr.bf16.mxu1 %v7646_v60  ;;  %v1072_v60 = vld [vmem:[#allocation11 + $0x138] sm:$0xff] }
 0x2aa   :  { %3001 = vmatpush2.bf16.msra.mxu0 %v7781_v43  ;;  %v1068_v43 = vld [vmem:[#allocation11 + $0x118] sm:$0xff] }
 0x2ab   :  { %3002 = vmatprep.subr.bf16.mxu0 %v7774_v25  ;;  %v1196_v25 = vld [vmem:[#allocation11 + $0x518] sm:$0xff]  ;;  %v7600_v0 = vcombine.high %v1068_v43, %v1072_v60  ;;  %v7599_v26 = vcombine.low %v1068_v43, %v1072_v60 }
 0x2ac   :  { %2930 = vmatpush2.bf16.msra.mxu1 %v7645_v7  ;;  %v7728_v7 = vcombine.high %v1196_v25, %v1200_v9  ;;  %v7727_v10 = vcombine.low %v1196_v25, %v1200_v9  ;;  %v1288_v43 = vld [vmem:[#allocation11 + $0x7f8] sm:$0xff] }
 0x2ad   :  { %2931 = vmatprep.subr.bf16.mxu1 %v7638_v29  ;;  %v1064_v29 = vld [vmem:[#allocation11 + $0xf8] sm:$0xff] }
 0x2ae   :  { %3003 = vmatpush2.bf16.msra.mxu0 %v7773_v24  ;;  %v1060_v24 = vld [vmem:[#allocation11 + $0xd8] sm:$0xff] }
 0x2af   :  { %3004 = vmatprep.subr.bf16.mxu0 %v7766_v1  ;;  %v1188_v1 = vld [vmem:[#allocation11 + $0x4d8] sm:$0xff]  ;;  %v7592_v16 = vcombine.high %v1060_v24, %v1064_v29  ;;  %v7591_v52 = vcombine.low %v1060_v24, %v1064_v29 }
 0x2b0   :  { %2932 = vmatpush2.bf16.msra.mxu1 %v7637_v58  ;;  %v7720_v58 = vcombine.high %v1188_v1, %v1192_v15  ;;  %v7719_v49 = vcombine.low %v1188_v1, %v1192_v15  ;;  %v1280_v24 = vld [vmem:[#allocation11 + $0x7b8] sm:$0xff] }
 0x2b1   :  { %2933 = vmatprep.subr.bf16.mxu1 %v7630_v17  ;;  %v1056_v17 = vld [vmem:[#allocation11 + $0xb8] sm:$0xff] }
 0x2b2   :  { %3005 = vmatpush2.bf16.msra.mxu0 %v7765_v59  ;;  %v1052_v59 = vld [vmem:[#allocation11 + $0x98] sm:$0xff] }
 0x2b3   :  { %3006 = vmatprep.subr.bf16.mxu0 %v7758_v18  ;;  %v1180_v18 = vld [vmem:[#allocation11 + $0x498] sm:$0xff]  ;;  %v7584_v61 = vcombine.high %v1052_v59, %v1056_v17  ;;  %v7583_v44 = vcombine.low %v1052_v59, %v1056_v17 }
 0x2b4   :  { %2934 = vmatpush2.bf16.msra.mxu1 %v7629_v62  ;;  %v7712_v62 = vcombine.high %v1180_v18, %v1184_v48  ;;  %v7711_v14 = vcombine.low %v1180_v18, %v1184_v48  ;;  %v1132_v48 = vld [vmem:[#allocation11 + $0x318] sm:$0xff] }
 0x2b5   :  { %3049 = vmatprep.subr.bf16.mxu1 %v7624_v41  ;;  %v1048_v41 = vld [vmem:[#allocation11 + $0x78] sm:$0xff] }
 0x2b6   :  { %3007 = vmatpush2.bf16.msra.mxu0 %v7757_v51  ;;  %v1044_v51 = vld [vmem:[#allocation11 + $0x58] sm:$0xff] }
 0x2b7   :  { %3122 = vmatprep.subr.bf16.mxu0 %v7752_v11  ;;  %2936 = vmatmul.mubr.bf16.vlgmr.msra.gmra.mxu1 %v9852_v31  ;;  %v1172_v11 = vld [vmem:[#allocation11 + $0x458] sm:$0xff]  ;;  %v7576_v34 = vcombine.high %v1044_v51, %v1048_v41  ;;  %v7575_v54 = vcombine.low %v1044_v51, %v1048_v41 }
 0x2b8   :  { %2945 = vmatprep.mubr.bf16.mxu1 %v9907_v46  ;;  %3050 = vmatpush1.bf16.msra.mxu1 %v7623_v40  ;;  %v7704_v40 = vcombine.high %v1172_v11, %v1176_v12  ;;  %v7703_v27 = vcombine.low %v1172_v11, %v1176_v12  ;;  %v1124_v12 = vld [vmem:[#allocation11 + $0x2d8] sm:$0xff] }
 0x2b9   :  { %3009 = vmatmul.mubr.bf16.vlgmr.msra.gmra.mxu0 %v9858_v20  ;;  %3051 = vmatprep.subr.bf16.mxu1 %v7616_v5  ;;  %v1040_v5 = vld [vmem:[#allocation11 + $0x38] sm:$0xff] }
 0x2ba   :  { %3018 = vmatprep.mubr.bf16.mxu0 %v9909_v50  ;;  %3123 = vmatpush1.bf16.msra.mxu0 %v7751_v36  ;;  %v1036_v36 = vld [vmem:[#allocation11 + $0x18] sm:$0xff] }
 0x2bb   :  { %3124 = vmatprep.subr.bf16.mxu0 %v7744_v3  ;;  %v1164_v3 = vld [vmem:[#allocation11 + $0x418] sm:$0xff]  ;;  %v7568_v37 = vcombine.high %v1036_v36, %v1040_v5  ;;  %v7567_v60 = vcombine.low %v1036_v36, %v1040_v5 }
 0x2bc   :  { %3052 = vmatpush1.bf16.msra.mxu1 %v7615_v47  ;;  %v7696_v47 = vcombine.high %v1164_v3, %v1168_v8  ;;  %v7695_v25 = vcombine.low %v1164_v3, %v1168_v8  ;;  %v1116_v8 = vld [vmem:[#allocation11 + $0x298] sm:$0xff] }
 0x2bd   :  { %3053 = vmatprep.subr.bf16.mxu1 %v7608_v56  ;;  %v1160_v56 = vld [vmem:[#allocation11 + $0x3f8] sm:$0xff] }
 0x2be   :  { %3125 = vmatpush1.bf16.msra.mxu0 %v7743_v45  ;;  %v1156_v45 = vld [vmem:[#allocation11 + $0x3d8] sm:$0xff] }
 0x2bf   :  { %2946 = vmatmul.mubr.bf16.gmra.mxu1 %v9899_v53  ;;  %3126 = vmatprep.subr.bf16.mxu0 %v7736_v23  ;;  %v1284_v23 = vld [vmem:[#allocation11 + $0x7d8] sm:$0xff]  ;;  %v7688_v9 = vcombine.high %v1156_v45, %v1160_v56  ;;  %v7687_v29 = vcombine.low %v1156_v45, %v1160_v56 }
 0x2c0   :  { %2955 = vmatprep.mubr.bf16.mxu1 %v9971_v42  ;;  %3054 = vmatpush1.bf16.msra.mxu1 %v7607_v2  ;;  %v7816_v2 = vcombine.high %v1284_v23, %v1288_v43 }
 0x2c1   :  { %3019 = vmatmul.mubr.bf16.gmra.mxu0 %v9905_v35  ;;  %3055 = vmatprep.subr.bf16.mxu1 %v7600_v0  ;;  %v1152_v0 = vld [vmem:[#allocation11 + $0x3b8] sm:$0xff] }
 0x2c2   :  { %3028 = vmatprep.mubr.bf16.mxu0 %v9973_v6  ;;  %3127 = vmatpush1.bf16.msra.mxu0 %v7735_v13  ;;  %v1148_v13 = vld [vmem:[#allocation11 + $0x398] sm:$0xff] }
 0x2c3   :  { %3128 = vmatprep.subr.bf16.mxu0 %v7728_v7  ;;  %v1276_v7 = vld [vmem:[#allocation11 + $0x798] sm:$0xff]  ;;  %v7680_v1 = vcombine.high %v1148_v13, %v1152_v0 }
 0x2c4   :  { %3056 = vmatpush1.bf16.msra.mxu1 %v7599_v26  ;;  %v7808_v15 = vcombine.high %v1276_v7, %v1280_v24  ;;  %v1144_v26 = vld [vmem:[#allocation11 + $0x378] sm:$0xff]  ;;  %v7807_v59 = vcombine.low %v1276_v7, %v1280_v24 }
 0x2c5   :  { %3057 = vmatprep.subr.bf16.mxu1 %v7592_v16  ;;  %v1272_v16 = vld [vmem:[#allocation11 + $0x778] sm:$0xff] }
 0x2c6   :  { %3129 = vmatpush1.bf16.msra.mxu0 %v7727_v10  ;;  %v1268_v10 = vld [vmem:[#allocation11 + $0x758] sm:$0xff] }
 0x2c7   :  { %2956 = vmatmul.mubr.bf16.gmra.mxu1 %v9964_v28  ;;  %3130 = vmatprep.subr.bf16.mxu0 %v7720_v58  ;;  %v7679_v58 = vcombine.low %v1148_v13, %v1152_v0  ;;  %v7800_v18 = vcombine.high %v1268_v10, %v1272_v16  ;;  %v7799_v51 = vcombine.low %v1268_v10, %v1272_v16  ;;  %v1100_v24 = vld [vmem:[#allocation11 + $0x218] sm:$0xff] }
 0x2c8   :  { %2965 = vmatprep.mubr.bf16.mxu1 %v10011_v22  ;;  %3058 = vmatpush1.bf16.msra.mxu1 %v7591_v52  ;;  %v1136_v52 = vld [vmem:[#allocation11 + $0x338] sm:$0xff] }
 0x2c9   :  { %3029 = vmatmul.mubr.bf16.gmra.mxu0 %v9969_v63  ;;  %3059 = vmatprep.subr.bf16.mxu1 %v7584_v61  ;;  %v1264_v61 = vld [vmem:[#allocation11 + $0x738] sm:$0xff]  ;;  %v7664_v41 = vcombine.high %v1132_v48, %v1136_v52 }
 0x2ca   :  { %3038 = vmatprep.mubr.bf16.mxu0 %v10013_v19  ;;  %3131 = vmatpush1.bf16.msra.mxu0 %v7719_v49  ;;  %v1260_v49 = vld [vmem:[#allocation11 + $0x718] sm:$0xff] }
 0x2cb   :  { %3132 = vmatprep.subr.bf16.mxu0 %v7712_v62  ;;  %v7792_v11 = vcombine.high %v1260_v49, %v1264_v61  ;;  %v7791_v36 = vcombine.low %v1260_v49, %v1264_v61  ;;  %v8593_v49 = vld [vmem:[#allocation14 + $0x154] ss:$28 sps:$4 sm:$0xff]   ;;  %v8603_v61 = vld [vmem:[#allocation14 + $0x508] ss:$28 sps:$4 sm:$0xff]  }
 0x2cc   :  { %3060 = vmatpush1.bf16.msra.mxu1 %v7583_v44  ;;  %v1128_v44 = vld [vmem:[#allocation11 + $0x2f8] sm:$0xff] }
 0x2cd   :  { %3061 = vmatprep.subr.bf16.mxu1 %v7576_v34  ;;  %v1256_v34 = vld [vmem:[#allocation11 + $0x6f8] sm:$0xff]  ;;  %v7656_v5 = vcombine.high %v1124_v12, %v1128_v44 }
 0x2ce   :  { %3133 = vmatpush1.bf16.msra.mxu0 %v7711_v14  ;;  %v1252_v14 = vld [vmem:[#allocation11 + $0x6d8] sm:$0xff] }
 0x2cf   :  { %2966 = vmatmul.mubr.bf16.gmra.mxu1 %v10007_v4  ;;  %3134 = vmatprep.subr.bf16.mxu0 %v7704_v40  ;;  %v7663_v40 = vcombine.low %v1132_v48, %v1136_v52  ;;  %v7784_v3 = vcombine.high %v1252_v14, %v1256_v34  ;;  %v7783_v45 = vcombine.low %v1252_v14, %v1256_v34  ;;  %v8609_v14 = vld [vmem:[#allocation14 + $0x4d0] ss:$28 sps:$4 sm:$0xff]   ;;  %v10063_v34 = vld [vmem:[#allocation13] sm:$0xff] }
 0x2d0   :  { %3081 = vmatprep.mubr.bf16.mxu1 %v9860_v38  ;;  %3062 = vmatpush1.bf16.msra.mxu1 %v7575_v54  ;;  %v7815_v38 = vcombine.low %v1284_v23, %v1288_v43  ;;  %v1120_v54 = vld [vmem:[#allocation11 + $0x2b8] sm:$0xff] }
 0x2d1   :  { %3039 = vmatmul.mubr.bf16.gmra.mxu0 %v10009_v21  ;;  %3063 = vmatprep.subr.bf16.mxu1 %v7568_v37  ;;  %v1248_v37 = vld [vmem:[#allocation11 + $0x6b8] sm:$0xff]  ;;  %v7648_v56 = vcombine.high %v1116_v8, %v1120_v54 }
 0x2d2   :  { %3154 = vmatprep.mubr.bf16.mxu0 %v9862_v39  ;;  %3135 = vmatpush1.bf16.msra.mxu0 %v7703_v27  ;;  %v1140_v39 = vld [vmem:[#allocation11 + $0x358] sm:$0xff] }
 0x2d3   :  { %3136 = vmatprep.subr.bf16.mxu0 %v7696_v47  ;;  %v7672_v17 = vcombine.high %v1140_v39, %v1144_v26  ;;  %v7671_v62 = vcombine.low %v1140_v39, %v1144_v26  ;;  %v1244_v27 = vld [vmem:[#allocation11 + $0x698] sm:$0xff]  ;;  %v7655_v47 = vcombine.low %v1124_v12, %v1128_v44  ;;  %v8596_v44 = vld [vmem:[#allocation14 + $0x11c] ss:$28 sps:$4 sm:$0xff]  }
 0x2d4   :  { %3064 = vmatpush1.bf16.msra.mxu1 %v7567_v60  ;;  %v7776_v23 = vcombine.high %v1244_v27, %v1248_v37  ;;  %v1108_v43 = vld [vmem:[#allocation11 + $0x258] sm:$0xff]  ;;  %v7775_v13 = vcombine.low %v1244_v27, %v1248_v37  ;;  %v8597_v37 = vld [vmem:[#allocation14 + $0xe0] ss:$28 sps:$4 sm:$0xff]  }
 0x2d5   :  { %3065 = vmatprep.subr.bf16.mxu1 %v7688_v9  ;;  %v1112_v60 = vld [vmem:[#allocation11 + $0x278] sm:$0xff] }
 0x2d6   :  { %3137 = vmatpush1.bf16.msra.mxu0 %v7695_v25  ;;  %v1236_v25 = vld [vmem:[#allocation11 + $0x658] sm:$0xff]  ;;  %v7640_v0 = vcombine.high %v1108_v43, %v1112_v60 }
 0x2d7   :  { %3138 = vmatprep.subr.bf16.mxu0 %v7816_v2  ;;  %v1240_v9 = vld [vmem:[#allocation11 + $0x678] sm:$0xff]  ;;  %v7647_v2 = vcombine.low %v1116_v8, %v1120_v54  ;;  %v8623_v8 = vld [vmem:[#allocation14 + $0x464] ss:$28 sps:$4 sm:$0xff]  }
 0x2d8   :  { %3066 = vmatpush2.bf16.msra.mxu1 %v7687_v29  ;;  %v7768_v7 = vcombine.high %v1236_v25, %v1240_v9  ;;  %v1104_v29 = vld [vmem:[#allocation11 + $0x238] sm:$0xff]  ;;  %v7767_v39 = vcombine.low %v1236_v25, %v1240_v9 }
 0x2d9   :  { %3067 = vmatprep.subr.bf16.mxu1 %v7680_v1  ;;  %v1232_v1 = vld [vmem:[#allocation11 + $0x638] sm:$0xff]  ;;  %v7632_v26 = vcombine.high %v1100_v24, %v1104_v29  ;;  %v7631_v16 = vcombine.low %v1100_v24, %v1104_v29 }
 0x2da   :  { %3139 = vmatpush2.bf16.msra.mxu0 %v7815_v38  ;;  %v1228_v38 = vld [vmem:[#allocation11 + $0x618] sm:$0xff] }
 0x2db   :  { %3140 = vmatprep.subr.bf16.mxu0 %v7808_v15  ;;  %v7639_v15 = vcombine.low %v1108_v43, %v1112_v60  ;;  %v7760_v10 = vcombine.high %v1228_v38, %v1232_v1  ;;  %v8600_v43 = vld [vmem:[#allocation14 + $0xa8] ss:$28 sps:$4 sm:$0xff]   ;;  %v8633_v24 = vld [vmem:[#allocation14 + $0x3f0] ss:$28 sps:$4 sm:$0xff]  }
 0x2dc   :  { %3068 = vmatpush2.bf16.msra.mxu1 %v7679_v58  ;;  %v7759_v58 = vcombine.low %v1228_v38, %v1232_v1 }
 0x2dd   :  { %3069 = vmatprep.subr.bf16.mxu1 %v7672_v17  ;;  %v8605_v17 = vld [vmem:[#allocation14 + $0x50c] ss:$28 sps:$4 sm:$0xff]  }
 0x2de   :  { %3141 = vmatpush2.bf16.msra.mxu0 %v7807_v59  ;;  %v8590_v59 = vld [vmem:[#allocation14 + $0x18c] ss:$28 sps:$4 sm:$0xff]  }
 0x2df   :  { %3142 = vmatprep.subr.bf16.mxu0 %v7800_v18  ;;  %v8588_v18 = vld [vmem:[#allocation14 + $0x188] ss:$28 sps:$4 sm:$0xff]  }
 0x2e0   :  { %3070 = vmatpush2.bf16.msra.mxu1 %v7671_v62 }
 0x2e1   :  { %3071 = vmatprep.subr.bf16.mxu1 %v7664_v41 }
 0x2e2   :  { %3143 = vmatpush2.bf16.msra.mxu0 %v7799_v51  ;;  %v8611_v51 = vld [vmem:[#allocation14 + $0x4d4] ss:$28 sps:$4 sm:$0xff]  }
 0x2e3   :  { %3144 = vmatprep.subr.bf16.mxu0 %v7792_v11  ;;  %v8591_v11 = vld [vmem:[#allocation14 + $0x150] ss:$28 sps:$4 sm:$0xff]  }
 0x2e4   :  { %3072 = vmatpush2.bf16.msra.mxu1 %v7663_v40  ;;  %v8617_v40 = vld [vmem:[#allocation14 + $0x49c] ss:$28 sps:$4 sm:$0xff]  }
 0x2e5   :  { %3073 = vmatprep.subr.bf16.mxu1 %v7656_v5  ;;  %v8599_v5 = vld [vmem:[#allocation14 + $0xe4] ss:$28 sps:$4 sm:$0xff]  }
 0x2e6   :  { %3145 = vmatpush2.bf16.msra.mxu0 %v7791_v36 }
 0x2e7   :  { %3146 = vmatprep.subr.bf16.mxu0 %v7784_v3  ;;  %v8615_v3 = vld [vmem:[#allocation14 + $0x498] ss:$28 sps:$4 sm:$0xff]  }
 0x2e8   :  { %3074 = vmatpush2.bf16.msra.mxu1 %v7655_v47 }
 0x2e9   :  { %3075 = vmatprep.subr.bf16.mxu1 %v7648_v56  ;;  %v8621_v56 = vld [vmem:[#allocation14 + $0x460] ss:$28 sps:$4 sm:$0xff]  }
 0x2ea   :  { %3147 = vmatpush2.bf16.msra.mxu0 %v7783_v45  ;;  %v8602_v45 = vld [vmem:[#allocation14 + $0xac] ss:$28 sps:$4 sm:$0xff]  }
 0x2eb   :  { %3148 = vmatprep.subr.bf16.mxu0 %v7776_v23 }
 0x2ec   :  { %3076 = vmatpush2.bf16.msra.mxu1 %v7647_v2 }
 0x2ed   :  { %3077 = vmatprep.subr.bf16.mxu1 %v7640_v0 }
 0x2ee   :  { %3149 = vmatpush2.bf16.msra.mxu0 %v7775_v13  ;;  %v8606_v13 = vld [vmem:[#allocation14 + $0x70] ss:$28 sps:$4 sm:$0xff]  }
 0x2ef   :  { %3150 = vmatprep.subr.bf16.mxu0 %v7768_v7  ;;  %v8614_v7 = vld [vmem:[#allocation14 + $0x3c] ss:$28 sps:$4 sm:$0xff]  }
 0x2f0   :  { %3078 = vmatpush2.bf16.msra.mxu1 %v7639_v15 }
 0x2f1   :  { %3079 = vmatprep.subr.bf16.mxu1 %v7632_v26  ;;  %v8647_v26 = vld [vmem:[#allocation14 + $0x384] ss:$28 sps:$4 sm:$0xff]  }
 0x2f2   :  { %3151 = vmatpush2.bf16.msra.mxu0 %v7767_v39 }
 0x2f3   :  { %3152 = vmatprep.subr.bf16.mxu0 %v7760_v10 }
 0x2f4   :  { %3080 = vmatpush2.bf16.msra.mxu1 %v7631_v16  ;;  %v10053_v48 = vpop.f32.mrf.mxu1  ;;  %v10055_v52 = vpop.f32.mrf.mxu0  ;;  %v8618_v16 = vld [vmem:[#allocation14] ss:$28 sps:$4 sm:$0xff]  }
 0x2f5   :  { %6208 = vmatprep.subr.bf16.mxu1 %v8590_v59  ;;  %v8645_v59 = vld [vmem:[#allocation14 + $0x380] ss:$28 sps:$4 sm:$0xff]  }
 0x2f6   :  { %3153 = vmatpush2.bf16.msra.mxu0 %v7759_v58  ;;  %v2647_v62 = vpop.f32.mrf.mxu1  ;;  %v2720_v41 = vpop.f32.mrf.mxu0  ;;  %v8626_v58 = vld [vmem:[#allocation14 + $0x34c] ss:$28 sps:$4 sm:$0xff]  }
 0x2f7   :  { %6281 = vmatprep.subr.bf16.mxu0 %v8605_v17  ;;  %3082 = vmatmul.mubr.bf16.vlgmr.msra.gmra.mxu1 %v9852_v31 }
 0x2f8   :  { %3091 = vmatprep.mubr.bf16.mxu1 %v9907_v46  ;;  %6209 = vmatpush1.bf16.msra.mxu1 %v8588_v18  ;;  %v10061_v12 = vpop.f32.mrf.mxu1  ;;  %v10069_v46 = vpop.f32.mrf.mxu0  ;;  %v8653_v18 = vld [vmem:[#allocation14 + $0x6cc] ss:$28 sps:$4 sm:$0xff]  }
 0x2f9   :  { %3155 = vmatmul.mubr.bf16.vlgmr.msra.gmra.mxu0 %v9858_v20  ;;  %6210 = vmatprep.subr.bf16.mxu1 %v8593_v49  ;;  %v10067_v20 = vrot.slane %v10063_v34, %v9680_v33 }
 0x2fa   :  { %3164 = vmatprep.mubr.bf16.mxu0 %v9909_v50  ;;  %6282 = vmatpush1.bf16.msra.mxu0 %v8603_v61  ;;  %v2651_v31 = vpop.f32.mrf.mxu1  ;;  %v8594_v50 = vld [vmem:[#allocation14 + $0x118] ss:$28 sps:$4 sm:$0xff]   ;;  %v2724_v27 = vpop.f32.mrf.mxu0 }
 0x2fb   :  { %6283 = vmatprep.subr.bf16.mxu0 %v8611_v51  ;;  %v2652_v36 = vadd.f32 %v2651_v31, %v10067_v20  ;;  %v2648_v54 = vadd.f32 %v2647_v62, %v10067_v20  ;;  %v8632_v61 = vld [vmem:[#allocation14 + $0x314] ss:$28 sps:$4 sm:$0xff]   ;;  %v8651_v62 = vld [vmem:[#allocation14 + $0x6c8] ss:$28 sps:$4 sm:$0xff]  }
 0x2fc   :  { %6211 = vmatpush1.bf16.msra.mxu1 %v8591_v11  ;;  %v10077_v25 = vpop.f32.mrf.mxu1  ;;  %v8630_v11 = vld [vmem:[#allocation14 + $0x310] ss:$28 sps:$4 sm:$0xff]  }
 0x2fd   :  { %6212 = vmatprep.subr.bf16.mxu1 %v8596_v44  ;;  %v2725_v47 = vadd.f32 %v2724_v27, %v2652_v36  ;;  %v2721_v23 = vadd.f32 %v2720_v41, %v2648_v54  ;;  %v10080_v2 = vpop.f32.mrf.mxu0  ;;  %v8638_v44 = vld [vmem:[#allocation14 + $0x2dc] ss:$28 sps:$4 sm:$0xff]   ;;  %v8671_v54 = vld [vmem:[#allocation14 + $0x624] ss:$28 sps:$4 sm:$0xff]  }
 0x2fe   :  { %6284 = vmatpush1.bf16.msra.mxu0 %v8609_v14  ;;  %v10085_v29 = vpop.f32.mrf.mxu1  ;;  %v8657_v14 = vld [vmem:[#allocation14 + $0x690] ss:$28 sps:$4 sm:$0xff]   ;;  %v8636_v36 = vld [vmem:[#allocation14 + $0x2d8] ss:$28 sps:$4 sm:$0xff]  }
 0x2ff   :  { %3092 = vmatmul.mubr.bf16.gmra.mxu1 %v9899_v53  ;;  %6285 = vmatprep.subr.bf16.mxu0 %v8617_v40  ;;  %v8629_v53 = vld [vmem:[#allocation14 + $0x42c] ss:$28 sps:$4 sm:$0xff]   ;;  %v3204_v60 = vmul.f32 0.2, %v2725_v47  ;;  %v3196_v9 = vmul.f32 0.2, %v2721_v23  ;;  %v10087_v1 = vpop.f32.mrf.mxu0 }
 0x300   :  { %3101 = vmatprep.mubr.bf16.mxu1 %v9971_v42  ;;  %6213 = vmatpush1.bf16.msra.mxu1 %v8594_v50  ;;  %v8627_v42 = vld [vmem:[#allocation14 + $0x428] ss:$28 sps:$4 sm:$0xff]   ;;  %v10091_v39 = vpop.f32.mrf.mxu1  ;;  %v8665_v40 = vld [vmem:[#allocation14 + $0x65c] ss:$28 sps:$4 sm:$0xff]  }
 0x301   :  { %3165 = vmatmul.mubr.bf16.gmra.mxu0 %v9905_v35  ;;  %6214 = vmatprep.subr.bf16.mxu1 %v8599_v5  ;;  %v8608_v35 = vld [vmem:[#allocation14 + $0x74] ss:$28 sps:$4 sm:$0xff]   ;;  %v3268_v0 = vmax.f32 %v2725_v47, %v3204_v60  ;;  %v3260_v38 = vmax.f32 %v2721_v23, %v3196_v9  ;;  %v10094_v10 = vpop.f32.mrf.mxu0  ;;  %v8644_v5 = vld [vmem:[#allocation14 + $0x2a4] ss:$28 sps:$4 sm:$0xff]   ;;  %v8650_v47 = vld [vmem:[#allocation14 + $0x26c] ss:$28 sps:$4 sm:$0xff]   ;;  %v10112_v23 = vrot.slane %v10063_v34, %v9677_v32 }
 0x302   :  { %3174 = vmatprep.mubr.bf16.mxu0 %v9973_v6  ;;  %6286 = vmatpush1.bf16.msra.mxu0 %v8615_v3  ;;  %v8635_v6 = vld [vmem:[#allocation14 + $0x3f4] ss:$28 sps:$4 sm:$0xff]   ;;  %v2661_v17 = vpop.f32.mrf.mxu1  ;;  %v8648_v60 = vld [vmem:[#allocation14 + $0x268] ss:$28 sps:$4 sm:$0xff]  }
 0x303   :  { %6287 = vmatprep.subr.bf16.mxu0 %v8623_v8  ;;  %v10089_v15 = vpack.c.bf16 %v3268_v0, %v3260_v38  ;;  %v2734_v49 = vpop.f32.mrf.mxu0  ;;  %v8663_v3 = vld [vmem:[#allocation14 + $0x658] ss:$28 sps:$4 sm:$0xff]  }
 0x304   :  { %6215 = vmatpush1.bf16.msra.mxu1 %v8597_v37  ;;  %v8642_v37 = vld [vmem:[#allocation14 + $0x2a0] ss:$28 sps:$4 sm:$0xff]   ;;  %v8656_v9 = vld [vmem:[#allocation14 + $0x234] ss:$28 sps:$4 sm:$0xff]  }
 0x305   :  { %6216 = vmatprep.subr.bf16.mxu1 %v8602_v45  ;;  %11179 = vst [vmem:[#allocation27_spill] sm:$0xff] %v10089_v15  ;;  %v8669_v45 = vld [vmem:[#allocation14 + $0x620] ss:$28 sps:$4 sm:$0xff]  }
 0x306   :  { %6288 = vmatpush1.bf16.msra.mxu0 %v8621_v56 }
 0x307   :  { %3102 = vmatmul.mubr.bf16.gmra.mxu1 %v9964_v28  ;;  %6289 = vmatprep.subr.bf16.mxu0 %v8629_v53  ;;  %v8641_v28 = vld [vmem:[#allocation14 + $0x3bc] ss:$28 sps:$4 sm:$0xff]   ;;  %v10098_v51 = vpop.f32.mrf.mxu1  ;;  %v8674_v53 = vld [vmem:[#allocation14 + $0x5ec] ss:$28 sps:$4 sm:$0xff]  }
 0x308   :  { %3111 = vmatprep.mubr.bf16.mxu1 %v10011_v22  ;;  %6217 = vmatpush1.bf16.msra.mxu1 %v8600_v43  ;;  %v8620_v22 = vld [vmem:[#allocation14 + $0x4] ss:$28 sps:$4 sm:$0xff]   ;;  %v10100_v41 = vpop.f32.mrf.mxu0 }
 0x309   :  { %3175 = vmatmul.mubr.bf16.gmra.mxu0 %v9969_v63  ;;  %6218 = vmatprep.subr.bf16.mxu1 %v8608_v35  ;;  %v8612_v63 = vld [vmem:[#allocation14 + $0x38] ss:$28 sps:$4 sm:$0xff]   ;;  %v10102_v31 = vpop.f32.mrf.mxu1  ;;  %v2650_v35 = vadd.f32 %v10061_v12, %v10112_v23  ;;  %v8654_v12 = vld [vmem:[#allocation14 + $0x230] ss:$28 sps:$4 sm:$0xff]  }
 0x30a   :  { %3184 = vmatprep.mubr.bf16.mxu0 %v10013_v19  ;;  %6290 = vmatpush1.bf16.msra.mxu0 %v8627_v42  ;;  %v8639_v19 = vld [vmem:[#allocation14 + $0x3b8] ss:$28 sps:$4 sm:$0xff]   ;;  %v10104_v50 = vpop.f32.mrf.mxu0  ;;  %v2658_v42 = vadd.f32 %v10085_v29, %v10067_v20 }
 0x30b   :  { %6291 = vmatprep.subr.bf16.mxu0 %v8635_v6  ;;  %v10106_v8 = vpop.f32.mrf.mxu1  ;;  %v2662_v6 = vadd.f32 %v2661_v17, %v10067_v20  ;;  %v2723_v38 = vadd.f32 %v10069_v46, %v2650_v35  ;;  %v2660_v46 = vadd.f32 %v10091_v39, %v10112_v23  ;;  %v8668_v17 = vld [vmem:[#allocation14 + $0x1c4] ss:$28 sps:$4 sm:$0xff]  }
 0x30c   :  { %6219 = vmatpush1.bf16.msra.mxu1 %v8606_v13  ;;  %v10108_v27 = vpop.f32.mrf.mxu0  ;;  %v8672_v13 = vld [vmem:[#allocation14 + $0x5e8] ss:$28 sps:$4 sm:$0xff]   ;;  %v2731_v29 = vadd.f32 %v10087_v1, %v2658_v42  ;;  %v8660_v1 = vld [vmem:[#allocation14 + $0x1f8] ss:$28 sps:$4 sm:$0xff]  }
 0x30d   :  { %6220 = vmatprep.subr.bf16.mxu1 %v8614_v7  ;;  %v2671_v56 = vpop.f32.mrf.mxu1  ;;  %v8677_v7 = vld [vmem:[#allocation14 + $0x5b4] ss:$28 sps:$4 sm:$0xff]  }
 0x30e   :  { %6292 = vmatpush1.bf16.msra.mxu0 %v8633_v24  ;;  %v2744_v43 = vpop.f32.mrf.mxu0  ;;  %v2646_v24 = vadd.f32 %v10053_v48, %v10112_v23  ;;  %v2656_v48 = vadd.f32 %v10077_v25, %v10112_v23  ;;  %v8683_v25 = vld [vmem:[#allocation14 + $0x544] ss:$28 sps:$4 sm:$0xff]  }
 0x30f   :  { %3112 = vmatmul.mubr.bf16.gmra.mxu1 %v10007_v4  ;;  %6293 = vmatprep.subr.bf16.mxu0 %v8641_v28  ;;  %v8624_v4 = vld [vmem:[#allocation14 + $0x348] ss:$28 sps:$4 sm:$0xff]   ;;  %v10119_v0 = vpop.f32.mrf.mxu1 }
 0x310   :  { %6240 = vmatprep.mubr.bf16.mxu1 %v10089_v15  ;;  %6221 = vmatpush1.bf16.msra.mxu1 %v8612_v63  ;;  %v10123_v28 = vpop.f32.mrf.mxu0  ;;  %v2735_v63 = vadd.f32 %v2734_v49, %v2662_v6  ;;  %v3203_v49 = vmul.f32 0.2, %v2723_v38 }
 0x311   :  { %3185 = vmatmul.mubr.bf16.gmra.mxu0 %v10009_v21  ;;  %6222 = vmatprep.subr.bf16.mxu1 %v8620_v22  ;;  %v8659_v21 = vld [vmem:[#allocation14 + $0x694] ss:$28 sps:$4 sm:$0xff]   ;;  %v8662_v22 = vld [vmem:[#allocation14 + $0x1fc] ss:$28 sps:$4 sm:$0xff]  }
 0x312   :  { %6294 = vmatpush1.bf16.msra.mxu0 %v8639_v19  ;;  %v8675_v19 = vld [vmem:[#allocation14 + $0x5b0] ss:$28 sps:$4 sm:$0xff]  }
 0x313   :  { %6295 = vmatprep.subr.bf16.mxu0 %v8647_v26  ;;  %v2677_v26 = vpop.f32.mrf.mxu1 }
 0x314   :  { %6223 = vmatpush1.bf16.msra.mxu1 %v8618_v16  ;;  %v8680_v16 = vld [vmem:[#allocation14 + $0x57c] ss:$28 sps:$4 sm:$0xff]  }
 0x315   :  { %6224 = vmatprep.subr.bf16.mxu1 %v8626_v58  ;;  %v2719_v58 = vadd.f32 %v10055_v52, %v2646_v24  ;;  %v2668_v52 = vadd.f32 %v10102_v31, %v10067_v20 }
 0x316   :  { %6296 = vmatpush1.bf16.msra.mxu0 %v8645_v59  ;;  %v10128_v59 = vpop.f32.mrf.mxu0 }
 0x317   :  { %6297 = vmatprep.subr.bf16.mxu0 %v8653_v18  ;;  %v8678_v18 = vld [vmem:[#allocation14 + $0x578] ss:$28 sps:$4 sm:$0xff]  }
 0x318   :  { %6225 = vmatpush2.bf16.msra.mxu1 %v8624_v4  ;;  %v3212_v4 = vmul.f32 0.2, %v2731_v29  ;;  %v10139_v39 = vpop.f32.mrf.mxu0 }
 0x319   :  { %6226 = vmatprep.subr.bf16.mxu1 %v8632_v61  ;;  %v3220_v61 = vmul.f32 0.2, %v2735_v63 }
 0x31a   :  { %6298 = vmatpush2.bf16.msra.mxu0 %v8651_v62  ;;  %v2672_v62 = vadd.f32 %v2671_v56, %v10067_v20  ;;  %v2754_v35 = vpop.f32.mrf.mxu0 }
 0x31b   :  { %6299 = vmatprep.subr.bf16.mxu0 %v8659_v21  ;;  %v10137_v21 = vpop.f32.mrf.mxu1  ;;  %v3284_v31 = vmax.f32 %v2735_v63, %v3220_v61 }
 0x31c   :  { %6227 = vmatpush2.bf16.msra.mxu1 %v8630_v11  ;;  %v3195_v11 = vmul.f32 0.2, %v2719_v58 }
 0x31d   :  { %6228 = vmatprep.subr.bf16.mxu1 %v8638_v44  ;;  %v10142_v44 = vadd.f32 %v10080_v2, %v2656_v48  ;;  %v10154_v2 = vrot.slane %v10063_v34, %v9764_v55 }
 0x31e   :  { %6300 = vmatpush2.bf16.msra.mxu0 %v8657_v14  ;;  %v10145_v14 = vadd.f32 %v10094_v10, %v2660_v46  ;;  %v8734_v10 = vld [vmem:[#allocation14 + $0xc0c] ss:$28 sps:$4 sm:$0xff]   ;;  %v3259_v56 = vmax.f32 %v2719_v58, %v3195_v11 }
 0x31f   :  { %6301 = vmatprep.subr.bf16.mxu0 %v8665_v40  ;;  %v8666_v40 = vld [vmem:[#allocation14 + $0x1c0] ss:$28 sps:$4 sm:$0xff]  }
 0x320   :  { %6229 = vmatpush2.bf16.msra.mxu1 %v8636_v36  ;;  %v3267_v36 = vmax.f32 %v2723_v38, %v3203_v49  ;;  %v3219_v42 = vmul.f32 0.2, %v10145_v14  ;;  %v8692_v49 = vld [vmem:[#allocation14 + $0x81c] ss:$28 sps:$4 sm:$0xff]  }
 0x321   :  { %6230 = vmatprep.subr.bf16.mxu1 %v8644_v5  ;;  %v3276_v5 = vmax.f32 %v2731_v29, %v3212_v4 }
 0x322   :  { %6302 = vmatpush2.bf16.msra.mxu0 %v8663_v3  ;;  %v8681_v3 = vld [vmem:[#allocation14 + $0x540] ss:$28 sps:$4 sm:$0xff]   ;;  %v3283_v46 = vmax.f32 %v10145_v14, %v3219_v42 }
 0x323   :  { %6303 = vmatprep.subr.bf16.mxu0 %v8671_v54  ;;  %v8686_v54 = vld [vmem:[#allocation14 + $0x88c] ss:$28 sps:$4 sm:$0xff]  }
 0x324   :  { %6231 = vmatpush2.bf16.msra.mxu1 %v8642_v37  ;;  %v10148_v37 = vadd.f32 %v10104_v50, %v2668_v52  ;;  %v10162_v50 = vrot.slane %v10063_v34, %v9767_v57 }
 0x325   :  { %6232 = vmatprep.subr.bf16.mxu1 %v8650_v47  ;;  %v10150_v47 = vadd.f32 %v2744_v43, %v2672_v62  ;;  %v3211_v43 = vmul.f32 0.2, %v10142_v44 }
 0x326   :  { %6304 = vmatpush2.bf16.msra.mxu0 %v8669_v45  ;;  %v2681_v45 = vpop.f32.mrf.mxu1 }
 0x327   :  { %6305 = vmatprep.subr.bf16.mxu0 %v8674_v53  ;;  %v2666_v53 = vadd.f32 %v10098_v51, %v10112_v23  ;;  %v2678_v51 = vadd.f32 %v2677_v26, %v10067_v20  ;;  %v3236_v38 = vmul.f32 0.2, %v10150_v47  ;;  %v2682_v29 = vadd.f32 %v2681_v45, %v10067_v20 }
 0x328   :  { %6233 = vmatpush2.bf16.msra.mxu1 %v8648_v60  ;;  %v2670_v60 = vadd.f32 %v10106_v8, %v10112_v23  ;;  %v8689_v8 = vld [vmem:[#allocation14 + $0x854] ss:$28 sps:$4 sm:$0xff]   ;;  %v3275_v48 = vmax.f32 %v10142_v44, %v3211_v43 }
 0x329   :  { %6234 = vmatprep.subr.bf16.mxu1 %v8656_v9  ;;  %v8684_v9 = vld [vmem:[#allocation14 + $0x888] ss:$28 sps:$4 sm:$0xff]   ;;  %v3300_v61 = vmax.f32 %v10150_v47, %v3236_v38  ;;  %v10192_v52 = vadd.f32 %v2754_v35, %v2682_v29  ;;  %v8693_v29 = vld [vmem:[#allocation14 + $0x7e0] ss:$28 sps:$4 sm:$0xff]  }
 0x32a   :  { %6306 = vmatpush2.bf16.msra.mxu0 %v8672_v13  ;;  %v10166_v13 = vpack.c.bf16 %v3267_v36, %v3259_v56  ;;  %v10197_v36 = vpack.c.bf16 %v3283_v46, %v3275_v48 }
 0x32b   :  { %6307 = vmatprep.subr.bf16.mxu0 %v8677_v7  ;;  %v10168_v7 = vpack.c.bf16 %v3284_v31, %v3276_v5  ;;  %v2676_v5 = vadd.f32 %v10119_v0, %v10112_v23  ;;  %v2680_v31 = vadd.f32 %v10137_v21, %v10112_v23  ;;  %v3252_v35 = vmul.f32 0.2, %v10192_v52 }
 0x32c   :  { %6235 = vmatpush2.bf16.msra.mxu1 %v8654_v12  ;;  %11180 = vst [vmem:[#allocation28_spill] sm:$0xff] %v10166_v13  ;;  %v3228_v12 = vmul.f32 0.2, %v10148_v37  ;;  %11182 = vst [vmem:[#allocation30_spill] sm:$0xff] %v10197_v36 }
 0x32d   :  { %6236 = vmatprep.subr.bf16.mxu1 %v8662_v22  ;;  %11181 = vst [vmem:[#allocation29_spill] sm:$0xff] %v10168_v7 }
 0x32e   :  { %6308 = vmatpush2.bf16.msra.mxu0 %v8675_v19  ;;  %v10176_v19 = vadd.f32 %v10100_v41, %v2666_v53  ;;  %v10187_v41 = vadd.f32 %v10128_v59, %v2678_v51  ;;  %v3292_v4 = vmax.f32 %v10148_v37, %v3228_v12  ;;  %v8695_v37 = vld [vmem:[#allocation14 + $0x7e4] ss:$28 sps:$4 sm:$0xff]  }
 0x32f   :  { %6309 = vmatprep.subr.bf16.mxu0 %v8680_v16  ;;  %v10179_v16 = vadd.f32 %v10108_v27, %v2670_v60 }
 0x330   :  { %6237 = vmatpush2.bf16.msra.mxu1 %v8660_v1  ;;  %v8687_v1 = vld [vmem:[#allocation14 + $0x850] ss:$28 sps:$4 sm:$0xff]   ;;  %v3227_v11 = vmul.f32 0.2, %v10176_v19  ;;  %v3244_v47 = vmul.f32 0.2, %v10187_v41  ;;  %v10204_v60 = vpack.c.bf16 %v3300_v61, %v3292_v4 }
 0x331   :  { %6238 = vmatprep.subr.bf16.mxu1 %v8668_v17  ;;  %v3235_v44 = vmul.f32 0.2, %v10179_v16 }
 0x332   :  { %6310 = vmatpush2.bf16.msra.mxu0 %v8678_v18  ;;  %11183 = vst [vmem:[#allocation31_spill] sm:$0xff] %v10204_v60  ;;  %v3291_v23 = vmax.f32 %v10176_v19, %v3227_v11 }
 0x333   :  { %6311 = vmatprep.subr.bf16.mxu0 %v8683_v25  ;;  %v3299_v21 = vmax.f32 %v10179_v16, %v3235_v44 }
 0x334   :  { %6239 = vmatpush2.bf16.msra.mxu1 %v8666_v40 }
 0x335   :  { %6354 = vmatprep.subr.bf16.mxu1 %v8686_v54  ;;  %v8690_v54 = vld [vmem:[#allocation14 + $0x818] ss:$28 sps:$4 sm:$0xff]  }
 0x336   :  { %6312 = vmatpush2.bf16.msra.mxu0 %v8681_v3 }
 0x337   :  { %v2791_v6 = vpop.f32.mrf.mxu1  ;;  %6427 = vmatprep.subr.bf16.mxu0 %v8734_v10  ;;  %6241 = vmatmul.mubr.bf16.vlgmr.msra.gmra.mxu1 %v10166_v13 }
 0x338   :  { %v2792_v63 = vadd.f32 %v2791_v6, %v10154_v2  ;;  %6250 = vmatprep.mubr.bf16.mxu1 %v10168_v7  ;;  %6355 = vmatpush1.bf16.msra.mxu1 %v8684_v9 }
 0x339   :  { %v2864_v24 = vpop.f32.mrf.mxu0  ;;  %v2793_v22 = vpop.f32.mrf.mxu1  ;;  %6356 = vmatprep.subr.bf16.mxu1 %v8689_v8  ;;  %v10216_v8 = vadd.f32 %v10139_v39, %v2680_v31 }
 0x33a   :  { %v2794_v26 = vadd.f32 %v2793_v22, %v10162_v50  ;;  %v2865_v62 = vadd.f32 %v2864_v24, %v2792_v63  ;;  %v10213_v24 = vadd.f32 %v10123_v28, %v2676_v5  ;;  %v3308_v63 = vmax.f32 %v10187_v41, %v3244_v47 }
 0x33b   :  { %v2866_v58 = vpop.f32.mrf.mxu0  ;;  %v2795_v20 = vpop.f32.mrf.mxu1  ;;  %v3316_v28 = vmax.f32 %v10192_v52, %v3252_v35  ;;  %v8696_v52 = vld [vmem:[#allocation14 + $0x7a8] ss:$28 sps:$4 sm:$0xff]  }
 0x33c   :  { %v2867_v17 = vadd.f32 %v2866_v58, %v2794_v26  ;;  %v2796_v27 = vadd.f32 %v2795_v20, %v10154_v2  ;;  %6357 = vmatpush1.bf16.msra.mxu1 %v8687_v1  ;;  %v3197_v43 = vmul.f32 0.2, %v2865_v62  ;;  %v8698_v58 = vld [vmem:[#allocation14 + $0x7ac] ss:$28 sps:$4 sm:$0xff]   ;;  %v3243_v41 = vmul.f32 0.2, %v10213_v24 }
 0x33d   :  { %v2868_v18 = vpop.f32.mrf.mxu0  ;;  %v2797_v25 = vpop.f32.mrf.mxu1  ;;  %6358 = vmatprep.subr.bf16.mxu1 %v8692_v49  ;;  %v8732_v49 = vld [vmem:[#allocation14 + $0xc08] ss:$28 sps:$4 sm:$0xff]   ;;  %v10232_v5 = vpack.c.bf16 %v3316_v28, %v3308_v63 }
 0x33e   :  { %v2869_v59 = vadd.f32 %v2868_v18, %v2796_v27  ;;  %v2798_v14 = vadd.f32 %v2797_v25, %v10162_v50  ;;  %v3198_v45 = vmul.f32 0.2, %v2867_v17  ;;  %v3261_v48 = vmax.f32 %v2865_v62, %v3197_v43 }
 0x33f   :  { %v2870_v40 = vpop.f32.mrf.mxu0  ;;  %v2801_v3 = vpop.f32.mrf.mxu1  ;;  %6251 = vmatmul.mubr.bf16.gmra.mxu1 %v10197_v36  ;;  %v10229_v62 = vpack.c.bf16 %v3299_v21, %v3291_v23  ;;  %11186 = vst [vmem:[#allocation34_spill] sm:$0xff] %v10232_v5  ;;  %v8746_v23 = vld [vmem:[#allocation14 + $0xb9c] ss:$28 sps:$4 sm:$0xff]  }
 0x340   :  { %v3205_v10 = vmul.f32 0.2, %v2869_v59  ;;  %v2871_v56 = vadd.f32 %v2870_v40, %v2798_v14  ;;  %v2802_v0 = vadd.f32 %v2801_v3, %v10154_v2  ;;  %6260 = vmatprep.mubr.bf16.mxu1 %v10204_v60  ;;  %6359 = vmatpush1.bf16.msra.mxu1 %v8690_v54  ;;  %v3262_v22 = vmax.f32 %v2867_v17, %v3198_v45  ;;  %v8701_v14 = vld [vmem:[#allocation14 + $0x774] ss:$28 sps:$4 sm:$0xff]  }
 0x341   :  { %v2874_v53 = vpop.f32.mrf.mxu0  ;;  %v2803_v42 = vpop.f32.mrf.mxu1  ;;  %6360 = vmatprep.subr.bf16.mxu1 %v8695_v37  ;;  %v3251_v17 = vmul.f32 0.2, %v10216_v8  ;;  %11185 = vst [vmem:[#allocation33_spill] sm:$0xff] %v10229_v62  ;;  %v8740_v40 = vld [vmem:[#allocation14 + $0xbd4] ss:$28 sps:$4 sm:$0xff]  }
 0x342   :  { %v3206_v6 = vmul.f32 0.2, %v2871_v56  ;;  %v2804_v9 = vadd.f32 %v2803_v42, %v10162_v50  ;;  %v3269_v12 = vmax.f32 %v2869_v59, %v3205_v10  ;;  %v2875_v46 = vadd.f32 %v2874_v53, %v2802_v0  ;;  %v8699_v42 = vld [vmem:[#allocation14 + $0x770] ss:$28 sps:$4 sm:$0xff]  }
 0x343   :  { %v2876_v51 = vpop.f32.mrf.mxu0  ;;  %v2805_v38 = vpop.f32.mrf.mxu1  ;;  %v3307_v53 = vmax.f32 %v10213_v24, %v3243_v41  ;;  %v3315_v35 = vmax.f32 %v10216_v8, %v3251_v17 }
 0x344   :  { %v3270_v19 = vmax.f32 %v2871_v56, %v3206_v6  ;;  %v2877_v16 = vadd.f32 %v2876_v51, %v2804_v9  ;;  %v2806_v39 = vadd.f32 %v2805_v38, %v10154_v2  ;;  %v10227_v4 = vpack.c.bf16 %v3269_v12, %v3261_v48  ;;  %6361 = vmatpush1.bf16.msra.mxu1 %v8693_v29  ;;  %v8738_v56 = vld [vmem:[#allocation14 + $0xbd0] ss:$28 sps:$4 sm:$0xff]   ;;  %v8704_v12 = vld [vmem:[#allocation14 + $0x73c] ss:$28 sps:$4 sm:$0xff]  }
 0x345   :  { %v2878_v26 = vpop.f32.mrf.mxu0  ;;  %v2807_v20 = vpop.f32.mrf.mxu1  ;;  %6362 = vmatprep.subr.bf16.mxu1 %v8698_v58  ;;  %v3213_v31 = vmul.f32 0.2, %v2875_v46  ;;  %v8702_v48 = vld [vmem:[#allocation14 + $0x738] ss:$28 sps:$4 sm:$0xff]  }
 0x346   :  { %v10222_v1 = vpack.c.bf16 %v3270_v19, %v3262_v22  ;;  %v2808_v27 = vadd.f32 %v2807_v20, %v10162_v50  ;;  %v2879_v61 = vadd.f32 %v2878_v26, %v2806_v39  ;;  %v3214_v11 = vmul.f32 0.2, %v2877_v16  ;;  %v8744_v26 = vld [vmem:[#allocation14 + $0xb98] ss:$28 sps:$4 sm:$0xff]   ;;  %v8752_v39 = vld [vmem:[#allocation14 + $0xb64] ss:$28 sps:$4 sm:$0xff]  }
 0x347   :  { %v2880_v18 = vpop.f32.mrf.mxu0  ;;  %v2811_v25 = vpop.f32.mrf.mxu1  ;;  %6261 = vmatmul.mubr.bf16.gmra.mxu1 %v10229_v62  ;;  %v3277_v38 = vmax.f32 %v2875_v46, %v3213_v31  ;;  %v10247_v20 = vpack.c.bf16 %v3315_v35, %v3307_v53  ;;  %v8758_v31 = vld [vmem:[#allocation14 + $0xb2c] ss:$28 sps:$4 sm:$0xff]  }
 0x348   :  { %11184 = vst [vmem:[#allocation32_spill] sm:$0xff] %v10222_v1  ;;  %v2881_v44 = vadd.f32 %v2880_v18, %v2808_v27  ;;  %6313 = vmatprep.mubr.bf16.mxu0 %v10222_v1  ;;  %v3221_v3 = vmul.f32 0.2, %v2879_v61  ;;  %v2812_v47 = vadd.f32 %v2811_v25, %v10154_v2  ;;  %6270 = vmatprep.mubr.bf16.mxu1 %v10232_v5  ;;  %v8707_v18 = vld [vmem:[#allocation14 + $0x704] ss:$28 sps:$4 sm:$0xff]  }
 0x349   :  { %v2884_v59 = vpop.f32.mrf.mxu0  ;;  %v2813_v54 = vpop.f32.mrf.mxu1  ;;  %6314 = vmatmul.mubr.bf16.vlgmr.msra.gmra.mxu0 %v10227_v4  ;;  %6363 = vmatpush1.bf16.msra.mxu1 %v8696_v52  ;;  %v3278_v21 = vmax.f32 %v2877_v16, %v3214_v11  ;;  %11187 = vst [vmem:[#allocation35_spill] sm:$0xff] %v10247_v20 }
 0x34a   :  { %v3222_v37 = vmul.f32 0.2, %v2881_v44  ;;  %v2814_v45 = vadd.f32 %v2813_v54, %v10162_v50  ;;  %6428 = vmatpush1.bf16.msra.mxu0 %v8732_v49  ;;  %v3285_v43 = vmax.f32 %v2879_v61, %v3221_v3  ;;  %6364 = vmatprep.subr.bf16.mxu1 %v8701_v14  ;;  %v2885_v8 = vadd.f32 %v2884_v59, %v2812_v47 }
 0x34b   :  { %v2886_v10 = vpop.f32.mrf.mxu0  ;;  %v2815_v0 = vpop.f32.mrf.mxu1  ;;  %6429 = vmatprep.subr.bf16.mxu0 %v8740_v40  ;;  %v8705_v40 = vld [vmem:[#allocation14 + $0x700] ss:$28 sps:$4 sm:$0xff]  }
 0x34c   :  { %v3286_v6 = vmax.f32 %v2881_v44, %v3222_v37  ;;  %v2816_v9 = vadd.f32 %v2815_v0, %v10154_v2  ;;  %v2887_v29 = vadd.f32 %v2886_v10, %v2814_v45  ;;  %v10244_v58 = vpack.c.bf16 %v3285_v43, %v3277_v38  ;;  %v8750_v44 = vld [vmem:[#allocation14 + $0xb60] ss:$28 sps:$4 sm:$0xff]   ;;  %v8710_v45 = vld [vmem:[#allocation14 + $0xa4c] ss:$28 sps:$4 sm:$0xff]  }
 0x34d   :  { %v2888_v51 = vpop.f32.mrf.mxu0  ;;  %v2817_v24 = vpop.f32.mrf.mxu1  ;;  %6365 = vmatpush1.bf16.msra.mxu1 %v8699_v42  ;;  %v3229_v61 = vmul.f32 0.2, %v2885_v8 }
 0x34e   :  { %v10242_v63 = vpack.c.bf16 %v3286_v6, %v3278_v21  ;;  %v2889_v22 = vadd.f32 %v2888_v51, %v2816_v9  ;;  %6430 = vmatpush1.bf16.msra.mxu0 %v8738_v56  ;;  %v2818_v16 = vadd.f32 %v2817_v24, %v10162_v50  ;;  %6366 = vmatprep.subr.bf16.mxu1 %v8704_v12  ;;  %v3230_v49 = vmul.f32 0.2, %v2887_v29  ;;  %v8708_v6 = vld [vmem:[#allocation14 + $0xa48] ss:$28 sps:$4 sm:$0xff]   ;;  %v8713_v9 = vld [vmem:[#allocation14 + $0xa14] ss:$28 sps:$4 sm:$0xff]  }
 0x34f   :  { %v2890_v19 = vpop.f32.mrf.mxu0  ;;  %v2821_v28 = vpop.f32.mrf.mxu1  ;;  %6431 = vmatprep.subr.bf16.mxu0 %v8746_v23  ;;  %6271 = vmatmul.mubr.bf16.gmra.mxu1 %v10247_v20  ;;  %v3293_v35 = vmax.f32 %v2885_v8, %v3229_v61  ;;  %v8756_v51 = vld [vmem:[#allocation14 + $0xb28] ss:$28 sps:$4 sm:$0xff]   ;;  %v8764_v24 = vld [vmem:[#allocation14 + $0xaf4] ss:$28 sps:$4 sm:$0xff]  }
 0x350   :  { %v3237_v46 = vmul.f32 0.2, %v2889_v22  ;;  %6323 = vmatprep.mubr.bf16.mxu0 %v10242_v63  ;;  %v2891_v41 = vadd.f32 %v2890_v19, %v2818_v16  ;;  %v2822_v25 = vadd.f32 %v2821_v28, %v10154_v2  ;;  %v3294_v10 = vmax.f32 %v2887_v29, %v3230_v49  ;;  %v8762_v19 = vld [vmem:[#allocation14 + $0xaf0] ss:$28 sps:$4 sm:$0xff]   ;;  %v8768_v49 = vld [vmem:[#allocation14 + $0xab8] ss:$28 sps:$4 sm:$0xff]  }
 0x351   :  { %v2894_v27 = vpop.f32.mrf.mxu0  ;;  %v2823_v17 = vpop.f32.mrf.mxu1  ;;  %6324 = vmatmul.mubr.bf16.gmra.mxu0 %v10244_v58  ;;  %6367 = vmatpush1.bf16.msra.mxu1 %v8702_v48  ;;  %v8716_v48 = vld [vmem:[#allocation14 + $0x9dc] ss:$28 sps:$4 sm:$0xff]   ;;  %v8776_v61 = vld [vmem:[#allocation14 + $0xa84] ss:$28 sps:$4 sm:$0xff]  }
 0x352   :  { %v2824_v52 = vadd.f32 %v2823_v17, %v10162_v50  ;;  %6432 = vmatpush1.bf16.msra.mxu0 %v8744_v26  ;;  %v3238_v59 = vmul.f32 0.2, %v2891_v41  ;;  %v3301_v3 = vmax.f32 %v2889_v22, %v3237_v46  ;;  %6368 = vmatprep.subr.bf16.mxu1 %v8707_v18  ;;  %v2895_v43 = vadd.f32 %v2894_v27, %v2822_v25  ;;  %v8711_v22 = vld [vmem:[#allocation14 + $0xa10] ss:$28 sps:$4 sm:$0xff]   ;;  %v8714_v18 = vld [vmem:[#allocation14 + $0x9d8] ss:$28 sps:$4 sm:$0xff]  }
 0x353   :  { %v2896_v11 = vpop.f32.mrf.mxu0  ;;  %v2825_v14 = vpop.f32.mrf.mxu1  ;;  %6433 = vmatprep.subr.bf16.mxu0 %v8752_v39  ;;  %v8770_v39 = vld [vmem:[#allocation14 + $0xabc] ss:$28 sps:$4 sm:$0xff]   ;;  %v8719_v17 = vld [vmem:[#allocation14 + $0x9a4] ss:$28 sps:$4 sm:$0xff]  }
 0x354   :  { %v2897_v54 = vadd.f32 %v2896_v11, %v2824_v52  ;;  %v2826_v37 = vadd.f32 %v2825_v14, %v10154_v2  ;;  %v3302_v56 = vmax.f32 %v2891_v41, %v3238_v59  ;;  %v10258_v2 = vpack.c.bf16 %v3301_v3, %v3293_v35  ;;  %v8717_v25 = vld [vmem:[#allocation14 + $0x9a0] ss:$28 sps:$4 sm:$0xff]   ;;  %v8722_v11 = vld [vmem:[#allocation14 + $0x96c] ss:$28 sps:$4 sm:$0xff]  }
 0x355   :  { %v2898_v47 = vpop.f32.mrf.mxu0  ;;  %v2827_v53 = vpop.f32.mrf.mxu1  ;;  %6369 = vmatpush1.bf16.msra.mxu1 %v8705_v40  ;;  %v3245_v8 = vmul.f32 0.2, %v2895_v43  ;;  %v8774_v52 = vld [vmem:[#allocation14 + $0xa80] ss:$28 sps:$4 sm:$0xff]   ;;  %v8720_v59 = vld [vmem:[#allocation14 + $0x968] ss:$28 sps:$4 sm:$0xff]  }
 0x356   :  { %v2899_v0 = vadd.f32 %v2898_v47, %v2826_v37  ;;  %v2828_v42 = vadd.f32 %v2827_v53, %v10162_v50  ;;  %6434 = vmatpush1.bf16.msra.mxu0 %v8750_v44  ;;  %v10256_v23 = vpack.c.bf16 %v3302_v56, %v3294_v10  ;;  %v3246_v12 = vmul.f32 0.2, %v2897_v54  ;;  %6370 = vmatprep.subr.bf16.mxu1 %v8710_v45  ;;  %v8782_v44 = vld [vmem:[#allocation14 + $0xdcc] ss:$28 sps:$4 sm:$0xff]   ;;  %v8725_v40 = vld [vmem:[#allocation14 + $0x934] ss:$28 sps:$4 sm:$0xff]  }
 0x357   :  { %v2900_v21 = vpop.f32.mrf.mxu0  ;;  %6435 = vmatprep.subr.bf16.mxu0 %v8758_v31  ;;  %v3309_v46 = vmax.f32 %v2895_v43, %v3245_v8  ;;  %v8780_v14 = vld [vmem:[#allocation14 + $0xdc8] ss:$28 sps:$4 sm:$0xff]   ;;  %v8788_v31 = vld [vmem:[#allocation14 + $0xd94] ss:$28 sps:$4 sm:$0xff]   ;;  %v8728_v37 = vld [vmem:[#allocation14 + $0x8fc] ss:$28 sps:$4 sm:$0xff]  }
 0x358   :  { %v3253_v38 = vmul.f32 0.2, %v2899_v0  ;;  %v2901_v29 = vadd.f32 %v2900_v21, %v2828_v42  ;;  %6333 = vmatprep.mubr.bf16.mxu0 %v10256_v23  ;;  %v3310_v26 = vmax.f32 %v2897_v54, %v3246_v12  ;;  %v8723_v3 = vld [vmem:[#allocation14 + $0x930] ss:$28 sps:$4 sm:$0xff]   ;;  %v8794_v47 = vld [vmem:[#allocation14 + $0xd5c] ss:$28 sps:$4 sm:$0xff]  }
 0x359   :  { %6334 = vmatmul.mubr.bf16.gmra.mxu0 %v10258_v2  ;;  %6371 = vmatpush2.bf16.msra.mxu1 %v8708_v6  ;;  %v8786_v54 = vld [vmem:[#allocation14 + $0xd90] ss:$28 sps:$4 sm:$0xff]   ;;  %v8726_v45 = vld [vmem:[#allocation14 + $0x8f8] ss:$28 sps:$4 sm:$0xff]   ;;  %v8731_v56 = vld [vmem:[#allocation14 + $0x8c4] ss:$28 sps:$4 sm:$0xff]  }
 0x35a   :  { %v3254_v50 = vmul.f32 0.2, %v2901_v29  ;;  %6436 = vmatpush1.bf16.msra.mxu0 %v8756_v51  ;;  %v3317_v16 = vmax.f32 %v2899_v0, %v3253_v38  ;;  %6372 = vmatprep.subr.bf16.mxu1 %v8713_v9  ;;  %v8792_v10 = vld [vmem:[#allocation14 + $0xd58] ss:$28 sps:$4 sm:$0xff]   ;;  %v8800_v53 = vld [vmem:[#allocation14 + $0xd24] ss:$28 sps:$4 sm:$0xff]  }
 0x35b   :  { %6437 = vmatprep.subr.bf16.mxu0 %v8764_v24  ;;  %v11129_v35 = vsub.s32 4, %v9674_v30  ;;  %v11128_v43 = vsub.s32 5, %v9674_v30  ;;  %v8729_v0 = vld [vmem:[#allocation14 + $0x8c0] ss:$28 sps:$4 sm:$0xff]   ;;  %v8737_v21 = vld [vmem:[#allocation14 + $0x194] ss:$28 sps:$4 sm:$0xff]  }
 0x35c   :  { %v3318_v28 = vmax.f32 %v2901_v29, %v3254_v50  ;;  %v10264_v41 = vpack.c.bf16 %v3317_v16, %v3309_v46  ;;  %v8798_v42 = vld [vmem:[#allocation14 + $0xd20] ss:$28 sps:$4 sm:$0xff]   ;;  %v8806_v6 = vld [vmem:[#allocation14 + $0xcec] ss:$28 sps:$4 sm:$0xff]   ;;  %v8812_v29 = vld [vmem:[#allocation14 + $0xcb4] ss:$28 sps:$4 sm:$0xff]  }
 0x35d   :  { %6373 = vmatpush2.bf16.msra.mxu1 %v8711_v22  ;;  %v10273_v9 = vrot.slane %v10063_v34, %v11129_v35  ;;  %v10278_v51 = vrot.slane %v10063_v34, %v11128_v43  ;;  %v8804_v12 = vld [vmem:[#allocation14 + $0xce8] ss:$28 sps:$4 sm:$0xff]   ;;  %v8818_v34 = vld [vmem:[#allocation14 + $0xc7c] ss:$28 sps:$4 sm:$0xff]  }
 0x35e   :  { %v10262_v27 = vpack.c.bf16 %v3318_v28, %v3310_v26  ;;  %6438 = vmatpush1.bf16.msra.mxu0 %v8762_v19  ;;  %11188 = vst [vmem:[#allocation36_spill] sm:$0xff] %v10264_v41  ;;  %6374 = vmatprep.subr.bf16.mxu1 %v8716_v48  ;;  %v8810_v26 = vld [vmem:[#allocation14 + $0xcb0] ss:$28 sps:$4 sm:$0xff]  }
 0x35f   :  { %6439 = vmatprep.subr.bf16.mxu0 %v8770_v39 }
 0x360   :  { %6343 = vmatprep.mubr.bf16.mxu0 %v10262_v27 }
 0x361   :  { %6344 = vmatmul.mubr.bf16.gmra.mxu0 %v10264_v41  ;;  %6375 = vmatpush2.bf16.msra.mxu1 %v8714_v18 }
 0x362   :  { %6440 = vmatpush1.bf16.msra.mxu0 %v8768_v49  ;;  %6376 = vmatprep.subr.bf16.mxu1 %v8719_v17 }
 0x363   :  { %6441 = vmatprep.subr.bf16.mxu0 %v8776_v61 }
 0x365   :  { %6377 = vmatpush2.bf16.msra.mxu1 %v8717_v25  ;;  %v8816_v25 = vld [vmem:[#allocation14 + $0xc78] ss:$28 sps:$4 sm:$0xff]  }
 0x366   :  { %6442 = vmatpush1.bf16.msra.mxu0 %v8774_v52  ;;  %6378 = vmatprep.subr.bf16.mxu1 %v8722_v11  ;;  %v8824_v11 = vld [vmem:[#allocation14 + $0xc44] ss:$28 sps:$4 sm:$0xff]  }
 0x367   :  { %6443 = vmatprep.subr.bf16.mxu0 %v8782_v44 }
 0x369   :  { %6379 = vmatpush2.bf16.msra.mxu1 %v8720_v59 }
 0x36a   :  { %6444 = vmatpush2.bf16.msra.mxu0 %v8780_v14  ;;  %6380 = vmatprep.subr.bf16.mxu1 %v8725_v40 }
 0x36b   :  { %6445 = vmatprep.subr.bf16.mxu0 %v8788_v31 }
 0x36d   :  { %6381 = vmatpush2.bf16.msra.mxu1 %v8723_v3 }
 0x36e   :  { %6446 = vmatpush2.bf16.msra.mxu0 %v8786_v54  ;;  %6382 = vmatprep.subr.bf16.mxu1 %v8728_v37 }
 0x36f   :  { %6447 = vmatprep.subr.bf16.mxu0 %v8794_v47 }
 0x371   :  { %6383 = vmatpush2.bf16.msra.mxu1 %v8726_v45 }
 0x372   :  { %6448 = vmatpush2.bf16.msra.mxu0 %v8792_v10  ;;  %6384 = vmatprep.subr.bf16.mxu1 %v8731_v56  ;;  %v8822_v10 = vld [vmem:[#allocation14 + $0xc40] ss:$28 sps:$4 sm:$0xff]  }
 0x373   :  { %6449 = vmatprep.subr.bf16.mxu0 %v8800_v53 }
 0x375   :  { %6385 = vmatpush2.bf16.msra.mxu1 %v8729_v0  ;;  %v8830_v0 = vld [vmem:[#allocation14 + $0x514] ss:$28 sps:$4 sm:$0xff]  }
 0x376   :  { %6450 = vmatpush2.bf16.msra.mxu0 %v8798_v42  ;;  %6500 = vmatprep.subr.bf16.mxu1 %v8737_v21 }
 0x377   :  { %v2937_v38 = vpop.f32.mrf.mxu1  ;;  %6451 = vmatprep.subr.bf16.mxu0 %v8806_v6 }
 0x378   :  { %v2938_v8 = vadd.f32 %v2937_v38, %v10273_v9 }
 0x379   :  { %v3010_v24 = vpop.f32.mrf.mxu0  ;;  %v2939_v50 = vpop.f32.mrf.mxu1 }
 0x37a   :  { %v2940_v22 = vadd.f32 %v2939_v50, %v10278_v51  ;;  %6452 = vmatpush2.bf16.msra.mxu0 %v8804_v12  ;;  %v3011_v46 = vadd.f32 %v3010_v24, %v2938_v8 }
 0x37b   :  { %v3012_v19 = vpop.f32.mrf.mxu0  ;;  %v2941_v16 = vpop.f32.mrf.mxu1  ;;  %6453 = vmatprep.subr.bf16.mxu0 %v8812_v29 }
 0x37c   :  { %v3013_v28 = vadd.f32 %v3012_v19, %v2940_v22  ;;  %v2942_v48 = vadd.f32 %v2941_v16, %v10273_v9  ;;  %v3199_v31 = vmul.f32 0.2, %v3011_v46 }
 0x37d   :  { %v3014_v39 = vpop.f32.mrf.mxu0  ;;  %v2943_v18 = vpop.f32.mrf.mxu1 }
 0x37e   :  { %v3015_v49 = vadd.f32 %v3014_v39, %v2942_v48  ;;  %v2944_v17 = vadd.f32 %v2943_v18, %v10278_v51  ;;  %6454 = vmatpush2.bf16.msra.mxu0 %v8810_v26  ;;  %v3200_v44 = vmul.f32 0.2, %v3013_v28  ;;  %v3263_v38 = vmax.f32 %v3011_v46, %v3199_v31  ;;  %v8735_v26 = vld [vmem:[#allocation14 + $0x190] ss:$28 sps:$4 sm:$0xff]   ;;  %v8749_v31 = vld [vmem:[#allocation14 + $0x124] ss:$28 sps:$4 sm:$0xff]  }
 0x37f   :  { %v3016_v61 = vpop.f32.mrf.mxu0  ;;  %v2947_v52 = vpop.f32.mrf.mxu1  ;;  %6455 = vmatprep.subr.bf16.mxu0 %v8818_v34 }
 0x380   :  { %v3207_v59 = vmul.f32 0.2, %v3015_v49  ;;  %v3017_v14 = vadd.f32 %v3016_v61, %v2944_v17  ;;  %v2948_v3 = vadd.f32 %v2947_v52, %v10273_v9  ;;  %v3264_v42 = vmax.f32 %v3013_v28, %v3200_v44  ;;  %v8743_v28 = vld [vmem:[#allocation14 + $0x15c] ss:$28 sps:$4 sm:$0xff]  }
 0x381   :  { %v3020_v40 = vpop.f32.mrf.mxu0  ;;  %v2949_v54 = vpop.f32.mrf.mxu1 }
 0x382   :  { %v3208_v37 = vmul.f32 0.2, %v3017_v14  ;;  %v2950_v47 = vadd.f32 %v2949_v54, %v10278_v51  ;;  %6456 = vmatpush2.bf16.msra.mxu0 %v8816_v25  ;;  %v3271_v56 = vmax.f32 %v3015_v49, %v3207_v59  ;;  %v3021_v29 = vadd.f32 %v3020_v40, %v2948_v3  ;;  %v8741_v59 = vld [vmem:[#allocation14 + $0x158] ss:$28 sps:$4 sm:$0xff]  }
 0x383   :  { %v3022_v45 = vpop.f32.mrf.mxu0  ;;  %v2951_v53 = vpop.f32.mrf.mxu1  ;;  %6457 = vmatprep.subr.bf16.mxu0 %v8824_v11 }
 0x384   :  { %v3272_v21 = vmax.f32 %v3017_v14, %v3208_v37  ;;  %v3023_v6 = vadd.f32 %v3022_v45, %v2950_v47  ;;  %v2952_v24 = vadd.f32 %v2951_v53, %v10273_v9  ;;  %v10290_v16 = vpack.c.bf16 %v3271_v56, %v3263_v38 }
 0x385   :  { %v3024_v12 = vpop.f32.mrf.mxu0  ;;  %v2953_v8 = vpop.f32.mrf.mxu1  ;;  %v3215_v49 = vmul.f32 0.2, %v3021_v29 }
 0x386   :  { %v10287_v50 = vpack.c.bf16 %v3272_v21, %v3264_v42  ;;  %v2954_v22 = vadd.f32 %v2953_v8, %v10278_v51  ;;  %6458 = vmatpush2.bf16.msra.mxu0 %v8822_v10  ;;  %v3025_v34 = vadd.f32 %v3024_v12, %v2952_v24  ;;  %v3216_v39 = vmul.f32 0.2, %v3023_v6  ;;  %v8747_v12 = vld [vmem:[#allocation14 + $0x120] ss:$28 sps:$4 sm:$0xff]  }
 0x387   :  { %v3026_v19 = vpop.f32.mrf.mxu0  ;;  %v2957_v48 = vpop.f32.mrf.mxu1  ;;  %6573 = vmatprep.subr.bf16.mxu0 %v8830_v0  ;;  %v3279_v45 = vmax.f32 %v3021_v29, %v3215_v49 }
 0x388   :  { %11189 = vst [vmem:[#allocation37_spill] sm:$0xff] %v10287_v50  ;;  %v3027_v18 = vadd.f32 %v3026_v19, %v2954_v22  ;;  %6386 = vmatprep.mubr.bf16.mxu1 %v10287_v50  ;;  %v3223_v17 = vmul.f32 0.2, %v3025_v34  ;;  %v2958_v52 = vadd.f32 %v2957_v48, %v10273_v9  ;;  %v3280_v3 = vmax.f32 %v3023_v6, %v3216_v39  ;;  %v8755_v6 = vld [vmem:[#allocation14 + $0xec] ss:$28 sps:$4 sm:$0xff]  }
 0x389   :  { %v3030_v46 = vpop.f32.mrf.mxu0  ;;  %v2959_v61 = vpop.f32.mrf.mxu1  ;;  %6387 = vmatmul.mubr.bf16.vlgmr.msra.gmra.mxu1 %v10290_v16 }
 0x38a   :  { %v3224_v25 = vmul.f32 0.2, %v3027_v18  ;;  %v2960_v11 = vadd.f32 %v2959_v61, %v10278_v51  ;;  %6501 = vmatpush1.bf16.msra.mxu1 %v8735_v26  ;;  %v3287_v14 = vmax.f32 %v3025_v34, %v3223_v17  ;;  %v3031_v0 = vadd.f32 %v3030_v46, %v2958_v52  ;;  %v8753_v46 = vld [vmem:[#allocation14 + $0xe8] ss:$28 sps:$4 sm:$0xff]   ;;  %v8761_v61 = vld [vmem:[#allocation14 + $0xb4] ss:$28 sps:$4 sm:$0xff]  }
 0x38b   :  { %v3032_v44 = vpop.f32.mrf.mxu0  ;;  %v2961_v40 = vpop.f32.mrf.mxu1  ;;  %6502 = vmatprep.subr.bf16.mxu1 %v8743_v28 }
 0x38c   :  { %v3288_v54 = vmax.f32 %v3027_v18, %v3224_v25  ;;  %v2962_v37 = vadd.f32 %v2961_v40, %v10273_v9  ;;  %v3033_v10 = vadd.f32 %v3032_v44, %v2960_v11  ;;  %v10299_v38 = vpack.c.bf16 %v3287_v14, %v3279_v45 }
 0x38d   :  { %v3034_v47 = vpop.f32.mrf.mxu0  ;;  %v2963_v56 = vpop.f32.mrf.mxu1  ;;  %v3231_v48 = vmul.f32 0.2, %v3031_v0 }
 0x38e   :  { %v10297_v53 = vpack.c.bf16 %v3288_v54, %v3280_v3  ;;  %v3035_v42 = vadd.f32 %v3034_v47, %v2962_v37  ;;  %6503 = vmatpush1.bf16.msra.mxu1 %v8741_v59  ;;  %v2964_v24 = vadd.f32 %v2963_v56, %v10278_v51  ;;  %v3232_v29 = vmul.f32 0.2, %v3033_v10  ;;  %v8759_v56 = vld [vmem:[#allocation14 + $0xb0] ss:$28 sps:$4 sm:$0xff]  }
 0x38f   :  { %v3036_v21 = vpop.f32.mrf.mxu0  ;;  %v2967_v8 = vpop.f32.mrf.mxu1  ;;  %6504 = vmatprep.subr.bf16.mxu1 %v8749_v31  ;;  %v3295_v31 = vmax.f32 %v3031_v0, %v3231_v48 }
 0x390   :  { %v3239_v22 = vmul.f32 0.2, %v3035_v42  ;;  %6396 = vmatprep.mubr.bf16.mxu1 %v10297_v53  ;;  %v3037_v26 = vadd.f32 %v3036_v21, %v2964_v24  ;;  %v2968_v28 = vadd.f32 %v2967_v8, %v10273_v9  ;;  %v3296_v59 = vmax.f32 %v3033_v10, %v3232_v29  ;;  %v8767_v24 = vld [vmem:[#allocation14 + $0x7c] ss:$28 sps:$4 sm:$0xff]  }
 0x391   :  { %v3040_v19 = vpop.f32.mrf.mxu0  ;;  %v2969_v34 = vpop.f32.mrf.mxu1  ;;  %6397 = vmatmul.mubr.bf16.gmra.mxu1 %v10299_v38 }
 0x392   :  { %v2970_v39 = vadd.f32 %v2969_v34, %v10278_v51  ;;  %6505 = vmatpush1.bf16.msra.mxu1 %v8747_v12  ;;  %v3240_v49 = vmul.f32 0.2, %v3037_v26  ;;  %v3303_v25 = vmax.f32 %v3035_v42, %v3239_v22  ;;  %v3041_v3 = vadd.f32 %v3040_v19, %v2968_v28  ;;  %v8773_v19 = vld [vmem:[#allocation14 + $0x44] ss:$28 sps:$4 sm:$0xff]   ;;  %v8779_v28 = vld [vmem:[#allocation14 + $0xc] ss:$28 sps:$4 sm:$0xff]  }
 0x393   :  { %v3042_v18 = vpop.f32.mrf.mxu0  ;;  %v2971_v17 = vpop.f32.mrf.mxu1  ;;  %6506 = vmatprep.subr.bf16.mxu1 %v8755_v6  ;;  %v8771_v34 = vld [vmem:[#allocation14 + $0x40] ss:$28 sps:$4 sm:$0xff]  }
 0x394   :  { %v3043_v52 = vadd.f32 %v3042_v18, %v2970_v39  ;;  %v2972_v11 = vadd.f32 %v2971_v17, %v10273_v9  ;;  %v3304_v14 = vmax.f32 %v3037_v26, %v3240_v49  ;;  %v10310_v21 = vpack.c.bf16 %v3303_v25, %v3295_v31  ;;  %v8777_v39 = vld [vmem:[#allocation14 + $0x8] ss:$28 sps:$4 sm:$0xff]   ;;  %v8785_v18 = vld [vmem:[#allocation14 + $0x354] ss:$28 sps:$4 sm:$0xff]   ;;  %v8791_v49 = vld [vmem:[#allocation14 + $0x31c] ss:$28 sps:$4 sm:$0xff]  }
 0x395   :  { %v3044_v44 = vpop.f32.mrf.mxu0  ;;  %v2973_v40 = vpop.f32.mrf.mxu1  ;;  %v3247_v10 = vmul.f32 0.2, %v3041_v3  ;;  %v8789_v17 = vld [vmem:[#allocation14 + $0x318] ss:$28 sps:$4 sm:$0xff]   ;;  %v8795_v25 = vld [vmem:[#allocation14 + $0x2e0] ss:$28 sps:$4 sm:$0xff]  }
 0x396   :  { %v3045_v54 = vadd.f32 %v3044_v44, %v2972_v11  ;;  %v2974_v37 = vadd.f32 %v2973_v40, %v10278_v51  ;;  %6507 = vmatpush1.bf16.msra.mxu1 %v8753_v46  ;;  %v10308_v47 = vpack.c.bf16 %v3304_v14, %v3296_v59  ;;  %v3248_v42 = vmul.f32 0.2, %v3043_v52  ;;  %v8765_v51 = vld [vmem:[#allocation14 + $0x78] ss:$28 sps:$4 sm:$0xff]   ;;  %v8783_v46 = vld [vmem:[#allocation14 + $0x350] ss:$28 sps:$4 sm:$0xff]  }
 0x397   :  { %v3046_v45 = vpop.f32.mrf.mxu0  ;;  %6508 = vmatprep.subr.bf16.mxu1 %v8761_v61  ;;  %v3311_v29 = vmax.f32 %v3041_v3, %v3247_v10  ;;  %v8797_v61 = vld [vmem:[#allocation14 + $0x2e4] ss:$28 sps:$4 sm:$0xff]   ;;  %v11127_v11 = vsub.s32 6, %v9674_v30  ;;  %v1321_v59 = vsub.s32 7, %v9674_v30  ;;  %v8809_v14 = vld [vmem:[#allocation14 + $0x274] ss:$28 sps:$4 sm:$0xff]  }
 0x398   :  { %v3255_v12 = vmul.f32 0.2, %v3045_v54  ;;  %v3047_v9 = vadd.f32 %v3046_v45, %v2974_v37  ;;  %6406 = vmatprep.mubr.bf16.mxu1 %v10308_v47  ;;  %v3312_v8 = vmax.f32 %v3043_v52, %v3248_v42  ;;  %v8803_v52 = vld [vmem:[#allocation14 + $0x2ac] ss:$28 sps:$4 sm:$0xff]   ;;  %v9340_v40 = vld [vmem:[#allocation13] sm:$0xff] }
 0x399   :  { %6407 = vmatmul.mubr.bf16.gmra.mxu1 %v10310_v21  ;;  %v8801_v44 = vld [vmem:[#allocation14 + $0x2a8] ss:$28 sps:$4 sm:$0xff]   ;;  %v10325_v31 = vrot.slane %v9340_v40, %v11127_v11  ;;  %v8807_v3 = vld [vmem:[#allocation14 + $0x270] ss:$28 sps:$4 sm:$0xff]   ;;  %v8815_v45 = vld [vmem:[#allocation14 + $0x23c] ss:$28 sps:$4 sm:$0xff]  }
 0x39a   :  { %v3256_v0 = vmul.f32 0.2, %v3047_v9  ;;  %6509 = vmatpush1.bf16.msra.mxu1 %v8759_v56  ;;  %v3319_v6 = vmax.f32 %v3045_v54, %v3255_v12  ;;  %v10327_v54 = vrot.slane %v9340_v40, %v1321_v59  ;;  %v8813_v10 = vld [vmem:[#allocation14 + $0x238] ss:$28 sps:$4 sm:$0xff]  }
 0x39b   :  { %6510 = vmatprep.subr.bf16.mxu1 %v8767_v24 }
 0x39c   :  { %v3320_v22 = vmax.f32 %v3047_v9, %v3256_v0  ;;  %v10316_v48 = vpack.c.bf16 %v3319_v6, %v3311_v29 }
 0x39e   :  { %v10314_v26 = vpack.c.bf16 %v3320_v22, %v3312_v8  ;;  %6511 = vmatpush1.bf16.msra.mxu1 %v8765_v51  ;;  %11190 = vst [vmem:[#allocation38_spill] sm:$0xff] %v10316_v48  ;;  %v8821_v51 = vld [vmem:[#allocation14 + $0x204] ss:$28 sps:$4 sm:$0xff]  }
 0x39f   :  { %6512 = vmatprep.subr.bf16.mxu1 %v8773_v19 }
 0x3a0   :  { %6416 = vmatprep.mubr.bf16.mxu1 %v10314_v26 }
 0x3a1   :  { %6417 = vmatmul.mubr.bf16.gmra.mxu1 %v10316_v48 }
 0x3a2   :  { %6513 = vmatpush1.bf16.msra.mxu1 %v8771_v34  ;;  %6532 = vmatprep.mubr.bf16.mxu1 %v10089_v15 }
 0x3a3   :  { %6514 = vmatprep.subr.bf16.mxu1 %v8779_v28 }
 0x3a6   :  { %6515 = vmatpush1.bf16.msra.mxu1 %v8777_v39 }
 0x3a7   :  { %6516 = vmatprep.subr.bf16.mxu1 %v8785_v18  ;;  %v8819_v18 = vld [vmem:[#allocation14 + $0x200] ss:$28 sps:$4 sm:$0xff]  }
 0x3aa   :  { %6517 = vmatpush2.bf16.msra.mxu1 %v8783_v46 }
 0x3ab   :  { %6518 = vmatprep.subr.bf16.mxu1 %v8791_v49  ;;  %v8827_v49 = vld [vmem:[#allocation14 + $0x1cc] ss:$28 sps:$4 sm:$0xff]  }
 0x3ae   :  { %6519 = vmatpush2.bf16.msra.mxu1 %v8789_v17 }
 0x3af   :  { %6520 = vmatprep.subr.bf16.mxu1 %v8797_v61 }
 0x3b2   :  { %6521 = vmatpush2.bf16.msra.mxu1 %v8795_v25 }
 0x3b3   :  { %6522 = vmatprep.subr.bf16.mxu1 %v8803_v52 }
 0x3b6   :  { %6523 = vmatpush2.bf16.msra.mxu1 %v8801_v44 }
 0x3b7   :  { %v3083_v37 = vpop.f32.mrf.mxu1  ;;  %6524 = vmatprep.subr.bf16.mxu1 %v8809_v14 }
 0x3b8   :  { %v3084_v42 = vadd.f32 %v3083_v37, %v10325_v31 }
 0x3b9   :  { %v3156_v56 = vpop.f32.mrf.mxu0  ;;  %v3085_v12 = vpop.f32.mrf.mxu1 }
 0x3ba   :  { %v3086_v9 = vadd.f32 %v3085_v12, %v10327_v54  ;;  %6525 = vmatpush2.bf16.msra.mxu1 %v8807_v3  ;;  %v3157_v19 = vadd.f32 %v3156_v56, %v3084_v42  ;;  %v8833_v12 = vld [vmem:[#allocation14 + $0x894] ss:$28 sps:$4 sm:$0xff]  }
 0x3bb   :  { %v3158_v24 = vpop.f32.mrf.mxu0  ;;  %v3087_v0 = vpop.f32.mrf.mxu1  ;;  %6526 = vmatprep.subr.bf16.mxu1 %v8815_v45  ;;  %v8825_v45 = vld [vmem:[#allocation14 + $0x1c8] ss:$28 sps:$4 sm:$0xff]  }
 0x3bc   :  { %v3159_v8 = vadd.f32 %v3158_v24, %v3086_v9  ;;  %v3088_v6 = vadd.f32 %v3087_v0, %v10325_v31  ;;  %v3201_v44 = vmul.f32 0.2, %v3157_v19 }
 0x3bd   :  { %v3160_v22 = vpop.f32.mrf.mxu0  ;;  %v3089_v29 = vpop.f32.mrf.mxu1 }
 0x3be   :  { %v3161_v34 = vadd.f32 %v3160_v22, %v3088_v6  ;;  %v3090_v28 = vadd.f32 %v3089_v29, %v10327_v54  ;;  %6527 = vmatpush2.bf16.msra.mxu1 %v8813_v10  ;;  %v3202_v17 = vmul.f32 0.2, %v3159_v8 }
 0x3bf   :  { %v3162_v39 = vpop.f32.mrf.mxu0  ;;  %v3093_v46 = vpop.f32.mrf.mxu1  ;;  %6528 = vmatprep.subr.bf16.mxu1 %v8821_v51  ;;  %v3265_v51 = vmax.f32 %v3157_v19, %v3201_v44  ;;  %v8839_v44 = vld [vmem:[#allocation14 + $0x85c] ss:$28 sps:$4 sm:$0xff]  }
 0x3c0   :  { %v3209_v61 = vmul.f32 0.2, %v3161_v34  ;;  %v3163_v25 = vadd.f32 %v3162_v39, %v3090_v28  ;;  %v3094_v59 = vadd.f32 %v3093_v46, %v10325_v31  ;;  %v3266_v9 = vmax.f32 %v3159_v8, %v3202_v17  ;;  %v8831_v8 = vld [vmem:[#allocation14 + $0x890] ss:$28 sps:$4 sm:$0xff]   ;;  %v8836_v17 = vld [vmem:[#allocation14 + $0x4dc] ss:$28 sps:$4 sm:$0xff]  }
 0x3c1   :  { %v3166_v52 = vpop.f32.mrf.mxu0  ;;  %v3095_v14 = vpop.f32.mrf.mxu1 }
 0x3c2   :  { %v3210_v40 = vmul.f32 0.2, %v3163_v25  ;;  %v3096_v3 = vadd.f32 %v3095_v14, %v10327_v54  ;;  %6529 = vmatpush2.bf16.msra.mxu1 %v8819_v18  ;;  %v3273_v56 = vmax.f32 %v3161_v34, %v3209_v61  ;;  %v3167_v6 = vadd.f32 %v3166_v52, %v3094_v59  ;;  %v8828_v18 = vld [vmem:[#allocation14 + $0x510] ss:$28 sps:$4 sm:$0xff]  }
 0x3c3   :  { %v3168_v37 = vpop.f32.mrf.mxu0  ;;  %v3097_v42 = vpop.f32.mrf.mxu1  ;;  %6530 = vmatprep.subr.bf16.mxu1 %v8827_v49 }
 0x3c4   :  { %v3274_v24 = vmax.f32 %v3163_v25, %v3210_v40  ;;  %v3169_v10 = vadd.f32 %v3168_v37, %v3096_v3  ;;  %v3098_v22 = vadd.f32 %v3097_v42, %v10325_v31  ;;  %v10339_v34 = vpack.c.bf16 %v3273_v56, %v3265_v51  ;;  %v8834_v42 = vld [vmem:[#allocation14 + $0x4d8] ss:$28 sps:$4 sm:$0xff]  }
 0x3c5   :  { %v3170_v0 = vpop.f32.mrf.mxu0  ;;  %v3099_v29 = vpop.f32.mrf.mxu1  ;;  %v3217_v59 = vmul.f32 0.2, %v3167_v6 }
 0x3c6   :  { %v10336_v28 = vpack.c.bf16 %v3274_v24, %v3266_v9  ;;  %v3100_v39 = vadd.f32 %v3099_v29, %v10327_v54  ;;  %6531 = vmatpush2.bf16.msra.mxu1 %v8825_v45  ;;  %11192 = vst [vmem:[#allocation40_spill] sm:$0xff] %v10339_v34  ;;  %v3171_v49 = vadd.f32 %v3170_v0, %v3098_v22  ;;  %v3218_v25 = vmul.f32 0.2, %v3169_v10  ;;  %v8837_v24 = vld [vmem:[#allocation14 + $0x858] ss:$28 sps:$4 sm:$0xff]  }
 0x3c7   :  { %v3172_v46 = vpop.f32.mrf.mxu0  ;;  %v3103_v61 = vpop.f32.mrf.mxu1  ;;  %6646 = vmatprep.subr.bf16.mxu1 %v8833_v12  ;;  %v8842_v0 = vld [vmem:[#allocation14 + $0x4a4] ss:$28 sps:$4 sm:$0xff]  }
 0x3c8   :  { %11191 = vst [vmem:[#allocation39_spill] sm:$0xff] %v10336_v28  ;;  %v3173_v19 = vadd.f32 %v3172_v46, %v3100_v39  ;;  %6459 = vmatprep.mubr.bf16.mxu0 %v10336_v28  ;;  %v3225_v14 = vmul.f32 0.2, %v3171_v49  ;;  %v3104_v37 = vadd.f32 %v3103_v61, %v10325_v31  ;;  %v3282_v51 = vmax.f32 %v3169_v10, %v3218_v25  ;;  %v8845_v46 = vld [vmem:[#allocation14 + $0x824] ss:$28 sps:$4 sm:$0xff]  }
 0x3c9   :  { %v3176_v52 = vpop.f32.mrf.mxu0  ;;  %6533 = vmatmul.mubr.bf16.vlgmr.msra.gmra.mxu1 %v10166_v13  ;;  %v3105_v40 = vpop.f32.mrf.mxu1  ;;  %6460 = vmatmul.mubr.bf16.vlgmr.msra.gmra.mxu0 %v10339_v34  ;;  %v3281_v61 = vmax.f32 %v3167_v6, %v3217_v59  ;;  %v8851_v59 = vld [vmem:[#allocation14 + $0x7ec] ss:$28 sps:$4 sm:$0xff]  }
 0x3ca   :  { %v3226_v3 = vmul.f32 0.2, %v3173_v19  ;;  %v3106_v45 = vadd.f32 %v3105_v40, %v10327_v54  ;;  %6542 = vmatprep.mubr.bf16.mxu1 %v10168_v7  ;;  %6574 = vmatpush1.bf16.msra.mxu0 %v8828_v18  ;;  %v3289_v12 = vmax.f32 %v3171_v49, %v3225_v14  ;;  %v3177_v18 = vadd.f32 %v3176_v52, %v3104_v37 }
 0x3cb   :  { %v3178_v56 = vpop.f32.mrf.mxu0  ;;  %6647 = vmatpush1.bf16.msra.mxu1 %v8831_v8  ;;  %v3107_v9 = vpop.f32.mrf.mxu1  ;;  %6575 = vmatprep.subr.bf16.mxu0 %v8836_v17  ;;  %v8840_v8 = vld [vmem:[#allocation14 + $0x4a0] ss:$28 sps:$4 sm:$0xff]  }
 0x3cc   :  { %v3290_v22 = vmax.f32 %v3173_v19, %v3226_v3  ;;  %v3108_v29 = vadd.f32 %v3107_v9, %v10325_v31  ;;  %6648 = vmatprep.subr.bf16.mxu1 %v8839_v44  ;;  %v3179_v40 = vadd.f32 %v3178_v56, %v3106_v45  ;;  %v10350_v17 = vpack.c.bf16 %v3289_v12, %v3281_v61  ;;  %v8843_v19 = vld [vmem:[#allocation14 + $0x820] ss:$28 sps:$4 sm:$0xff]   ;;  %v8848_v44 = vld [vmem:[#allocation14 + $0x46c] ss:$28 sps:$4 sm:$0xff]   ;;  %v8857_v61 = vld [vmem:[#allocation14 + $0x7b4] ss:$28 sps:$4 sm:$0xff]  }
 0x3cd   :  { %v3180_v39 = vpop.f32.mrf.mxu0  ;;  %v3109_v11 = vpop.f32.mrf.mxu1  ;;  %v3233_v45 = vmul.f32 0.2, %v3177_v18  ;;  %v8846_v12 = vld [vmem:[#allocation14 + $0x468] ss:$28 sps:$4 sm:$0xff]  }
 0x3ce   :  { %v10348_v43 = vpack.c.bf16 %v3290_v22, %v3282_v51  ;;  %v3181_v35 = vadd.f32 %v3180_v39, %v3108_v29  ;;  %6576 = vmatpush1.bf16.msra.mxu0 %v8834_v42  ;;  %11194 = vst [vmem:[#allocation42_spill] sm:$0xff] %v10350_v17  ;;  %v3110_v10 = vadd.f32 %v3109_v11, %v10327_v54  ;;  %v3234_v52 = vmul.f32 0.2, %v3179_v40  ;;  %v8854_v51 = vld [vmem:[#allocation14 + $0x434] ss:$28 sps:$4 sm:$0xff]  }
 0x3cf   :  { %v3182_v49 = vpop.f32.mrf.mxu0  ;;  %6649 = vmatpush1.bf16.msra.mxu1 %v8837_v24  ;;  %v3113_v25 = vpop.f32.mrf.mxu1  ;;  %6577 = vmatprep.subr.bf16.mxu0 %v8842_v0  ;;  %v8849_v0 = vld [vmem:[#allocation14 + $0x7e8] ss:$28 sps:$4 sm:$0xff]  }
 0x3d0   :  { %11193 = vst [vmem:[#allocation41_spill] sm:$0xff] %v10348_v43  ;;  %v3241_v14 = vmul.f32 0.2, %v3181_v35  ;;  %6469 = vmatprep.mubr.bf16.mxu0 %v10348_v43  ;;  %6650 = vmatprep.subr.bf16.mxu1 %v8845_v46  ;;  %v3183_v3 = vadd.f32 %v3182_v49, %v3110_v10  ;;  %v3114_v11 = vadd.f32 %v3113_v25, %v10325_v31 }
 0x3d1   :  { %v3186_v6 = vpop.f32.mrf.mxu0  ;;  %6543 = vmatmul.mubr.bf16.gmra.mxu1 %v10197_v36  ;;  %v3115_v37 = vpop.f32.mrf.mxu1  ;;  %6470 = vmatmul.mubr.bf16.gmra.mxu0 %v10350_v17  ;;  %v3298_v49 = vmax.f32 %v3179_v40, %v3234_v52 }
 0x3d2   :  { %v3116_v56 = vadd.f32 %v3115_v37, %v10327_v54  ;;  %6552 = vmatprep.mubr.bf16.mxu1 %v10204_v60  ;;  %6578 = vmatpush1.bf16.msra.mxu0 %v8840_v8  ;;  %v3242_v9 = vmul.f32 0.2, %v3183_v3  ;;  %v3305_v22 = vmax.f32 %v3181_v35, %v3241_v14  ;;  %v3297_v37 = vmax.f32 %v3177_v18, %v3233_v45  ;;  %v8852_v35 = vld [vmem:[#allocation14 + $0x430] ss:$28 sps:$4 sm:$0xff]   ;;  %v8863_v18 = vld [vmem:[#allocation14 + $0x77c] ss:$28 sps:$4 sm:$0xff]  }
 0x3d3   :  { %v3188_v42 = vpop.f32.mrf.mxu0  ;;  %6651 = vmatpush1.bf16.msra.mxu1 %v8843_v19  ;;  %v3117_v24 = vpop.f32.mrf.mxu1  ;;  %6579 = vmatprep.subr.bf16.mxu0 %v8848_v44  ;;  %v3187_v30 = vadd.f32 %v3186_v6, %v3114_v11  ;;  %v8855_v14 = vld [vmem:[#allocation14 + $0x7b0] ss:$28 sps:$4 sm:$0xff]   ;;  %v8861_v45 = vld [vmem:[#allocation14 + $0x778] ss:$28 sps:$4 sm:$0xff]  }
 0x3d4   :  { %v3189_v29 = vadd.f32 %v3188_v42, %v3116_v56  ;;  %v3118_v39 = vadd.f32 %v3117_v24, %v10325_v31  ;;  %6652 = vmatprep.subr.bf16.mxu1 %v8851_v59  ;;  %v3306_v10 = vmax.f32 %v3183_v3, %v3242_v9  ;;  %v8860_v31 = vld [vmem:[#allocation14 + $0x3fc] ss:$28 sps:$4 sm:$0xff]   ;;  %v10363_v56 = vpack.c.bf16 %v3305_v22, %v3297_v37  ;;  %v8869_v9 = vld [vmem:[#allocation14 + $0x744] ss:$28 sps:$4 sm:$0xff]   ;;  %v8879_v37 = vld [vmem:[#allocation14 + $0xa50] ss:$28 sps:$4 sm:$0xff]  }
 0x3d5   :  { %v3190_v46 = vpop.f32.mrf.mxu0  ;;  %v3119_v25 = vpop.f32.mrf.mxu1  ;;  %v8858_v3 = vld [vmem:[#allocation14 + $0x3f8] ss:$28 sps:$4 sm:$0xff]   ;;  %v8867_v22 = vld [vmem:[#allocation14 + $0x740] ss:$28 sps:$4 sm:$0xff]  }
 0x3d6   :  { %v3191_v8 = vadd.f32 %v3190_v46, %v3118_v39  ;;  %v3120_v57 = vadd.f32 %v3119_v25, %v10327_v54  ;;  %6580 = vmatpush1.bf16.msra.mxu0 %v8846_v12  ;;  %v10361_v19 = vpack.c.bf16 %v3306_v10, %v3298_v49  ;;  %11196 = vst [vmem:[#allocation44_spill] sm:$0xff] %v10363_v56  ;;  %v3250_v59 = vmul.f32 0.2, %v3189_v29  ;;  %v8872_v46 = vld [vmem:[#allocation14 + $0x38c] ss:$28 sps:$4 sm:$0xff]  }
 0x3d7   :  { %v3192_v44 = vpop.f32.mrf.mxu0  ;;  %6653 = vmatpush1.bf16.msra.mxu1 %v8849_v0  ;;  %6581 = vmatprep.subr.bf16.mxu0 %v8854_v51  ;;  %v3249_v54 = vmul.f32 0.2, %v3187_v30  ;;  %v8864_v51 = vld [vmem:[#allocation14 + $0x3c0] ss:$28 sps:$4 sm:$0xff]   ;;  %v8878_v49 = vld [vmem:[#allocation14 + $0x6d4] ss:$28 sps:$4 sm:$0xff]  }
 0x3d8   :  { %11195 = vst [vmem:[#allocation43_spill] sm:$0xff] %v10361_v19  ;;  %v3257_v40 = vmul.f32 0.2, %v3191_v8  ;;  %v3193_v52 = vadd.f32 %v3192_v44, %v3120_v57  ;;  %6654 = vmatprep.subr.bf16.mxu1 %v8857_v61  ;;  %6479 = vmatprep.mubr.bf16.mxu0 %v10361_v19  ;;  %v3314_v11 = vmax.f32 %v3189_v29, %v3250_v59  ;;  %v8866_v57 = vld [vmem:[#allocation14 + $0x3c4] ss:$28 sps:$4 sm:$0xff]  }
 0x3d9   :  { %6553 = vmatmul.mubr.bf16.gmra.mxu1 %v10229_v62  ;;  %6480 = vmatmul.mubr.bf16.gmra.mxu0 %v10363_v56  ;;  %v3313_v24 = vmax.f32 %v3187_v30, %v3249_v54  ;;  %v8875_v29 = vld [vmem:[#allocation14 + $0x70c] ss:$28 sps:$4 sm:$0xff]   ;;  %v8881_v10 = vld [vmem:[#allocation14 + $0xa54] ss:$28 sps:$4 sm:$0xff]   ;;  %v8887_v44 = vld [vmem:[#allocation14 + $0xa1c] ss:$28 sps:$4 sm:$0xff]  }
 0x3da   :  { %v3258_v6 = vmul.f32 0.2, %v3193_v52  ;;  %6562 = vmatprep.mubr.bf16.mxu1 %v10232_v5  ;;  %6582 = vmatpush1.bf16.msra.mxu0 %v8852_v35  ;;  %v3321_v42 = vmax.f32 %v3191_v8, %v3257_v40  ;;  %v8870_v30 = vld [vmem:[#allocation14 + $0x388] ss:$28 sps:$4 sm:$0xff]   ;;  %v8876_v25 = vld [vmem:[#allocation14 + $0x6d0] ss:$28 sps:$4 sm:$0xff]  }
 0x3db   :  { %6655 = vmatpush1.bf16.msra.mxu1 %v8855_v14  ;;  %6583 = vmatprep.subr.bf16.mxu0 %v8860_v31  ;;  %v8873_v61 = vld [vmem:[#allocation14 + $0x708] ss:$28 sps:$4 sm:$0xff]   ;;  %v8884_v8 = vld [vmem:[#allocation14 + $0x69c] ss:$28 sps:$4 sm:$0xff]  }
 0x3dc   :  { %v3322_v12 = vmax.f32 %v3193_v52, %v3258_v6  ;;  %6656 = vmatprep.subr.bf16.mxu1 %v8863_v18  ;;  %v10371_v39 = vpack.c.bf16 %v3321_v42, %v3313_v24  ;;  %v8882_v35 = vld [vmem:[#allocation14 + $0x698] ss:$28 sps:$4 sm:$0xff]   ;;  %v8890_v31 = vld [vmem:[#allocation14 + $0x664] ss:$28 sps:$4 sm:$0xff]   ;;  %v8896_v18 = vld [vmem:[#allocation14 + $0x62c] ss:$28 sps:$4 sm:$0xff]  }
 0x3dd   :  { %v8885_v14 = vld [vmem:[#allocation14 + $0xa18] ss:$28 sps:$4 sm:$0xff]   ;;  %v8893_v59 = vld [vmem:[#allocation14 + $0x9e4] ss:$28 sps:$4 sm:$0xff]   ;;  %v8899_v54 = vld [vmem:[#allocation14 + $0x9ac] ss:$28 sps:$4 sm:$0xff]  }
 0x3de   :  { %v10369_v0 = vpack.c.bf16 %v3322_v12, %v3314_v11  ;;  %6584 = vmatpush1.bf16.msra.mxu0 %v8858_v3  ;;  %11198 = vst [vmem:[#allocation46_spill] sm:$0xff] %v10371_v39  ;;  %v8888_v40 = vld [vmem:[#allocation14 + $0x660] ss:$28 sps:$4 sm:$0xff]   ;;  %v8894_v6 = vld [vmem:[#allocation14 + $0x628] ss:$28 sps:$4 sm:$0xff]  }
 0x3df   :  { %6657 = vmatpush1.bf16.msra.mxu1 %v8861_v45  ;;  %6585 = vmatprep.subr.bf16.mxu0 %v8866_v57  ;;  %v8891_v52 = vld [vmem:[#allocation14 + $0x9e0] ss:$28 sps:$4 sm:$0xff]   ;;  %v8897_v3 = vld [vmem:[#allocation14 + $0x9a8] ss:$28 sps:$4 sm:$0xff]   ;;  %v8902_v45 = vld [vmem:[#allocation14 + $0x5f4] ss:$28 sps:$4 sm:$0xff]  }
 0x3e0   :  { %11197 = vst [vmem:[#allocation45_spill] sm:$0xff] %v10369_v0  ;;  %6489 = vmatprep.mubr.bf16.mxu0 %v10369_v0  ;;  %6658 = vmatprep.subr.bf16.mxu1 %v8869_v9  ;;  %v8905_v11 = vld [vmem:[#allocation14 + $0x974] ss:$28 sps:$4 sm:$0xff]   ;;  %v8908_v57 = vld [vmem:[#allocation14 + $0x5bc] ss:$28 sps:$4 sm:$0xff]  }
 0x3e1   :  { %6563 = vmatmul.mubr.bf16.gmra.mxu1 %v10247_v20  ;;  %6490 = vmatmul.mubr.bf16.gmra.mxu0 %v10371_v39  ;;  %v8900_v42 = vld [vmem:[#allocation14 + $0x5f0] ss:$28 sps:$4 sm:$0xff]   ;;  %v8911_v9 = vld [vmem:[#allocation14 + $0x93c] ss:$28 sps:$4 sm:$0xff]  }
 0x3e2   :  { %6678 = vmatprep.mubr.bf16.mxu1 %v10287_v50  ;;  %6586 = vmatpush1.bf16.msra.mxu0 %v8864_v51  ;;  %v8903_v12 = vld [vmem:[#allocation14 + $0x970] ss:$28 sps:$4 sm:$0xff]   ;;  %v8906_v24 = vld [vmem:[#allocation14 + $0x5b8] ss:$28 sps:$4 sm:$0xff]  }
 0x3e3   :  { %6659 = vmatpush1.bf16.msra.mxu1 %v8867_v22  ;;  %6605 = vmatprep.mubr.bf16.mxu0 %v10222_v1  ;;  %v8909_v51 = vld [vmem:[#allocation14 + $0x938] ss:$28 sps:$4 sm:$0xff]   ;;  %v8914_v22 = vld [vmem:[#allocation14 + $0x584] ss:$28 sps:$4 sm:$0xff]  }
 0x3e4   :  { %6587 = vmatprep.subr.bf16.mxu0 %v8872_v46  ;;  %6660 = vmatprep.subr.bf16.mxu1 %v8875_v29  ;;  %v8917_v46 = vld [vmem:[#allocation14 + $0x904] ss:$28 sps:$4 sm:$0xff]  }
 0x3e5   :  { %v8912_v29 = vld [vmem:[#allocation14 + $0x580] ss:$28 sps:$4 sm:$0xff]  }
 0x3e6   :  { %6588 = vmatpush1.bf16.msra.mxu0 %v8870_v30  ;;  %v8915_v30 = vld [vmem:[#allocation14 + $0x900] ss:$28 sps:$4 sm:$0xff]  }
 0x3e7   :  { %6661 = vmatpush1.bf16.msra.mxu1 %v8873_v61  ;;  %6589 = vmatprep.subr.bf16.mxu0 %v8878_v49  ;;  %v8920_v61 = vld [vmem:[#allocation14 + $0x54c] ss:$28 sps:$4 sm:$0xff]  }
 0x3e8   :  { %6662 = vmatprep.subr.bf16.mxu1 %v8881_v10  ;;  %v8923_v49 = vld [vmem:[#allocation14 + $0x8cc] ss:$28 sps:$4 sm:$0xff]  }
 0x3e9   :  { %v8918_v10 = vld [vmem:[#allocation14 + $0x548] ss:$28 sps:$4 sm:$0xff]  }
 0x3ea   :  { %6590 = vmatpush2.bf16.msra.mxu0 %v8876_v25  ;;  %v8921_v25 = vld [vmem:[#allocation14 + $0x8c8] ss:$28 sps:$4 sm:$0xff]  }
 0x3eb   :  { %6663 = vmatpush2.bf16.msra.mxu1 %v8879_v37  ;;  %6591 = vmatprep.subr.bf16.mxu0 %v8884_v8  ;;  %v8926_v37 = vld [vmem:[#allocation14 + $0xc14] ss:$28 sps:$4 sm:$0xff]   ;;  %v8929_v8 = vld [vmem:[#allocation14 + $0x19c] ss:$28 sps:$4 sm:$0xff]  }
 0x3ec   :  { %6664 = vmatprep.subr.bf16.mxu1 %v8887_v44  ;;  %v8924_v44 = vld [vmem:[#allocation14 + $0xc10] ss:$28 sps:$4 sm:$0xff]  }
 0x3ee   :  { %6592 = vmatpush2.bf16.msra.mxu0 %v8882_v35  ;;  %v8927_v35 = vld [vmem:[#allocation14 + $0x198] ss:$28 sps:$4 sm:$0xff]  }
 0x3ef   :  { %6665 = vmatpush2.bf16.msra.mxu1 %v8885_v14  ;;  %6593 = vmatprep.subr.bf16.mxu0 %v8890_v31  ;;  %v8932_v14 = vld [vmem:[#allocation14 + $0xbdc] ss:$28 sps:$4 sm:$0xff]   ;;  %v8935_v31 = vld [vmem:[#allocation14 + $0x164] ss:$28 sps:$4 sm:$0xff]  }
 0x3f0   :  { %6666 = vmatprep.subr.bf16.mxu1 %v8893_v59  ;;  %v8930_v59 = vld [vmem:[#allocation14 + $0xbd8] ss:$28 sps:$4 sm:$0xff]  }
 0x3f2   :  { %6594 = vmatpush2.bf16.msra.mxu0 %v8888_v40  ;;  %v8933_v40 = vld [vmem:[#allocation14 + $0x160] ss:$28 sps:$4 sm:$0xff]  }
 0x3f3   :  { %6667 = vmatpush2.bf16.msra.mxu1 %v8891_v52  ;;  %6595 = vmatprep.subr.bf16.mxu0 %v8896_v18  ;;  %v8938_v52 = vld [vmem:[#allocation14 + $0xba4] ss:$28 sps:$4 sm:$0xff]   ;;  %v8941_v18 = vld [vmem:[#allocation14 + $0x12c] ss:$28 sps:$4 sm:$0xff]  }
 0x3f4   :  { %6668 = vmatprep.subr.bf16.mxu1 %v8899_v54  ;;  %v8936_v54 = vld [vmem:[#allocation14 + $0xba0] ss:$28 sps:$4 sm:$0xff]  }
 0x3f6   :  { %6596 = vmatpush2.bf16.msra.mxu0 %v8894_v6  ;;  %v8939_v6 = vld [vmem:[#allocation14 + $0x128] ss:$28 sps:$4 sm:$0xff]  }
 0x3f7   :  { %6669 = vmatpush2.bf16.msra.mxu1 %v8897_v3  ;;  %6597 = vmatprep.subr.bf16.mxu0 %v8902_v45  ;;  %v8944_v3 = vld [vmem:[#allocation14 + $0xb6c] ss:$28 sps:$4 sm:$0xff]   ;;  %v8947_v45 = vld [vmem:[#allocation14 + $0xf4] ss:$28 sps:$4 sm:$0xff]  }
 0x3f8   :  { %6670 = vmatprep.subr.bf16.mxu1 %v8905_v11  ;;  %v8942_v11 = vld [vmem:[#allocation14 + $0xb68] ss:$28 sps:$4 sm:$0xff]  }
 0x3fa   :  { %6598 = vmatpush2.bf16.msra.mxu0 %v8900_v42  ;;  %v8945_v42 = vld [vmem:[#allocation14 + $0xf0] ss:$28 sps:$4 sm:$0xff]  }
 0x3fb   :  { %6671 = vmatpush2.bf16.msra.mxu1 %v8903_v12  ;;  %6599 = vmatprep.subr.bf16.mxu0 %v8908_v57  ;;  %v8950_v12 = vld [vmem:[#allocation14 + $0xb34] ss:$28 sps:$4 sm:$0xff]   ;;  %v8953_v57 = vld [vmem:[#allocation14 + $0xbc] ss:$28 sps:$4 sm:$0xff]  }
 0x3fc   :  { %6672 = vmatprep.subr.bf16.mxu1 %v8911_v9  ;;  %v10386_v9 = vpop.f32.mrf.mxu1 }
 0x3fe   :  { %6600 = vmatpush2.bf16.msra.mxu0 %v8906_v24  ;;  %v8948_v24 = vld [vmem:[#allocation14 + $0xb30] ss:$28 sps:$4 sm:$0xff]  }
 0x3ff   :  { %6673 = vmatpush2.bf16.msra.mxu1 %v8909_v51  ;;  %6601 = vmatprep.subr.bf16.mxu0 %v8914_v22  ;;  %v8951_v51 = vld [vmem:[#allocation14 + $0xb8] ss:$28 sps:$4 sm:$0xff]  }
 0x400   :  { %6674 = vmatprep.subr.bf16.mxu1 %v8917_v46  ;;  %v8956_v22 = vld [vmem:[#allocation14 + $0xafc] ss:$28 sps:$4 sm:$0xff]   ;;  %v8959_v46 = vld [vmem:[#allocation14 + $0x84] ss:$28 sps:$4 sm:$0xff]  }
 0x402   :  { %6602 = vmatpush2.bf16.msra.mxu0 %v8912_v29  ;;  %v10388_v29 = vpop.f32.mrf.mxu1 }
 0x403   :  { %6675 = vmatpush2.bf16.msra.mxu1 %v8915_v30  ;;  %6603 = vmatprep.subr.bf16.mxu0 %v8920_v61  ;;  %v8954_v30 = vld [vmem:[#allocation14 + $0xaf8] ss:$28 sps:$4 sm:$0xff]   ;;  %v8957_v61 = vld [vmem:[#allocation14 + $0x80] ss:$28 sps:$4 sm:$0xff]  }
 0x404   :  { %6676 = vmatprep.subr.bf16.mxu1 %v8923_v49  ;;  %v8962_v49 = vld [vmem:[#allocation14 + $0xac4] ss:$28 sps:$4 sm:$0xff]  }
 0x406   :  { %6604 = vmatpush2.bf16.msra.mxu0 %v8918_v10  ;;  %v8965_v10 = vld [vmem:[#allocation14 + $0x4c] ss:$28 sps:$4 sm:$0xff]  }
 0x407   :  { %6677 = vmatpush2.bf16.msra.mxu1 %v8921_v25  ;;  %6719 = vmatprep.subr.bf16.mxu0 %v8926_v37  ;;  %v10394_v25 = vpop.f32.mrf.mxu1  ;;  %v8960_v37 = vld [vmem:[#allocation14 + $0xac0] ss:$28 sps:$4 sm:$0xff]  }
 0x408   :  { %6792 = vmatprep.subr.bf16.mxu1 %v8929_v8  ;;  %v8963_v8 = vld [vmem:[#allocation14 + $0x48] ss:$28 sps:$4 sm:$0xff]  }
 0x409   :  { %6606 = vmatmul.mubr.bf16.vlgmr.msra.gmra.mxu0 %v10227_v4 }
 0x40a   :  { %6679 = vmatmul.mubr.bf16.vlgmr.msra.gmra.mxu1 %v10290_v16  ;;  %6615 = vmatprep.mubr.bf16.mxu0 %v10242_v63 }
 0x40b   :  { %6688 = vmatprep.mubr.bf16.mxu1 %v10297_v53  ;;  %6720 = vmatpush1.bf16.msra.mxu0 %v8924_v44  ;;  %v8968_v44 = vld [vmem:[#allocation14 + $0xa8c] ss:$28 sps:$4 sm:$0xff]  }
 0x40c   :  { %6793 = vmatpush1.bf16.msra.mxu1 %v8927_v35  ;;  %6721 = vmatprep.subr.bf16.mxu0 %v8932_v14  ;;  %v8971_v35 = vld [vmem:[#allocation14 + $0x14] ss:$28 sps:$4 sm:$0xff]   ;;  %v10396_v14 = vpop.f32.mrf.mxu1 }
 0x40d   :  { %6794 = vmatprep.subr.bf16.mxu1 %v8935_v31  ;;  %v8966_v31 = vld [vmem:[#allocation14 + $0xa88] ss:$28 sps:$4 sm:$0xff]  }
 0x40f   :  { %6722 = vmatpush1.bf16.msra.mxu0 %v8930_v59  ;;  %v8969_v59 = vld [vmem:[#allocation14 + $0x10] ss:$28 sps:$4 sm:$0xff]  }
 0x410   :  { %6795 = vmatpush1.bf16.msra.mxu1 %v8933_v40  ;;  %6723 = vmatprep.subr.bf16.mxu0 %v8938_v52  ;;  %v8974_v40 = vld [vmem:[#allocation14 + $0xdd4] ss:$28 sps:$4 sm:$0xff]   ;;  %v8977_v52 = vld [vmem:[#allocation14 + $0x35c] ss:$28 sps:$4 sm:$0xff]  }
 0x411   :  { %6796 = vmatprep.subr.bf16.mxu1 %v8941_v18  ;;  %6616 = vmatmul.mubr.bf16.gmra.mxu0 %v10244_v58  ;;  %v10402_v18 = vpop.f32.mrf.mxu1 }
 0x412   :  { %6689 = vmatmul.mubr.bf16.gmra.mxu1 %v10299_v38  ;;  %6625 = vmatprep.mubr.bf16.mxu0 %v10256_v23 }
 0x413   :  { %6698 = vmatprep.mubr.bf16.mxu1 %v10308_v47  ;;  %6724 = vmatpush1.bf16.msra.mxu0 %v8936_v54  ;;  %v8972_v54 = vld [vmem:[#allocation14 + $0xdd0] ss:$28 sps:$4 sm:$0xff]  }
 0x414   :  { %6797 = vmatpush1.bf16.msra.mxu1 %v8939_v6  ;;  %6725 = vmatprep.subr.bf16.mxu0 %v8944_v3  ;;  %v8975_v6 = vld [vmem:[#allocation14 + $0x358] ss:$28 sps:$4 sm:$0xff]  }
 0x415   :  { %6798 = vmatprep.subr.bf16.mxu1 %v8947_v45  ;;  %v8980_v3 = vld [vmem:[#allocation14 + $0xd9c] ss:$28 sps:$4 sm:$0xff]   ;;  %v8983_v45 = vld [vmem:[#allocation14 + $0x324] ss:$28 sps:$4 sm:$0xff]  }
 0x417   :  { %6726 = vmatpush1.bf16.msra.mxu0 %v8942_v11  ;;  %v10404_v11 = vpop.f32.mrf.mxu1 }
 0x418   :  { %6799 = vmatpush1.bf16.msra.mxu1 %v8945_v42  ;;  %6727 = vmatprep.subr.bf16.mxu0 %v8950_v12  ;;  %v8978_v42 = vld [vmem:[#allocation14 + $0xd98] ss:$28 sps:$4 sm:$0xff]   ;;  %v8981_v12 = vld [vmem:[#allocation14 + $0x320] ss:$28 sps:$4 sm:$0xff]  }
 0x419   :  { %6800 = vmatprep.subr.bf16.mxu1 %v8953_v57  ;;  %6626 = vmatmul.mubr.bf16.gmra.mxu0 %v10258_v2  ;;  %v8986_v57 = vld [vmem:[#allocation14 + $0xd64] ss:$28 sps:$4 sm:$0xff]  }
 0x41a   :  { %6699 = vmatmul.mubr.bf16.gmra.mxu1 %v10310_v21  ;;  %6635 = vmatprep.mubr.bf16.mxu0 %v10262_v27 }
 0x41b   :  { %6708 = vmatprep.mubr.bf16.mxu1 %v10314_v26  ;;  %6728 = vmatpush1.bf16.msra.mxu0 %v8948_v24  ;;  %v8989_v24 = vld [vmem:[#allocation14 + $0x2ec] ss:$28 sps:$4 sm:$0xff]  }
 0x41c   :  { %6801 = vmatpush1.bf16.msra.mxu1 %v8951_v51  ;;  %6729 = vmatprep.subr.bf16.mxu0 %v8956_v22  ;;  %v10406_v51 = vpop.f32.mrf.mxu1  ;;  %v8984_v22 = vld [vmem:[#allocation14 + $0xd60] ss:$28 sps:$4 sm:$0xff]  }
 0x41d   :  { %6802 = vmatprep.subr.bf16.mxu1 %v8959_v46  ;;  %v8987_v46 = vld [vmem:[#allocation14 + $0x2e8] ss:$28 sps:$4 sm:$0xff]  }
 0x41f   :  { %6730 = vmatpush1.bf16.msra.mxu0 %v8954_v30  ;;  %v8992_v30 = vld [vmem:[#allocation14 + $0xd2c] ss:$28 sps:$4 sm:$0xff]  }
 0x420   :  { %6803 = vmatpush1.bf16.msra.mxu1 %v8957_v61  ;;  %6731 = vmatprep.subr.bf16.mxu0 %v8962_v49  ;;  %v8995_v61 = vld [vmem:[#allocation14 + $0x2b4] ss:$28 sps:$4 sm:$0xff]   ;;  %v10408_v49 = vpop.f32.mrf.mxu1 }
 0x421   :  { %6804 = vmatprep.subr.bf16.mxu1 %v8965_v10  ;;  %6636 = vmatmul.mubr.bf16.gmra.mxu0 %v10264_v41  ;;  %v8990_v10 = vld [vmem:[#allocation14 + $0xd28] ss:$28 sps:$4 sm:$0xff]  }
 0x422   :  { %6709 = vmatmul.mubr.bf16.gmra.mxu1 %v10316_v48  ;;  %6751 = vmatprep.mubr.bf16.mxu0 %v10336_v28  ;;  %v9097_v28 = vld [vmem:[#allocation14 + $0x97c] ss:$28 sps:$4 sm:$0xff]   ;;  %v9100_v48 = vld [vmem:[#allocation14 + $0x5c4] ss:$28 sps:$4 sm:$0xff]  }
 0x423   :  { %6824 = vmatprep.mubr.bf16.mxu1 %v10089_v15  ;;  %6732 = vmatpush1.bf16.msra.mxu0 %v8960_v37  ;;  %v8993_v37 = vld [vmem:[#allocation14 + $0x2b0] ss:$28 sps:$4 sm:$0xff]   ;;  %v9094_v15 = vld [vmem:[#allocation14 + $0x5fc] ss:$28 sps:$4 sm:$0xff]   ;;  %v9103_v41 = vld [vmem:[#allocation14 + $0x944] ss:$28 sps:$4 sm:$0xff]  }
 0x424   :  { %6805 = vmatpush1.bf16.msra.mxu1 %v8963_v8  ;;  %6733 = vmatprep.subr.bf16.mxu0 %v8968_v44  ;;  %v8998_v8 = vld [vmem:[#allocation14 + $0xcf4] ss:$28 sps:$4 sm:$0xff]   ;;  %v9001_v44 = vld [vmem:[#allocation14 + $0x27c] ss:$28 sps:$4 sm:$0xff]  }
 0x425   :  { %6806 = vmatprep.subr.bf16.mxu1 %v8971_v35  ;;  %v10410_v35 = vpop.f32.mrf.mxu1 }
 0x427   :  { %6734 = vmatpush1.bf16.msra.mxu0 %v8966_v31  ;;  %v8996_v31 = vld [vmem:[#allocation14 + $0xcf0] ss:$28 sps:$4 sm:$0xff]  }
 0x428   :  { %6807 = vmatpush1.bf16.msra.mxu1 %v8969_v59  ;;  %6735 = vmatprep.subr.bf16.mxu0 %v8974_v40  ;;  %v8999_v59 = vld [vmem:[#allocation14 + $0x278] ss:$28 sps:$4 sm:$0xff]  }
 0x429   :  { %6808 = vmatprep.subr.bf16.mxu1 %v8977_v52  ;;  %v9004_v40 = vld [vmem:[#allocation14 + $0xcbc] ss:$28 sps:$4 sm:$0xff]   ;;  %v9007_v52 = vld [vmem:[#allocation14 + $0x244] ss:$28 sps:$4 sm:$0xff]  }
 0x42b   :  { %6736 = vmatpush2.bf16.msra.mxu0 %v8972_v54  ;;  %v10412_v54 = vpop.f32.mrf.mxu1 }
 0x42c   :  { %6809 = vmatpush2.bf16.msra.mxu1 %v8975_v6  ;;  %6737 = vmatprep.subr.bf16.mxu0 %v8980_v3  ;;  %v9002_v6 = vld [vmem:[#allocation14 + $0xcb8] ss:$28 sps:$4 sm:$0xff]   ;;  %v9005_v3 = vld [vmem:[#allocation14 + $0x240] ss:$28 sps:$4 sm:$0xff]  }
 0x42d   :  { %6810 = vmatprep.subr.bf16.mxu1 %v8983_v45  ;;  %v9010_v45 = vld [vmem:[#allocation14 + $0xc84] ss:$28 sps:$4 sm:$0xff]  }
 0x42f   :  { %6738 = vmatpush2.bf16.msra.mxu0 %v8978_v42  ;;  %v9013_v42 = vld [vmem:[#allocation14 + $0x20c] ss:$28 sps:$4 sm:$0xff]  }
 0x430   :  { %6811 = vmatpush2.bf16.msra.mxu1 %v8981_v12  ;;  %6739 = vmatprep.subr.bf16.mxu0 %v8986_v57  ;;  %v10414_v12 = vpop.f32.mrf.mxu1  ;;  %v9008_v57 = vld [vmem:[#allocation14 + $0xc80] ss:$28 sps:$4 sm:$0xff]  }
 0x431   :  { %6812 = vmatprep.subr.bf16.mxu1 %v8989_v24  ;;  %v9011_v24 = vld [vmem:[#allocation14 + $0x208] ss:$28 sps:$4 sm:$0xff]  }
 0x433   :  { %6740 = vmatpush2.bf16.msra.mxu0 %v8984_v22  ;;  %v9016_v22 = vld [vmem:[#allocation14 + $0xc4c] ss:$28 sps:$4 sm:$0xff]  }
 0x434   :  { %6813 = vmatpush2.bf16.msra.mxu1 %v8987_v46  ;;  %6741 = vmatprep.subr.bf16.mxu0 %v8992_v30  ;;  %v9019_v46 = vld [vmem:[#allocation14 + $0x1d4] ss:$28 sps:$4 sm:$0xff]   ;;  %v10416_v30 = vpop.f32.mrf.mxu1 }
 0x435   :  { %6814 = vmatprep.subr.bf16.mxu1 %v8995_v61  ;;  %v9014_v61 = vld [vmem:[#allocation14 + $0xc48] ss:$28 sps:$4 sm:$0xff]  }
 0x437   :  { %6742 = vmatpush2.bf16.msra.mxu0 %v8990_v10  ;;  %v9017_v10 = vld [vmem:[#allocation14 + $0x1d0] ss:$28 sps:$4 sm:$0xff]  }
 0x438   :  { %6815 = vmatpush2.bf16.msra.mxu1 %v8993_v37  ;;  %6743 = vmatprep.subr.bf16.mxu0 %v8998_v8  ;;  %v9022_v37 = vld [vmem:[#allocation14 + $0x51c] ss:$28 sps:$4 sm:$0xff]  }
 0x439   :  { %6816 = vmatprep.subr.bf16.mxu1 %v9001_v44  ;;  %v9025_v8 = vld [vmem:[#allocation14 + $0x89c] ss:$28 sps:$4 sm:$0xff]   ;;  %v10418_v44 = vpop.f32.mrf.mxu1 }
 0x43b   :  { %6744 = vmatpush2.bf16.msra.mxu0 %v8996_v31  ;;  %v9020_v31 = vld [vmem:[#allocation14 + $0x518] ss:$28 sps:$4 sm:$0xff]  }
 0x43c   :  { %6817 = vmatpush2.bf16.msra.mxu1 %v8999_v59  ;;  %6745 = vmatprep.subr.bf16.mxu0 %v9004_v40  ;;  %v9023_v59 = vld [vmem:[#allocation14 + $0x898] ss:$28 sps:$4 sm:$0xff]   ;;  %v10420_v40 = vpop.f32.mrf.mxu1 }
 0x43d   :  { %6818 = vmatprep.subr.bf16.mxu1 %v9007_v52  ;;  %11199 = vst [vmem:[#allocation47_spill] sm:$0xff] %v10420_v40  ;;  %v9028_v52 = vld [vmem:[#allocation14 + $0x4e4] ss:$28 sps:$4 sm:$0xff]  }
 0x43e   :  { %v9107_v40 = vld [vmem:[#allocation14 + $0x908] ss:$28 sps:$4 sm:$0xff]  }
 0x43f   :  { %6746 = vmatpush2.bf16.msra.mxu0 %v9002_v6  ;;  %v9031_v6 = vld [vmem:[#allocation14 + $0x864] ss:$28 sps:$4 sm:$0xff]  }
 0x440   :  { %6819 = vmatpush2.bf16.msra.mxu1 %v9005_v3  ;;  %6747 = vmatprep.subr.bf16.mxu0 %v9010_v45  ;;  %v10422_v3 = vpop.f32.mrf.mxu0  ;;  %v9026_v45 = vld [vmem:[#allocation14 + $0x4e0] ss:$28 sps:$4 sm:$0xff]  }
 0x441   :  { %6820 = vmatprep.subr.bf16.mxu1 %v9013_v42  ;;  %v9029_v42 = vld [vmem:[#allocation14 + $0x860] ss:$28 sps:$4 sm:$0xff]  }
 0x443   :  { %6748 = vmatpush2.bf16.msra.mxu0 %v9008_v57  ;;  %v10428_v57 = vpop.f32.mrf.mxu1 }
 0x444   :  { %6821 = vmatpush2.bf16.msra.mxu1 %v9011_v24  ;;  %6749 = vmatprep.subr.bf16.mxu0 %v9016_v22  ;;  %11200 = vst [vmem:[#allocation48_spill] sm:$0xff] %v10428_v57  ;;  %v9034_v24 = vld [vmem:[#allocation14 + $0x4ac] ss:$28 sps:$4 sm:$0xff]  }
 0x445   :  { %6822 = vmatprep.subr.bf16.mxu1 %v9019_v46  ;;  %v9037_v22 = vld [vmem:[#allocation14 + $0x82c] ss:$28 sps:$4 sm:$0xff]   ;;  %v10430_v46 = vpop.f32.mrf.mxu0 }
 0x447   :  { %6750 = vmatpush2.bf16.msra.mxu0 %v9014_v61  ;;  %v9032_v61 = vld [vmem:[#allocation14 + $0x4a8] ss:$28 sps:$4 sm:$0xff]  }
 0x448   :  { %6823 = vmatpush2.bf16.msra.mxu1 %v9017_v10  ;;  %6865 = vmatprep.subr.bf16.mxu0 %v9022_v37  ;;  %v9035_v10 = vld [vmem:[#allocation14 + $0x828] ss:$28 sps:$4 sm:$0xff]   ;;  %v10432_v37 = vpop.f32.mrf.mxu1 }
 0x449   :  { %6938 = vmatprep.subr.bf16.mxu1 %v9025_v8  ;;  %11201 = vst [vmem:[#allocation49_spill] sm:$0xff] %v10432_v37  ;;  %v9040_v8 = vld [vmem:[#allocation14 + $0x474] ss:$28 sps:$4 sm:$0xff]   ;;  %v9101_v37 = vld [vmem:[#allocation14 + $0x940] ss:$28 sps:$4 sm:$0xff]  }
 0x44a   :  { %6752 = vmatmul.mubr.bf16.vlgmr.msra.gmra.mxu0 %v10339_v34  ;;  %v9055_v34 = vld [vmem:[#allocation14 + $0x784] ss:$28 sps:$4 sm:$0xff]  }
 0x44b   :  { %6825 = vmatmul.mubr.bf16.vlgmr.msra.gmra.mxu1 %v10166_v13  ;;  %6761 = vmatprep.mubr.bf16.mxu0 %v10348_v43  ;;  %v9047_v43 = vld [vmem:[#allocation14 + $0x7b8] ss:$28 sps:$4 sm:$0xff]  }
 0x44c   :  { %6834 = vmatprep.mubr.bf16.mxu1 %v10168_v7  ;;  %6866 = vmatpush1.bf16.msra.mxu0 %v9020_v31  ;;  %v9043_v31 = vld [vmem:[#allocation14 + $0x7f4] ss:$28 sps:$4 sm:$0xff]  }
 0x44d   :  { %6939 = vmatpush1.bf16.msra.mxu1 %v9023_v59  ;;  %6867 = vmatprep.subr.bf16.mxu0 %v9028_v52  ;;  %v10434_v59 = vpop.f32.mrf.mxu0  ;;  %v10438_v52 = vpop.f32.mrf.mxu1  ;;  %v9088_v7 = vld [vmem:[#allocation14 + $0x634] ss:$28 sps:$4 sm:$0xff]  }
 0x44e   :  { %6940 = vmatprep.subr.bf16.mxu1 %v9031_v6  ;;  %v9038_v6 = vld [vmem:[#allocation14 + $0x470] ss:$28 sps:$4 sm:$0xff]  }
 0x44f   :  { %v10444_v55 = vpop.f32.mrf.mxu1  ;;  %v9091_v13 = vld [vmem:[#allocation14 + $0x9b4] ss:$28 sps:$4 sm:$0xff]  }
 0x450   :  { %6868 = vmatpush1.bf16.msra.mxu0 %v9026_v45  ;;  %v9041_v45 = vld [vmem:[#allocation14 + $0x7f0] ss:$28 sps:$4 sm:$0xff]  }
 0x451   :  { %6941 = vmatpush1.bf16.msra.mxu1 %v9029_v42  ;;  %6869 = vmatprep.subr.bf16.mxu0 %v9034_v24  ;;  %v9046_v42 = vld [vmem:[#allocation14 + $0x43c] ss:$28 sps:$4 sm:$0xff]  }
 0x452   :  { %6942 = vmatprep.subr.bf16.mxu1 %v9037_v22  ;;  %6762 = vmatmul.mubr.bf16.gmra.mxu0 %v10350_v17  ;;  %v9049_v24 = vld [vmem:[#allocation14 + $0x7bc] ss:$28 sps:$4 sm:$0xff]   ;;  %v10442_v22 = vpop.f32.mrf.mxu0 }
 0x453   :  { %6835 = vmatmul.mubr.bf16.gmra.mxu1 %v10197_v36  ;;  %6771 = vmatprep.mubr.bf16.mxu0 %v10361_v19  ;;  %v9044_v17 = vld [vmem:[#allocation14 + $0x438] ss:$28 sps:$4 sm:$0xff]   ;;  %v9052_v19 = vld [vmem:[#allocation14 + $0x404] ss:$28 sps:$4 sm:$0xff]   ;;  %v9085_v36 = vld [vmem:[#allocation14 + $0x9ec] ss:$28 sps:$4 sm:$0xff]  }
 0x454   :  { %6844 = vmatprep.mubr.bf16.mxu1 %v10204_v60  ;;  %6870 = vmatpush1.bf16.msra.mxu0 %v9032_v61  ;;  %v10446_v61 = vpop.f32.mrf.mxu0  ;;  %v9082_v60 = vld [vmem:[#allocation14 + $0x66c] ss:$28 sps:$4 sm:$0xff]  }
 0x455   :  { %6943 = vmatpush1.bf16.msra.mxu1 %v9035_v10  ;;  %6871 = vmatprep.subr.bf16.mxu0 %v9040_v8  ;;  %v10450_v10 = vpop.f32.mrf.mxu1  ;;  %v9050_v8 = vld [vmem:[#allocation14 + $0x400] ss:$28 sps:$4 sm:$0xff]  }
 0x456   :  { %6944 = vmatprep.subr.bf16.mxu1 %v9043_v31  ;;  %v9053_v31 = vld [vmem:[#allocation14 + $0x780] ss:$28 sps:$4 sm:$0xff]  }
 0x458   :  { %6872 = vmatpush1.bf16.msra.mxu0 %v9038_v6  ;;  %v9058_v6 = vld [vmem:[#allocation14 + $0x3cc] ss:$28 sps:$4 sm:$0xff]  }
 0x459   :  { %6945 = vmatpush1.bf16.msra.mxu1 %v9041_v45  ;;  %6873 = vmatprep.subr.bf16.mxu0 %v9046_v42  ;;  %v9061_v45 = vld [vmem:[#allocation14 + $0x74c] ss:$28 sps:$4 sm:$0xff]   ;;  %v10454_v42 = vpop.f32.mrf.mxu0 }
 0x45a   :  { %6946 = vmatprep.subr.bf16.mxu1 %v9049_v24  ;;  %6772 = vmatmul.mubr.bf16.gmra.mxu0 %v10363_v56  ;;  %v10456_v24 = vpop.f32.mrf.mxu1  ;;  %v9056_v56 = vld [vmem:[#allocation14 + $0x3c8] ss:$28 sps:$4 sm:$0xff]  }
 0x45b   :  { %6845 = vmatmul.mubr.bf16.gmra.mxu1 %v10229_v62  ;;  %6781 = vmatprep.mubr.bf16.mxu0 %v10369_v0  ;;  %v9059_v62 = vld [vmem:[#allocation14 + $0x748] ss:$28 sps:$4 sm:$0xff]   ;;  %v9064_v0 = vld [vmem:[#allocation14 + $0x394] ss:$28 sps:$4 sm:$0xff]  }
 0x45c   :  { %6854 = vmatprep.mubr.bf16.mxu1 %v10232_v5  ;;  %6874 = vmatpush1.bf16.msra.mxu0 %v9044_v17  ;;  %v9067_v5 = vld [vmem:[#allocation14 + $0x714] ss:$28 sps:$4 sm:$0xff]   ;;  %v10458_v17 = vpop.f32.mrf.mxu0 }
 0x45d   :  { %6947 = vmatpush1.bf16.msra.mxu1 %v9047_v43  ;;  %6875 = vmatprep.subr.bf16.mxu0 %v9052_v19  ;;  %v10462_v43 = vpop.f32.mrf.mxu1  ;;  %v9065_v19 = vld [vmem:[#allocation14 + $0x710] ss:$28 sps:$4 sm:$0xff]  }
 0x45e   :  { %6948 = vmatprep.subr.bf16.mxu1 %v9055_v34  ;;  %v9062_v34 = vld [vmem:[#allocation14 + $0x390] ss:$28 sps:$4 sm:$0xff]  }
 0x460   :  { %6876 = vmatpush1.bf16.msra.mxu0 %v9050_v8  ;;  %v9070_v8 = vld [vmem:[#allocation14 + $0x6dc] ss:$28 sps:$4 sm:$0xff]  }
 0x461   :  { %6949 = vmatpush1.bf16.msra.mxu1 %v9053_v31  ;;  %6877 = vmatprep.subr.bf16.mxu0 %v9058_v6  ;;  %v9073_v31 = vld [vmem:[#allocation14 + $0xa5c] ss:$28 sps:$4 sm:$0xff]   ;;  %v10466_v6 = vpop.f32.mrf.mxu0 }
 0x462   :  { %6950 = vmatprep.subr.bf16.mxu1 %v9061_v45  ;;  %6782 = vmatmul.mubr.bf16.gmra.mxu0 %v10371_v39  ;;  %v10468_v45 = vpop.f32.mrf.mxu1  ;;  %v9068_v39 = vld [vmem:[#allocation14 + $0x6d8] ss:$28 sps:$4 sm:$0xff]  }
 0x463   :  { %6855 = vmatmul.mubr.bf16.gmra.mxu1 %v10247_v20  ;;  %6897 = vmatprep.mubr.bf16.mxu0 %v10222_v1  ;;  %v9071_v20 = vld [vmem:[#allocation14 + $0xa58] ss:$28 sps:$4 sm:$0xff]   ;;  %v9076_v1 = vld [vmem:[#allocation14 + $0x6a4] ss:$28 sps:$4 sm:$0xff]  }
 0x464   :  { %6970 = vmatprep.mubr.bf16.mxu1 %v10287_v50  ;;  %6878 = vmatpush1.bf16.msra.mxu0 %v9056_v56  ;;  %v9079_v50 = vld [vmem:[#allocation14 + $0xa24] ss:$28 sps:$4 sm:$0xff]   ;;  %v10470_v56 = vpop.f32.mrf.mxu0 }
 0x465   :  { %6951 = vmatpush1.bf16.msra.mxu1 %v9059_v62  ;;  %6879 = vmatprep.subr.bf16.mxu0 %v9064_v0  ;;  %v10472_v62 = vpop.f32.mrf.mxu1  ;;  %v9077_v0 = vld [vmem:[#allocation14 + $0xa20] ss:$28 sps:$4 sm:$0xff]  }
 0x466   :  { %6952 = vmatprep.subr.bf16.mxu1 %v9067_v5  ;;  %v9074_v5 = vld [vmem:[#allocation14 + $0x6a0] ss:$28 sps:$4 sm:$0xff]  }
 0x468   :  { %6880 = vmatpush1.bf16.msra.mxu0 %v9062_v34  ;;  %v10474_v34 = vpop.f32.mrf.mxu0 }
 0x469   :  { %6953 = vmatpush1.bf16.msra.mxu1 %v9065_v19  ;;  %6881 = vmatprep.subr.bf16.mxu0 %v9070_v8  ;;  %v10476_v19 = vpop.f32.mrf.mxu1  ;;  %v9080_v8 = vld [vmem:[#allocation14 + $0x668] ss:$28 sps:$4 sm:$0xff]  }
 0x46a   :  { %6954 = vmatprep.subr.bf16.mxu1 %v9073_v31  ;;  %v9083_v31 = vld [vmem:[#allocation14 + $0x9e8] ss:$28 sps:$4 sm:$0xff]  }
 0x46c   :  { %6882 = vmatpush2.bf16.msra.mxu0 %v9068_v39  ;;  %v10478_v39 = vpop.f32.mrf.mxu0 }
 0x46d   :  { %6955 = vmatpush2.bf16.msra.mxu1 %v9071_v20  ;;  %6883 = vmatprep.subr.bf16.mxu0 %v9076_v1  ;;  %v10480_v20 = vpop.f32.mrf.mxu1  ;;  %v9086_v1 = vld [vmem:[#allocation14 + $0x630] ss:$28 sps:$4 sm:$0xff]  }
 0x46e   :  { %6956 = vmatprep.subr.bf16.mxu1 %v9079_v50  ;;  %v9089_v50 = vld [vmem:[#allocation14 + $0x9b0] ss:$28 sps:$4 sm:$0xff]  }
 0x470   :  { %6884 = vmatpush2.bf16.msra.mxu0 %v9074_v5  ;;  %v10482_v5 = vpop.f32.mrf.mxu0 }
 0x471   :  { %6957 = vmatpush2.bf16.msra.mxu1 %v9077_v0  ;;  %6885 = vmatprep.subr.bf16.mxu0 %v9082_v60  ;;  %v10484_v0 = vpop.f32.mrf.mxu1  ;;  %v9095_v60 = vld [vmem:[#allocation14 + $0x978] ss:$28 sps:$4 sm:$0xff]  }
 0x472   :  { %6958 = vmatprep.subr.bf16.mxu1 %v9085_v36  ;;  %v9092_v36 = vld [vmem:[#allocation14 + $0x5f8] ss:$28 sps:$4 sm:$0xff]  }
 0x474   :  { %6886 = vmatpush2.bf16.msra.mxu0 %v9080_v8  ;;  %v10486_v8 = vpop.f32.mrf.mxu0 }
 0x475   :  { %6959 = vmatpush2.bf16.msra.mxu1 %v9083_v31  ;;  %6887 = vmatprep.subr.bf16.mxu0 %v9088_v7  ;;  %11202 = vst [vmem:[#allocation50_spill] sm:$0xff] %v10486_v8  ;;  %v10488_v31 = vpop.f32.mrf.mxu1  ;;  %v10490_v7 = vld [vmem:[#allocation16] sm:$0xff] }
 0x476   :  { %6960 = vmatprep.subr.bf16.mxu1 %v9091_v13  ;;  %11203 = vst [vmem:[#allocation51_spill] sm:$0xff] %v10490_v7  ;;  %v9098_v13 = vld [vmem:[#allocation14 + $0x5c0] ss:$28 sps:$4 sm:$0xff]   ;;  %v10492_v57 = vpop.f32.mrf.mxu0  ;;  %v9104_v8 = vld [vmem:[#allocation14 + $0x588] ss:$28 sps:$4 sm:$0xff]  }
 0x477   :  { %11204 = vst [vmem:[#allocation52_spill] sm:$0xff] %v10492_v57 }
 0x478   :  { %6888 = vmatpush2.bf16.msra.mxu0 %v9086_v1  ;;  %v9106_v1 = vld [vmem:[#allocation14 + $0x58c] ss:$28 sps:$4 sm:$0xff]  }
 0x479   :  { %6961 = vmatpush2.bf16.msra.mxu1 %v9089_v50  ;;  %6889 = vmatprep.subr.bf16.mxu0 %v9094_v15  ;;  %v9109_v50 = vld [vmem:[#allocation14 + $0x90c] ss:$28 sps:$4 sm:$0xff]   ;;  %v10496_v15 = vrot.slane %v10490_v7, %v9677_v32 }
 0x47a   :  { %6962 = vmatprep.subr.bf16.mxu1 %v9097_v28  ;;  %v10498_v28 = vpop.f32.mrf.mxu1 }
 0x47b   :  { %11205 = vst [vmem:[#allocation53_spill] sm:$0xff] %v10498_v28  ;;  %v6243_v32 = vadd.f32 %v10386_v9, %v10496_v15  ;;  %v6247_v9 = vadd.f32 %v10394_v25, %v10496_v15 }
 0x47c   :  { %6890 = vmatpush2.bf16.msra.mxu0 %v9092_v36  ;;  %v10502_v36 = vrot.slane %v10490_v7, %v9680_v33  ;;  %v10508_v57 = vpop.f32.mrf.mxu1 }
 0x47d   :  { %6963 = vmatpush2.bf16.msra.mxu1 %v9095_v60  ;;  %6891 = vmatprep.subr.bf16.mxu0 %v9100_v48  ;;  %v9115_v48 = vld [vmem:[#allocation14 + $0x8d4] ss:$28 sps:$4 sm:$0xff]   ;;  %v10504_v60 = vpop.f32.mrf.mxu0  ;;  %v6316_v33 = vadd.f32 %v10422_v3, %v6243_v32 }
 0x47e   :  { %6964 = vmatprep.subr.bf16.mxu1 %v9103_v41  ;;  %v9112_v41 = vld [vmem:[#allocation14 + $0x554] ss:$28 sps:$4 sm:$0xff]   ;;  %11206 = vst [vmem:[#allocation54_spill] sm:$0xff] %v10504_v60  ;;  %v6245_v28 = vadd.f32 %v10388_v29, %v10502_v36  ;;  %v6249_v29 = vadd.f32 %v10396_v14, %v10502_v36 }
 0x47f   :  { %v10513_v7 = vpop.f32.mrf.mxu0  ;;  %v9116_v32 = vld [vmem:[#allocation14 + $0xc18] ss:$28 sps:$4 sm:$0xff]  }
 0x480   :  { %6892 = vmatpush2.bf16.msra.mxu0 %v9098_v13  ;;  %v9113_v13 = vld [vmem:[#allocation14 + $0x8d0] ss:$28 sps:$4 sm:$0xff]   ;;  %11207 = vst [vmem:[#allocation55_spill] sm:$0xff] %v10513_v7  ;;  %v6318_v60 = vadd.f32 %v10430_v46, %v6245_v28  ;;  %v9120_v7 = vld [vmem:[#allocation14 + $0x1a0] ss:$28 sps:$4 sm:$0xff]   ;;  %v6253_v46 = vadd.f32 %v10402_v18, %v10496_v15  ;;  %v6322_v14 = vadd.f32 %v10442_v22, %v6249_v29 }
 0x481   :  { %6965 = vmatpush2.bf16.msra.mxu1 %v9101_v37  ;;  %6893 = vmatprep.subr.bf16.mxu0 %v9106_v1  ;;  %v9110_v37 = vld [vmem:[#allocation14 + $0x550] ss:$28 sps:$4 sm:$0xff]   ;;  %v9118_v1 = vld [vmem:[#allocation14 + $0xc1c] ss:$28 sps:$4 sm:$0xff]   ;;  %v9123_v28 = vld [vmem:[#allocation14 + $0xbe4] ss:$28 sps:$4 sm:$0xff]  }
 0x482   :  { %6966 = vmatprep.subr.bf16.mxu1 %v9109_v50  ;;  %v9119_v50 = vld [vmem:[#allocation14 + $0x360] ss:$28 sps:$4 sm:$0xff]   ;;  %v6326_v22 = vadd.f32 %v10446_v61, %v6253_v46  ;;  %v9129_v29 = vld [vmem:[#allocation14 + $0x2f0] ss:$28 sps:$4 sm:$0xff]  }
 0x484   :  { %6894 = vmatpush2.bf16.msra.mxu0 %v9104_v8  ;;  %v10519_v8 = vpop.f32.mrf.mxu1  ;;  %v6399_v61 = vadd.f32 %v10462_v43, %v6326_v22  ;;  %v9130_v43 = vld [vmem:[#allocation14 + $0x130] ss:$28 sps:$4 sm:$0xff]   ;;  %v6265_v22 = vadd.f32 %v10412_v54, %v10502_v36  ;;  %v6269_v54 = vadd.f32 %v10416_v30, %v10502_v36  ;;  %v6273_v30 = vadd.f32 %v10418_v44, %v10496_v15 }
 0x485   :  { %6967 = vmatpush2.bf16.msra.mxu1 %v9107_v40  ;;  %6895 = vmatprep.subr.bf16.mxu0 %v9112_v41  ;;  %v6389_v40 = vadd.f32 %v10438_v52, %v6316_v33  ;;  %v6320_v41 = vadd.f32 %v10434_v59, %v6247_v9  ;;  %v9124_v33 = vld [vmem:[#allocation14 + $0x328] ss:$28 sps:$4 sm:$0xff]   ;;  %v6255_v59 = vadd.f32 %v10404_v11, %v10502_v36 }
 0x486   :  { %6968 = vmatprep.subr.bf16.mxu1 %v9115_v48  ;;  %v6391_v48 = vadd.f32 %v10444_v55, %v6318_v60  ;;  %v9121_v60 = vld [vmem:[#allocation14 + $0xbe0] ss:$28 sps:$4 sm:$0xff]   ;;  %v6257_v9 = vadd.f32 %v10406_v51, %v10496_v15 }
 0x488   :  { %6896 = vmatpush2.bf16.msra.mxu0 %v9110_v37  ;;  %v6393_v37 = vadd.f32 %v10450_v10, %v6320_v41  ;;  %v6395_v10 = vadd.f32 %v10456_v24, %v6322_v14 }
 0x489   :  { %6969 = vmatpush2.bf16.msra.mxu1 %v9113_v13  ;;  %v6461_v3 = vpop.f32.mrf.mxu0  ;;  %7011 = vmatprep.subr.bf16.mxu0 %v9118_v1  ;;  %v10529_v13 = vpop.f32.mrf.mxu1 }
 0x48a   :  { %8265 = vmatprep.subr.bf16.mxu1 %v9119_v50  ;;  %v6462_v25 = vadd.f32 %v6461_v3, %v6389_v40  ;;  %v9125_v50 = vld [vmem:[#allocation14 + $0x168] ss:$28 sps:$4 sm:$0xff]   ;;  %v6328_v3 = vadd.f32 %v10454_v42, %v6255_v59 }
 0x48b   :  { %v6463_v52 = vpop.f32.mrf.mxu0  ;;  %6898 = vmatmul.mubr.bf16.vlgmr.msra.gmra.mxu0 %v10227_v4  ;;  %v9128_v40 = vld [vmem:[#allocation14 + $0xbac] ss:$28 sps:$4 sm:$0xff]   ;;  %v10543_v41 = vpop.f32.mrf.mxu1 }
 0x48c   :  { %6971 = vmatmul.mubr.bf16.vlgmr.msra.gmra.mxu1 %v10290_v16  ;;  %9228 = vtanh.f32 %v6462_v25  ;;  %v6464_v55 = vadd.f32 %v6463_v52, %v6391_v48  ;;  %6907 = vmatprep.mubr.bf16.mxu0 %v10242_v63  ;;  %v6401_v51 = vadd.f32 %v10468_v45, %v6328_v3  ;;  %v9126_v42 = vld [vmem:[#allocation14 + $0xba8] ss:$28 sps:$4 sm:$0xff]   ;;  %v6263_v45 = vadd.f32 %v10410_v35, %v10496_v15 }
 0x48d   :  { %6980 = vmatprep.mubr.bf16.mxu1 %v10297_v53  ;;  %v6465_v18 = vpop.f32.mrf.mxu0  ;;  %7012 = vmatpush1.bf16.msra.mxu0 %v9116_v32  ;;  %v6330_v32 = vadd.f32 %v10458_v17, %v6257_v9  ;;  %v10549_v25 = vpop.f32.mrf.mxu1  ;;  %v6267_v9 = vadd.f32 %v10414_v12, %v10496_v15 }
 0x48e   :  { %8266 = vmatpush3.bf16.msra.mxu1 %v9120_v7  ;;  %9230 = vtanh.f32 %v6464_v55  ;;  %v6466_v1 = vadd.f32 %v6465_v18, %v6393_v37  ;;  %7013 = vmatprep.subr.bf16.mxu0 %v9123_v28  ;;  %v6259_v7 = vadd.f32 %v10408_v49, %v10502_v36  ;;  %v9133_v28 = vld [vmem:[#allocation14 + $0xb74] ss:$28 sps:$4 sm:$0xff]   ;;  %v6336_v35 = vadd.f32 %v10470_v56, %v6263_v45 }
 0x48f   :  { %8267 = vmatprep.subr.bf16.mxu1 %v9124_v33  ;;  %v6467_v11 = vpop.f32.mrf.mxu0  ;;  %v9134_v33 = vld [vmem:[#allocation14 + $0x2b8] ss:$28 sps:$4 sm:$0xff]   ;;  %v6403_v14 = vadd.f32 %v10472_v62, %v6330_v32  ;;  %v10560_v59 = vpop.f32.mrf.mxu1 }
 0x490   :  { %9232 = vtanh.f32 %v6466_v1  ;;  %v6468_v24 = vadd.f32 %v6467_v11, %v6395_v10  ;;  %v6332_v49 = vadd.f32 %v10466_v6, %v6259_v7  ;;  %v9131_v6 = vld [vmem:[#allocation14 + $0xb70] ss:$28 sps:$4 sm:$0xff]   ;;  %v9135_v18 = vld [vmem:[#allocation14 + $0xf8] ss:$28 sps:$4 sm:$0xff]   ;;  %v9139_v1 = vld [vmem:[#allocation14 + $0x280] ss:$28 sps:$4 sm:$0xff]   ;;  %v6338_v11 = vadd.f32 %v10474_v34, %v6265_v22 }
 0x491   :  { %v6471_v48 = vpop.f32.mrf.mxu0  ;;  %7014 = vmatpush1.bf16.msra.mxu0 %v9121_v60  ;;  %v9138_v60 = vld [vmem:[#allocation14 + $0xb3c] ss:$28 sps:$4 sm:$0xff]   ;;  %v10571_v56 = vpop.f32.mrf.mxu1  ;;  %v6340_v7 = vadd.f32 %v10478_v39, %v6267_v9 }
 0x492   :  { %8268 = vmatpush3.bf16.msra.mxu1 %v9125_v50  ;;  %9234 = vtanh.f32 %v6468_v24  ;;  %v6472_v46 = vadd.f32 %v6471_v48, %v6399_v61  ;;  %7015 = vmatprep.subr.bf16.mxu0 %v9128_v40  ;;  %v6405_v55 = vadd.f32 %v10476_v19, %v6332_v49  ;;  %v6409_v40 = vadd.f32 %v10480_v20, %v6336_v35  ;;  %v9140_v61 = vld [vmem:[#allocation14 + $0xc0] ss:$28 sps:$4 sm:$0xff]   ;;  %v9144_v48 = vld [vmem:[#allocation14 + $0x248] ss:$28 sps:$4 sm:$0xff]  }
 0x493   :  { %8269 = vmatprep.subr.bf16.mxu1 %v9129_v29  ;;  %v6473_v52 = vpop.f32.mrf.mxu0  ;;  %6908 = vmatmul.mubr.bf16.gmra.mxu0 %v10244_v58  ;;  %v9136_v29 = vld [vmem:[#allocation14 + $0xb38] ss:$28 sps:$4 sm:$0xff]   ;;  %v6411_v12 = vadd.f32 %v10484_v0, %v6338_v11  ;;  %v9143_v20 = vld [vmem:[#allocation14 + $0xb04] ss:$28 sps:$4 sm:$0xff]   ;;  %v6413_v39 = vadd.f32 %v10488_v31, %v6340_v7  ;;  %v11212_v35 = vld [vmem:[#allocation52_spill] sm:$0xff] }
 0x494   :  { %6981 = vmatmul.mubr.bf16.gmra.mxu1 %v10299_v38  ;;  %9236 = vtanh.f32 %v6472_v46  ;;  %v6474_v17 = vadd.f32 %v6473_v52, %v6401_v51  ;;  %6917 = vmatprep.mubr.bf16.mxu0 %v10256_v23  ;;  %v11208_v46 = vld [vmem:[#allocation47_spill] sm:$0xff]  ;;  %v11209_v49 = vld [vmem:[#allocation50_spill] sm:$0xff] }
 0x495   :  { %6990 = vmatprep.mubr.bf16.mxu1 %v10308_v47  ;;  %v6475_v37 = vpop.f32.mrf.mxu0  ;;  %7016 = vmatpush1.bf16.msra.mxu0 %v9126_v42  ;;  %v6342_v42 = vadd.f32 %v10482_v5, %v6269_v54  ;;  %v6275_v44 = vadd.f32 %v11208_v46, %v10502_v36  ;;  %v9141_v52 = vld [vmem:[#allocation14 + $0xb00] ss:$28 sps:$4 sm:$0xff]   ;;  %v6346_v31 = vadd.f32 %v11209_v49, %v6273_v30  ;;  %v9146_v11 = vld [vmem:[#allocation14 + $0xac8] ss:$28 sps:$4 sm:$0xff]   ;;  %v9154_v7 = vld [vmem:[#allocation14 + $0x1d8] ss:$28 sps:$4 sm:$0xff]  }
 0x496   :  { %8270 = vmatpush3.bf16.msra.mxu1 %v9130_v43  ;;  %9238 = vtanh.f32 %v6474_v17  ;;  %v6476_v62 = vadd.f32 %v6475_v37, %v6403_v14  ;;  %7017 = vmatprep.subr.bf16.mxu0 %v9133_v28  ;;  %v10585_v43 = vpop.f32.mrf.mxu1  ;;  %v11210_v14 = vld [vmem:[#allocation53_spill] sm:$0xff]  ;;  %v9148_v37 = vld [vmem:[#allocation14 + $0xacc] ss:$28 sps:$4 sm:$0xff]  }
 0x497   :  { %8271 = vmatprep.subr.bf16.mxu1 %v9134_v33  ;;  %v6477_v10 = vpop.f32.mrf.mxu0  ;;  %v9145_v33 = vld [vmem:[#allocation14 + $0x88] ss:$28 sps:$4 sm:$0xff]   ;;  %v6415_v17 = vadd.f32 %v11210_v14, %v6342_v42 }
 0x498   :  { %9240 = vtanh.f32 %v6476_v62  ;;  %v6478_v19 = vadd.f32 %v6477_v10, %v6405_v55  ;;  %v9149_v55 = vld [vmem:[#allocation14 + $0x210] ss:$28 sps:$4 sm:$0xff]   ;;  %v6348_v10 = vadd.f32 %v11212_v35, %v6275_v44  ;;  %v10595_v9 = vpop.f32.mrf.mxu1  ;;  %v9155_v44 = vld [vmem:[#allocation14 + $0x18] ss:$28 sps:$4 sm:$0xff]  }
 0x499   :  { %v9229_v50 = vpop.eup %9228  ;;  %7018 = vmatpush1.bf16.msra.mxu0 %v9131_v6  ;;  %v6481_v3 = vpop.f32.mrf.mxu0  ;;  %v11211_v6 = vld [vmem:[#allocation48_spill] sm:$0xff]  ;;  %v11221_v35 = vld [vmem:[#allocation29_spill] sm:$0xff] }
 0x49a   :  { %7400 = vst [vmem:[#allocation17] sm:$0xff] %v9229_v50  ;;  %8272 = vmatpush3.bf16.msra.mxu1 %v9135_v18  ;;  %9242 = vtanh.f32 %v6478_v19  ;;  %7019 = vmatprep.subr.bf16.mxu0 %v9138_v60  ;;  %v6482_v34 = vadd.f32 %v6481_v3, %v6409_v40  ;;  %v6277_v62 = vadd.f32 %v11211_v6, %v10496_v15  ;;  %v11213_v19 = vld [vmem:[#allocation49_spill] sm:$0xff]  ;;  %v9164_v6 = vld [vmem:[#allocation14 + $0xa28] ss:$28 sps:$4 sm:$0xff]  }
 0x49b   :  { %v9231_v24 = vpop.eup %9230  ;;  %8273 = vmatprep.subr.bf16.mxu1 %v9139_v1  ;;  %6918 = vmatmul.mubr.bf16.gmra.mxu0 %v10258_v2  ;;  %v6483_v32 = vpop.f32.mrf.mxu0  ;;  %v6419_v60 = vadd.f32 %v10508_v57, %v6346_v31  ;;  %v6279_v50 = vadd.f32 %v11213_v19, %v10502_v36  ;;  %v9150_v15 = vld [vmem:[#allocation14 + $0x50] ss:$28 sps:$4 sm:$0xff]  }
 0x49c   :  { %7401 = vst [vmem:[#allocation17 + $0x8] sm:$0xff] %v9231_v24  ;;  %6991 = vmatmul.mubr.bf16.gmra.mxu1 %v10310_v21  ;;  %9244 = vtanh.f32 %v6482_v34  ;;  %6927 = vmatprep.mubr.bf16.mxu0 %v10262_v27  ;;  %v6484_v0 = vadd.f32 %v6483_v32, %v6411_v12  ;;  %v9153_v24 = vld [vmem:[#allocation14 + $0xa94] ss:$28 sps:$4 sm:$0xff]   ;;  %v11215_v36 = vld [vmem:[#allocation36_spill] sm:$0xff]  ;;  %v11216_v12 = vld [vmem:[#allocation38_spill] sm:$0xff] }
 0x49d   :  { %v9233_v51 = vpop.eup %9232  ;;  %7000 = vmatprep.mubr.bf16.mxu1 %v10314_v26  ;;  %7020 = vmatpush1.bf16.msra.mxu0 %v9136_v29  ;;  %v6485_v28 = vpop.f32.mrf.mxu0  ;;  %v11214_v29 = vld [vmem:[#allocation54_spill] sm:$0xff] }
 0x49e   :  { %7407 = vst [vmem:[#allocation17 + $0x38] sm:$0xff] %v9233_v51  ;;  %8274 = vmatpush3.bf16.msra.mxu1 %v9140_v61  ;;  %9246 = vtanh.f32 %v6484_v0  ;;  %7021 = vmatprep.subr.bf16.mxu0 %v9143_v20  ;;  %v6486_v45 = vadd.f32 %v6485_v28, %v6413_v39  ;;  %v6350_v3 = vadd.f32 %v11214_v29, %v6277_v62  ;;  %v11218_v51 = vld [vmem:[#allocation39_spill] sm:$0xff]  ;;  %v10605_v39 = vpop.f32.mrf.mxu1  ;;  %v9151_v0 = vld [vmem:[#allocation14 + $0xa90] ss:$28 sps:$4 sm:$0xff]  }
 0x49f   :  { %v9235_v5 = vpop.eup %9234  ;;  %8275 = vmatprep.subr.bf16.mxu1 %v9144_v48  ;;  %v6487_v18 = vpop.f32.mrf.mxu0  ;;  %v6421_v61 = vadd.f32 %v10519_v8, %v6348_v10  ;;  %v11217_v48 = vld [vmem:[#allocation55_spill] sm:$0xff]  ;;  %v11220_v62 = vld [vmem:[#allocation28_spill] sm:$0xff]  ;;  %v9173_v29 = vld [vmem:[#allocation14 + $0xd34] ss:$28 sps:$4 sm:$0xff]  }
 0x4a0   :  { %7408 = vst [vmem:[#allocation17 + $0x40] sm:$0xff] %v9235_v5  ;;  %9248 = vtanh.f32 %v6486_v45  ;;  %v6488_v1 = vadd.f32 %v6487_v18, %v6415_v17  ;;  %v6352_v30 = vadd.f32 %v11217_v48, %v6279_v50  ;;  %v6423_v32 = vadd.f32 %v10529_v13, %v6350_v3  ;;  %v11219_v8 = vld [vmem:[#allocation27_spill] sm:$0xff]  ;;  %v10608_v17 = vpop.f32.mrf.mxu1  ;;  %v9156_v45 = vld [vmem:[#allocation14 + $0xdd8] ss:$28 sps:$4 sm:$0xff]   ;;  %v9169_v50 = vld [vmem:[#allocation14 + $0x9f0] ss:$28 sps:$4 sm:$0xff]  }
 0x4a1   :  { %v9237_v22 = vpop.eup %9236  ;;  %7022 = vmatpush1.bf16.msra.mxu0 %v9141_v52  ;;  %v6491_v40 = vpop.f32.mrf.mxu0  ;;  %v9159_v5 = vld [vmem:[#allocation14 + $0xa60] ss:$28 sps:$4 sm:$0xff]   ;;  %v9175_v48 = vld [vmem:[#allocation14 + $0x7f8] ss:$28 sps:$4 sm:$0xff]  }
 0x4a2   :  { %7414 = vst [vmem:[#allocation17 + $0x70] sm:$0xff] %v9237_v22  ;;  %8276 = vmatpush3.bf16.msra.mxu1 %v9145_v33  ;;  %9250 = vtanh.f32 %v6488_v1  ;;  %7023 = vmatprep.subr.bf16.mxu0 %v9148_v37  ;;  %v6492_v57 = vadd.f32 %v6491_v40, %v6419_v60  ;;  %v6425_v28 = vadd.f32 %v10543_v41, %v6352_v30  ;;  %v9158_v33 = vld [vmem:[#allocation14 + $0xddc] ss:$28 sps:$4 sm:$0xff]   ;;  %v9163_v37 = vld [vmem:[#allocation14 + $0xda4] ss:$28 sps:$4 sm:$0xff]   ;;  %v10611_v22 = vpop.f32.mrf.mxu1 }
 0x4a3   :  { %v9239_v54 = vpop.eup %9238  ;;  %8277 = vmatprep.subr.bf16.mxu1 %v9149_v55  ;;  %6928 = vmatmul.mubr.bf16.gmra.mxu0 %v11215_v36  ;;  %v6493_v34 = vpop.f32.mrf.mxu0  ;;  %v9160_v41 = vld [vmem:[#allocation14 + $0x8a0] ss:$28 sps:$4 sm:$0xff]   ;;  %v9165_v60 = vld [vmem:[#allocation14 + $0x868] ss:$28 sps:$4 sm:$0xff]  }
 0x4a4   :  { %7415 = vst [vmem:[#allocation17 + $0x78] sm:$0xff] %v9239_v54  ;;  %7001 = vmatmul.mubr.bf16.gmra.mxu1 %v11216_v12  ;;  %9252 = vtanh.f32 %v6492_v57  ;;  %7043 = vmatprep.mubr.bf16.mxu0 %v11218_v51  ;;  %v6494_v42 = vadd.f32 %v6493_v34, %v6421_v61  ;;  %v9161_v10 = vld [vmem:[#allocation14 + $0xda0] ss:$28 sps:$4 sm:$0xff]   ;;  %v9168_v1 = vld [vmem:[#allocation14 + $0xd6c] ss:$28 sps:$4 sm:$0xff]   ;;  %v10614_v40 = vpop.f32.mrf.mxu1 }
 0x4a5   :  { %v9241_v20 = vpop.eup %9240  ;;  %7116 = vmatprep.mubr.bf16.mxu1 %v11219_v8  ;;  %7024 = vmatpush1.bf16.msra.mxu0 %v9146_v11  ;;  %v6495_v46 = vpop.f32.mrf.mxu0  ;;  %v9170_v54 = vld [vmem:[#allocation14 + $0x830] ss:$28 sps:$4 sm:$0xff]   ;;  %v9174_v61 = vld [vmem:[#allocation14 + $0x9b8] ss:$28 sps:$4 sm:$0xff]   ;;  %v11223_v34 = vld [vmem:[#allocation31_spill] sm:$0xff] }
 0x4a6   :  { %7421 = vst [vmem:[#allocation17 + $0xa8] sm:$0xff] %v9241_v20  ;;  %8278 = vmatpush3.bf16.msra.mxu1 %v9150_v15  ;;  %9254 = vtanh.f32 %v6494_v42  ;;  %7025 = vmatprep.subr.bf16.mxu0 %v9153_v24  ;;  %v6496_v13 = vadd.f32 %v6495_v46, %v6423_v32  ;;  %v9166_v15 = vld [vmem:[#allocation14 + $0xd68] ss:$28 sps:$4 sm:$0xff]   ;;  %v11222_v57 = vld [vmem:[#allocation30_spill] sm:$0xff]  ;;  %v9171_v20 = vld [vmem:[#allocation14 + $0xd30] ss:$28 sps:$4 sm:$0xff]  }
 0x4a7   :  { %v9243_v52 = vpop.eup %9242  ;;  %8279 = vmatprep.subr.bf16.mxu1 %v9154_v7  ;;  %v6497_v49 = vpop.f32.mrf.mxu0  ;;  %v9178_v30 = vld [vmem:[#allocation14 + $0xcfc] ss:$28 sps:$4 sm:$0xff]  }
 0x4a8   :  { %7422 = vst [vmem:[#allocation17 + $0xb0] sm:$0xff] %v9243_v52  ;;  %9256 = vtanh.f32 %v6496_v13  ;;  %v6498_v31 = vadd.f32 %v6497_v49, %v6425_v28  ;;  %v10617_v7 = vpop.f32.mrf.mxu1  ;;  %v9179_v8 = vld [vmem:[#allocation14 + $0x980] ss:$28 sps:$4 sm:$0xff]   ;;  %v9184_v52 = vld [vmem:[#allocation14 + $0x948] ss:$28 sps:$4 sm:$0xff]   ;;  %v11224_v28 = vld [vmem:[#allocation33_spill] sm:$0xff] }
 0x4a9   :  { %v9245_v14 = vpop.eup %9244  ;;  %7026 = vmatpush1.bf16.msra.mxu0 %v9151_v0  ;;  %v9176_v0 = vld [vmem:[#allocation14 + $0xcf8] ss:$28 sps:$4 sm:$0xff]   ;;  %v9180_v46 = vld [vmem:[#allocation14 + $0x7c0] ss:$28 sps:$4 sm:$0xff]   ;;  %v9185_v49 = vld [vmem:[#allocation14 + $0x788] ss:$28 sps:$4 sm:$0xff]  }
 0x4aa   :  { %8280 = vmatpush3.bf16.msra.mxu1 %v9155_v44  ;;  %7428 = vst [vmem:[#allocation17 + $0xe0] sm:$0xff] %v9245_v14  ;;  %9258 = vtanh.f32 %v6498_v31  ;;  %7027 = vmatprep.subr.bf16.mxu0 %v9158_v33  ;;  %v10620_v42 = vpop.f32.mrf.mxu1  ;;  %v9183_v44 = vld [vmem:[#allocation14 + $0xcc4] ss:$28 sps:$4 sm:$0xff]   ;;  %v11225_v33 = vld [vmem:[#allocation34_spill] sm:$0xff]  ;;  %v9188_v31 = vld [vmem:[#allocation14 + $0xc8c] ss:$28 sps:$4 sm:$0xff]  }
 0x4ab   :  { %8345 = vmatprep.subr.bf16.mxu1 %v9159_v5  ;;  %v9247_v55 = vpop.eup %9246  ;;  %v9181_v5 = vld [vmem:[#allocation14 + $0xcc0] ss:$28 sps:$4 sm:$0xff]   ;;  %v9189_v14 = vld [vmem:[#allocation14 + $0x910] ss:$28 sps:$4 sm:$0xff]  }
 0x4ac   :  { %7429 = vst [vmem:[#allocation17 + $0xe8] sm:$0xff] %v9247_v55  ;;  %v10623_v13 = vpop.f32.mrf.mxu1  ;;  %v9193_v55 = vld [vmem:[#allocation14 + $0xc54] ss:$28 sps:$4 sm:$0xff]  }
 0x4ad   :  { %7117 = vmatmul.mubr.bf16.vlgmr.msra.gmra.mxu1 %v11220_v62  ;;  %v9249_v18 = vpop.eup %9248  ;;  %7028 = vmatpush2.bf16.msra.mxu0 %v9156_v45  ;;  %v11227_v62 = vld [vmem:[#allocation35_spill] sm:$0xff] }
 0x4ae   :  { %7124 = vmatprep.mubr.bf16.mxu1 %v11221_v35  ;;  %7435 = vst [vmem:[#allocation17 + $0x118] sm:$0xff] %v9249_v18  ;;  %8346 = vmatpush3.bf16.msra.mxu1 %v9160_v41  ;;  %v10626_v45 = vpop.f32.mrf.mxu1  ;;  %v9186_v41 = vld [vmem:[#allocation14 + $0xc88] ss:$28 sps:$4 sm:$0xff]   ;;  %v11229_v35 = vld [vmem:[#allocation37_spill] sm:$0xff] }
 0x4af   :  { %7029 = vmatprep.subr.bf16.mxu0 %v9163_v37  ;;  %v9251_v19 = vpop.eup %9250  ;;  %8347 = vmatprep.subr.bf16.mxu1 %v9164_v6  ;;  %11226 = vst [vmem:[#allocation47_spill] sm:$0xff] %v10626_v45  ;;  %v9190_v37 = vld [vmem:[#allocation14 + $0x750] ss:$28 sps:$4 sm:$0xff]   ;;  %v9194_v6 = vld [vmem:[#allocation14 + $0x8d8] ss:$28 sps:$4 sm:$0xff]  }
 0x4b0   :  { %7436 = vst [vmem:[#allocation17 + $0x120] sm:$0xff] %v9251_v19  ;;  %v10629_v18 = vpop.f32.mrf.mxu1  ;;  %v10632_v19 = vld [vmem:[#allocation14 + $0xde0] ss:$28 sps:$4 sm:$0xff]  }
 0x4b1   :  { %v9253_v11 = vpop.eup %9252  ;;  %7030 = vmatpush2.bf16.msra.mxu0 %v9161_v10  ;;  %11228 = vst [vmem:[#allocation50_spill] sm:$0xff] %v10629_v18  ;;  %v9191_v10 = vld [vmem:[#allocation14 + $0xc50] ss:$28 sps:$4 sm:$0xff]  }
 0x4b2   :  { %7442 = vst [vmem:[#allocation17 + $0x150] sm:$0xff] %v9253_v11  ;;  %8348 = vmatpush3.bf16.msra.mxu1 %v9165_v60  ;;  %7031 = vmatprep.subr.bf16.mxu0 %v9168_v1  ;;  %v9195_v60 = vld [vmem:[#allocation14 + $0x718] ss:$28 sps:$4 sm:$0xff]   ;;  %v9196_v1 = vld [vmem:[#allocation14 + $0x6e0] ss:$28 sps:$4 sm:$0xff]  }
 0x4b3   :  { %v9255_v3 = vpop.eup %9254  ;;  %8349 = vmatprep.subr.bf16.mxu1 %v9169_v50  ;;  %v10634_v50 = vpop.f32.mrf.mxu1  ;;  %v9198_v11 = vld [vmem:[#allocation14 + $0x520] ss:$28 sps:$4 sm:$0xff]  }
 0x4b4   :  { %7443 = vst [vmem:[#allocation17 + $0x158] sm:$0xff] %v9255_v3  ;;  %11230 = vst [vmem:[#allocation53_spill] sm:$0xff] %v10634_v50  ;;  %v11231_v3 = vld [vmem:[#allocation40_spill] sm:$0xff] }
 0x4b5   :  { %7125 = vmatmul.mubr.bf16.gmra.mxu1 %v11222_v57  ;;  %v9257_v24 = vpop.eup %9256  ;;  %7032 = vmatpush2.bf16.msra.mxu0 %v9166_v15  ;;  %v10637_v15 = vld [vmem:[#allocation14 + $0xc20] ss:$28 sps:$4 sm:$0xff]   ;;  %v10644_v57 = vpop.f32.mrf.mxu1 }
 0x4b6   :  { %7132 = vmatprep.mubr.bf16.mxu1 %v11223_v34  ;;  %7449 = vst [vmem:[#allocation17 + $0x188] sm:$0xff] %v9257_v24  ;;  %8350 = vmatpush3.bf16.msra.mxu1 %v9170_v54  ;;  %v9200_v54 = vld [vmem:[#allocation14 + $0x6a8] ss:$28 sps:$4 sm:$0xff]   ;;  %11232 = vst [vmem:[#allocation48_spill] sm:$0xff] %v10644_v57  ;;  %v11233_v24 = vld [vmem:[#allocation41_spill] sm:$0xff] }
 0x4b7   :  { %7033 = vmatprep.subr.bf16.mxu0 %v9173_v29  ;;  %v9259_v32 = vpop.eup %9258  ;;  %8351 = vmatprep.subr.bf16.mxu1 %v9174_v61  ;;  %v10642_v61 = vld [vmem:[#allocation14 + $0xda8] ss:$28 sps:$4 sm:$0xff]  }
 0x4b8   :  { %7450 = vst [vmem:[#allocation17 + $0x190] sm:$0xff] %v9259_v32  ;;  %v9202_v34 = vld [vmem:[#allocation14 + $0x4e8] ss:$28 sps:$4 sm:$0xff]  }
 0x4b9   :  { %7034 = vmatpush2.bf16.msra.mxu0 %v9171_v20  ;;  %v11239_v57 = vld [vmem:[#allocation32_spill] sm:$0xff] }
 0x4ba   :  { %8352 = vmatpush3.bf16.msra.mxu1 %v9175_v48  ;;  %7035 = vmatprep.subr.bf16.mxu0 %v9178_v30  ;;  %v10652_v48 = vld [vmem:[#allocation14 + $0xbe8] ss:$28 sps:$4 sm:$0xff]   ;;  %v9204_v30 = vld [vmem:[#allocation14 + $0x670] ss:$28 sps:$4 sm:$0xff]  }
 0x4bb   :  { %8353 = vmatprep.subr.bf16.mxu1 %v9179_v8  ;;  %v10657_v8 = vld [vmem:[#allocation14 + $0xd70] ss:$28 sps:$4 sm:$0xff]  }
 0x4bd   :  { %7133 = vmatmul.mubr.bf16.gmra.mxu1 %v11224_v28  ;;  %7036 = vmatpush2.bf16.msra.mxu0 %v9176_v0  ;;  %v10668_v28 = vld [vmem:[#allocation14 + $0xd38] ss:$28 sps:$4 sm:$0xff]  }
 0x4be   :  { %7140 = vmatprep.mubr.bf16.mxu1 %v11225_v33  ;;  %8354 = vmatpush3.bf16.msra.mxu1 %v9180_v46  ;;  %v9208_v46 = vld [vmem:[#allocation14 + $0x638] ss:$28 sps:$4 sm:$0xff]   ;;  %v11235_v33 = vld [vmem:[#allocation43_spill] sm:$0xff] }
 0x4bf   :  { %7037 = vmatprep.subr.bf16.mxu0 %v9183_v44  ;;  %8355 = vmatprep.subr.bf16.mxu1 %v9184_v52  ;;  %v11234_v52 = vld [vmem:[#allocation42_spill] sm:$0xff] }
 0x4c1   :  { %7038 = vmatpush2.bf16.msra.mxu0 %v9181_v5  ;;  %v9210_v5 = vld [vmem:[#allocation14 + $0x478] ss:$28 sps:$4 sm:$0xff]  }
 0x4c2   :  { %8356 = vmatpush3.bf16.msra.mxu1 %v9185_v49  ;;  %7039 = vmatprep.subr.bf16.mxu0 %v9188_v31  ;;  %v10676_v31 = vld [vmem:[#allocation14 + $0xb78] ss:$28 sps:$4 sm:$0xff]  }
 0x4c3   :  { %8357 = vmatprep.subr.bf16.mxu1 %v9189_v14  ;;  %v9212_v14 = vld [vmem:[#allocation14 + $0x600] ss:$28 sps:$4 sm:$0xff]  }
 0x4c5   :  { %7141 = vmatmul.mubr.bf16.gmra.mxu1 %v11227_v62  ;;  %7040 = vmatpush2.bf16.msra.mxu0 %v9186_v41 }
 0x4c6   :  { %7246 = vmatprep.mubr.bf16.mxu1 %v11229_v35  ;;  %8358 = vmatpush3.bf16.msra.mxu1 %v9190_v37  ;;  %v10681_v37 = vld [vmem:[#allocation14 + $0xd00] ss:$28 sps:$4 sm:$0xff]   ;;  %v11236_v35 = vld [vmem:[#allocation44_spill] sm:$0xff] }
 0x4c7   :  { %7041 = vmatprep.subr.bf16.mxu0 %v9193_v55  ;;  %8359 = vmatprep.subr.bf16.mxu1 %v9194_v6  ;;  %v9216_v6 = vld [vmem:[#allocation14 + $0x5c8] ss:$28 sps:$4 sm:$0xff]  }
 0x4c9   :  { %7042 = vmatpush2.bf16.msra.mxu0 %v9191_v10  ;;  %v10639_v29 = vpop.f32.mrf.mxu0  ;;  %v10692_v10 = vld [vmem:[#allocation14 + $0xcc8] ss:$28 sps:$4 sm:$0xff]  }
 0x4ca   :  { %8360 = vmatpush3.bf16.msra.mxu1 %v9195_v60  ;;  %8305 = vmatprep.subr.bf16.mxu0 %v9196_v1  ;;  %v10649_v20 = vpop.f32.mrf.mxu1  ;;  %v11237_v60 = vld [vmem:[#allocation45_spill] sm:$0xff]  ;;  %v9218_v1 = vld [vmem:[#allocation14 + $0x408] ss:$28 sps:$4 sm:$0xff]  }
 0x4cb   :  { %8425 = vmatprep.subr.bf16.mxu1 %v10632_v19  ;;  %v10654_v32 = vpop.f32.mrf.mxu0 }
 0x4cc   :  { %7044 = vmatmul.mubr.bf16.vlgmr.msra.gmra.mxu0 %v11231_v3  ;;  %v10659_v0 = vpop.f32.mrf.mxu1 }
 0x4cd   :  { %7247 = vmatmul.mubr.bf16.vlgmr.msra.gmra.mxu1 %v10290_v16  ;;  %7053 = vmatprep.mubr.bf16.mxu0 %v11233_v24  ;;  %v9206_v16 = vld [vmem:[#allocation14 + $0x4b0] ss:$28 sps:$4 sm:$0xff]   ;;  %v10664_v44 = vpop.f32.mrf.mxu0 }
 0x4ce   :  { %8306 = vmatpush3.bf16.msra.mxu0 %v9198_v11  ;;  %7254 = vmatprep.mubr.bf16.mxu1 %v10297_v53  ;;  %v10662_v53 = vld [vmem:[#allocation14 + $0xbb0] ss:$28 sps:$4 sm:$0xff]   ;;  %v10673_v49 = vpop.f32.mrf.mxu1 }
 0x4cf   :  { %8433 = vmatpush3.bf16.msra.mxu1 %v10637_v15  ;;  %8307 = vmatprep.subr.bf16.mxu0 %v9200_v54  ;;  %v10678_v41 = vpop.f32.mrf.mxu0  ;;  %v10700_v54 = vld [vmem:[#allocation14 + $0xb08] ss:$28 sps:$4 sm:$0xff]  }
 0x4d0   :  { %8426 = vmatprep.subr.bf16.mxu1 %v10642_v61  ;;  %v10683_v55 = vpop.f32.mrf.mxu1 }
 0x4d1   :  { %v10688_v62 = vpop.f32.mrf.mxu0 }
 0x4d2   :  { %8308 = vmatpush3.bf16.msra.mxu0 %v9202_v34  ;;  %v10697_v11 = vpop.f32.mrf.mxu1  ;;  %v9220_v34 = vld [vmem:[#allocation14 + $0x590] ss:$28 sps:$4 sm:$0xff]  }
 0x4d3   :  { %8434 = vmatpush3.bf16.msra.mxu1 %v10652_v48  ;;  %8309 = vmatprep.subr.bf16.mxu0 %v9204_v30  ;;  %v10702_v30 = vpop.f32.mrf.mxu0 }
 0x4d4   :  { %7054 = vmatmul.mubr.bf16.gmra.mxu0 %v11234_v52  ;;  %8427 = vmatprep.subr.bf16.mxu1 %v10657_v8 }
 0x4d5   :  { %7255 = vmatmul.mubr.bf16.gmra.mxu1 %v10299_v38  ;;  %7063 = vmatprep.mubr.bf16.mxu0 %v11235_v33  ;;  %v9214_v38 = vld [vmem:[#allocation14 + $0x440] ss:$28 sps:$4 sm:$0xff]  }
 0x4d6   :  { %8310 = vmatpush3.bf16.msra.mxu0 %v9206_v16  ;;  %7262 = vmatprep.mubr.bf16.mxu1 %v10308_v47  ;;  %v10686_v47 = vld [vmem:[#allocation14 + $0xb40] ss:$28 sps:$4 sm:$0xff]   ;;  %v9221_v16 = vld [vmem:[#allocation14 + $0xc90] ss:$28 sps:$4 sm:$0xff]  }
 0x4d7   :  { %8435 = vmatpush3.bf16.msra.mxu1 %v10662_v53  ;;  %8311 = vmatprep.subr.bf16.mxu0 %v9208_v46  ;;  %v10705_v46 = vpop.f32.mrf.mxu1 }
 0x4d8   :  { %8428 = vmatprep.subr.bf16.mxu1 %v10668_v28 }
 0x4d9   :  { %v10716_v50 = vpop.f32.mrf.mxu1 }
 0x4da   :  { %8312 = vmatpush3.bf16.msra.mxu0 %v9210_v5  ;;  %v9224_v5 = vld [vmem:[#allocation14 + $0x558] ss:$28 sps:$4 sm:$0xff]  }
 0x4db   :  { %8436 = vmatpush3.bf16.msra.mxu1 %v10676_v31  ;;  %8313 = vmatprep.subr.bf16.mxu0 %v9212_v14  ;;  %v10710_v14 = vpop.f32.mrf.mxu0  ;;  %v10721_v45 = vpop.f32.mrf.mxu1 }
 0x4dc   :  { %7064 = vmatmul.mubr.bf16.gmra.mxu0 %v11236_v35  ;;  %8429 = vmatprep.subr.bf16.mxu1 %v10681_v37 }
 0x4dd   :  { %7263 = vmatmul.mubr.bf16.gmra.mxu1 %v10310_v21  ;;  %7073 = vmatprep.mubr.bf16.mxu0 %v11237_v60  ;;  %v9222_v21 = vld [vmem:[#allocation14 + $0x3d0] ss:$28 sps:$4 sm:$0xff]   ;;  %v10719_v18 = vpop.f32.mrf.mxu0 }
 0x4de   :  { %8314 = vmatpush3.bf16.msra.mxu0 %v9214_v38  ;;  %7270 = vmatprep.mubr.bf16.mxu1 %v10314_v26  ;;  %v10708_v26 = vld [vmem:[#allocation14 + $0xad0] ss:$28 sps:$4 sm:$0xff]   ;;  %v11238_v38 = vld [vmem:[#allocation46_spill] sm:$0xff] }
 0x4df   :  { %8437 = vmatpush3.bf16.msra.mxu1 %v10686_v47  ;;  %8315 = vmatprep.subr.bf16.mxu0 %v9216_v6  ;;  %v9225_v6 = vld [vmem:[#allocation14 + $0xc58] ss:$28 sps:$4 sm:$0xff]  }
 0x4e0   :  { %8430 = vmatprep.subr.bf16.mxu1 %v10692_v10 }
 0x4e2   :  { %8316 = vmatpush3.bf16.msra.mxu0 %v9218_v1  ;;  %v9226_v1 = vld [vmem:[#allocation14 + $0x398] ss:$28 sps:$4 sm:$0xff]  }
 0x4e3   :  { %8438 = vmatpush3.bf16.msra.mxu1 %v10700_v54  ;;  %8317 = vmatprep.subr.bf16.mxu0 %v9220_v34  ;;  %v9227_v34 = vld [vmem:[#allocation14 + $0xa98] ss:$28 sps:$4 sm:$0xff]  }
 0x4e4   :  { %7074 = vmatmul.mubr.bf16.gmra.mxu0 %v11238_v38  ;;  %8431 = vmatprep.subr.bf16.mxu1 %v9221_v16 }
 0x4e5   :  { %7271 = vmatmul.mubr.bf16.gmra.mxu1 %v11216_v12  ;;  %7181 = vmatprep.mubr.bf16.mxu0 %v11239_v57  ;;  %v10724_v12 = vpop.f32.mrf.mxu0  ;;  %v10729_v57 = vpop.f32.mrf.mxu1 }
 0x4e6   :  { %8318 = vmatpush3.bf16.msra.mxu0 %v9222_v21  ;;  %7327 = vmatprep.mubr.bf16.mxu1 %v11235_v33 }
 0x4e7   :  { %8439 = vmatpush3.bf16.msra.mxu1 %v10708_v26  ;;  %8319 = vmatprep.subr.bf16.mxu0 %v9224_v5  ;;  %v10733_v33 = vpop.f32.mrf.mxu0  ;;  %v10736_v21 = vpop.f32.mrf.mxu1 }
 0x4e8   :  { %8432 = vmatprep.subr.bf16.mxu1 %v9225_v6 }
 0x4ea   :  { %8320 = vmatpush3.bf16.msra.mxu0 %v9226_v1 }
 0x4eb   :  { %8440 = vmatpush3.bf16.msra.mxu1 %v9227_v34  ;;  %8385 = vmatprep.subr.bf16.mxu0 %v10632_v19  ;;  %v10739_v19 = vpop.f32.mrf.mxu0 }
 0x4ed   :  { %7182 = vmatmul.mubr.bf16.vlgmr.msra.gmra.mxu0 %v10227_v4  ;;  %v10745_v4 = vpop.f32.mrf.mxu1 }
 0x4ee   :  { %7328 = vmatmul.mubr.bf16.vlgmr.msra.gmra.mxu1 %v11236_v35  ;;  %7189 = vmatprep.mubr.bf16.mxu0 %v10242_v63  ;;  %v10748_v63 = vpop.f32.mrf.mxu0 }
 0x4ef   :  { %8386 = vmatpush3.bf16.msra.mxu0 %v10637_v15  ;;  %7335 = vmatprep.mubr.bf16.mxu1 %v11237_v60  ;;  %v10751_v15 = vpop.f32.mrf.mxu1 }
 0x4f0   :  { %8387 = vmatprep.subr.bf16.mxu0 %v10642_v61  ;;  %v10754_v61 = vpop.f32.mrf.mxu0 }
 0x4f3   :  { %8388 = vmatpush3.bf16.msra.mxu0 %v10652_v48 }
 0x4f4   :  { %8389 = vmatprep.subr.bf16.mxu0 %v10657_v8  ;;  %v10763_v8 = vpop.f32.mrf.mxu1 }
 0x4f5   :  { %7190 = vmatmul.mubr.bf16.gmra.mxu0 %v10244_v58  ;;  %v11240_v58 = vld [vmem:[#allocation25_spill] sm:$0xff] }
 0x4f6   :  { %7336 = vmatmul.mubr.bf16.gmra.mxu1 %v11238_v38  ;;  %7197 = vmatprep.mubr.bf16.mxu0 %v10256_v23  ;;  %v11241_v23 = vld [vmem:[#allocation51_spill] sm:$0xff] }
 0x4f7   :  { %8390 = vmatpush3.bf16.msra.mxu0 %v10662_v53  ;;  %v10761_v48 = vrot.slane %v11241_v23, %v11240_v58  ;;  %v10766_v53 = vpop.f32.mrf.mxu0 }
 0x4f8   :  { %8391 = vmatprep.subr.bf16.mxu0 %v10668_v28  ;;  %v11242_v28 = vld [vmem:[#allocation26_spill] sm:$0xff] }
 0x4fb   :  { %8392 = vmatpush3.bf16.msra.mxu0 %v10676_v31  ;;  %v10771_v31 = vrot.slane %v11241_v23, %v11242_v28 }
 0x4fc   :  { %8393 = vmatprep.subr.bf16.mxu0 %v10681_v37  ;;  %v10778_v37 = vpop.f32.mrf.mxu0 }
 0x4fd   :  { %7198 = vmatmul.mubr.bf16.gmra.mxu0 %v10258_v2  ;;  %v6535_v2 = vadd.f32 %v10549_v25, %v10761_v48  ;;  %v6547_v38 = vadd.f32 %v10605_v39, %v10771_v31 }
 0x4fe   :  { %7205 = vmatprep.mubr.bf16.mxu0 %v10262_v27  ;;  %v10775_v27 = vpop.f32.mrf.mxu1 }
 0x4ff   :  { %8394 = vmatpush3.bf16.msra.mxu0 %v10686_v47  ;;  %v6537_v47 = vadd.f32 %v10560_v59, %v10771_v31  ;;  %v6608_v35 = vadd.f32 %v10639_v29, %v6535_v2  ;;  %v6541_v59 = vadd.f32 %v10585_v43, %v10771_v31 }
 0x500   :  { %8395 = vmatprep.subr.bf16.mxu0 %v10692_v10  ;;  %v6539_v10 = vadd.f32 %v10571_v56, %v10761_v48  ;;  %v10788_v60 = vpop.f32.mrf.mxu1  ;;  %v6545_v56 = vadd.f32 %v10595_v9, %v10761_v48 }
 0x501   :  { %v6610_v25 = vadd.f32 %v10654_v32, %v6537_v47  ;;  %v6681_v29 = vadd.f32 %v10649_v20, %v6608_v35 }
 0x502   :  { %v10801_v5 = vpop.f32.mrf.mxu1 }
 0x503   :  { %8396 = vmatpush3.bf16.msra.mxu0 %v10700_v54  ;;  %v10791_v54 = vpop.f32.mrf.mxu0  ;;  %v6683_v32 = vadd.f32 %v10659_v0, %v6610_v25  ;;  %v6549_v0 = vadd.f32 %v10608_v17, %v10761_v48 }
 0x504   :  { %8397 = vmatprep.subr.bf16.mxu0 %v9221_v16  ;;  %v6614_v16 = vadd.f32 %v10678_v41, %v6541_v59 }
 0x505   :  { %7206 = vmatmul.mubr.bf16.gmra.mxu0 %v11215_v36  ;;  %v6612_v36 = vadd.f32 %v10664_v44, %v6539_v10  ;;  %v6618_v44 = vadd.f32 %v10688_v62, %v6545_v56  ;;  %v6622_v23 = vadd.f32 %v10710_v14, %v6549_v0 }
 0x506   :  { %7311 = vmatprep.mubr.bf16.mxu0 %v11218_v51  ;;  %v6687_v1 = vadd.f32 %v10683_v55, %v6614_v16  ;;  %v6555_v55 = vadd.f32 %v10614_v40, %v10761_v48  ;;  %v6559_v40 = vadd.f32 %v10620_v42, %v10761_v48 }
 0x507   :  { %8398 = vmatpush3.bf16.msra.mxu0 %v10708_v26  ;;  %v6685_v20 = vadd.f32 %v10673_v49, %v6612_v36  ;;  %v6551_v49 = vadd.f32 %v10611_v22, %v10771_v31  ;;  %v6691_v58 = vadd.f32 %v10697_v11, %v6618_v44  ;;  %v6557_v22 = vadd.f32 %v10617_v7, %v10771_v31 }
 0x508   :  { %8399 = vmatprep.subr.bf16.mxu0 %v9225_v6  ;;  %v6695_v14 = vadd.f32 %v10716_v50, %v6622_v23  ;;  %v6628_v47 = vadd.f32 %v10724_v12, %v6555_v55  ;;  %v6561_v50 = vadd.f32 %v10623_v13, %v10771_v31 }
 0x509   :  { %v6624_v28 = vadd.f32 %v10719_v18, %v6551_v49  ;;  %v6630_v25 = vadd.f32 %v10733_v33, %v6557_v22 }
 0x50a   :  { %v6753_v51 = vpop.f32.mrf.mxu0  ;;  %v6701_v59 = vadd.f32 %v10729_v57, %v6628_v47  ;;  %v11244_v57 = vld [vmem:[#allocation50_spill] sm:$0xff] }
 0x50b   :  { %8400 = vmatpush3.bf16.msra.mxu0 %v9227_v34  ;;  %v6754_v26 = vadd.f32 %v6753_v51, %v6681_v29  ;;  %v10807_v6 = vpop.f32.mrf.mxu1  ;;  %v6620_v34 = vadd.f32 %v10702_v30, %v6547_v38  ;;  %v6632_v29 = vadd.f32 %v10739_v19, %v6559_v40  ;;  %v11243_v51 = vld [vmem:[#allocation47_spill] sm:$0xff]  ;;  %v6703_v33 = vadd.f32 %v10736_v21, %v6630_v25 }
 0x50c   :  { %v6755_v43 = vpop.f32.mrf.mxu0  ;;  %v6567_v19 = vadd.f32 %v11244_v57, %v10771_v31 }
 0x50d   :  { %9260 = vtanh.f32 %v6754_v26  ;;  %v6756_v9 = vadd.f32 %v6755_v43, %v6683_v32  ;;  %v10819_v17 = vpop.f32.mrf.mxu1  ;;  %v6634_v32 = vadd.f32 %v10748_v63, %v6561_v50  ;;  %v6705_v38 = vadd.f32 %v10745_v4, %v6632_v29  ;;  %v11245_v63 = vld [vmem:[#allocation53_spill] sm:$0xff] }
 0x50e   :  { %7312 = vmatmul.mubr.bf16.vlgmr.msra.gmra.mxu0 %v11231_v3  ;;  %v6757_v41 = vpop.f32.mrf.mxu0 }
 0x50f   :  { %7319 = vmatprep.mubr.bf16.mxu0 %v11233_v24  ;;  %9262 = vtanh.f32 %v6756_v9  ;;  %v6758_v39 = vadd.f32 %v6757_v41, %v6685_v20  ;;  %v6693_v24 = vadd.f32 %v10705_v46, %v6620_v34  ;;  %v10829_v35 = vpop.f32.mrf.mxu1  ;;  %v6697_v46 = vadd.f32 %v10721_v45, %v6624_v28 }
 0x510   :  { %v6759_v62 = vpop.f32.mrf.mxu0  ;;  %v6565_v45 = vadd.f32 %v11243_v51, %v10761_v48  ;;  %v6569_v9 = vadd.f32 %v11245_v63, %v10761_v48  ;;  %v6707_v41 = vadd.f32 %v10751_v15, %v6634_v32 }
 0x511   :  { %9264 = vtanh.f32 %v6758_v39  ;;  %v6760_v3 = vadd.f32 %v6759_v62, %v6687_v1  ;;  %v10840_v36 = vpop.f32.mrf.mxu1  ;;  %v6640_v1 = vadd.f32 %v10766_v53, %v6567_v19 }
 0x512   :  { %v6763_v30 = vpop.f32.mrf.mxu0  ;;  %v6638_v43 = vadd.f32 %v10754_v61, %v6565_v45  ;;  %v11246_v61 = vld [vmem:[#allocation48_spill] sm:$0xff] }
 0x513   :  { %9266 = vtanh.f32 %v6760_v3  ;;  %v6764_v2 = vadd.f32 %v6763_v30, %v6691_v58  ;;  %v10850_v20 = vpop.f32.mrf.mxu1  ;;  %v6571_v39 = vadd.f32 %v11246_v61, %v10771_v31  ;;  %v6642_v58 = vadd.f32 %v10778_v37, %v6569_v9 }
 0x514   :  { %v6765_v11 = vpop.f32.mrf.mxu0  ;;  %v6711_v62 = vadd.f32 %v10763_v8, %v6638_v43  ;;  %v6713_v53 = vadd.f32 %v10775_v27, %v6640_v1 }
 0x515   :  { %9268 = vtanh.f32 %v6764_v2  ;;  %v6766_v10 = vadd.f32 %v6765_v11, %v6693_v24  ;;  %v10860_v23 = vpop.f32.mrf.mxu1  ;;  %v6644_v55 = vadd.f32 %v10791_v54, %v6571_v39  ;;  %v6715_v8 = vadd.f32 %v10788_v60, %v6642_v58 }
 0x516   :  { %7320 = vmatmul.mubr.bf16.gmra.mxu0 %v11234_v52  ;;  %v6767_v18 = vpop.f32.mrf.mxu0 }
 0x517   :  { %9270 = vtanh.f32 %v6766_v10  ;;  %v6768_v7 = vadd.f32 %v6767_v18, %v6695_v14  ;;  %v10865_v37 = vpop.f32.mrf.mxu1  ;;  %v6717_v11 = vadd.f32 %v10801_v5, %v6644_v55 }
 0x518   :  { %v6769_v12 = vpop.f32.mrf.mxu0 }
 0x519   :  { %9272 = vtanh.f32 %v6768_v7  ;;  %v6770_v42 = vadd.f32 %v6769_v12, %v6697_v46  ;;  %v10868_v47 = vpop.f32.mrf.mxu1 }
 0x51a   :  { %v9261_v52 = vpop.eup %9260  ;;  %v6773_v56 = vpop.f32.mrf.mxu0 }
 0x51b   :  { %7402 = vst [vmem:[#allocation17 + $0x10] sm:$0xff] %v9261_v52  ;;  %9274 = vtanh.f32 %v6770_v42  ;;  %v6774_v13 = vadd.f32 %v6773_v56, %v6701_v59  ;;  %v10870_v18 = vpop.f32.mrf.mxu1 }
 0x51c   :  { %v9263_v16 = vpop.eup %9262  ;;  %v6775_v26 = vpop.f32.mrf.mxu0 }
 0x51d   :  { %7403 = vst [vmem:[#allocation17 + $0x18] sm:$0xff] %v9263_v16  ;;  %9276 = vtanh.f32 %v6774_v13  ;;  %v6776_v44 = vadd.f32 %v6775_v26, %v6703_v33  ;;  %v10872_v25 = vpop.f32.mrf.mxu1 }
 0x51e   :  { %v9265_v21 = vpop.eup %9264  ;;  %v6777_v0 = vpop.f32.mrf.mxu0 }
 0x51f   :  { %7409 = vst [vmem:[#allocation17 + $0x48] sm:$0xff] %v9265_v21  ;;  %9278 = vtanh.f32 %v6776_v44  ;;  %v6778_v34 = vadd.f32 %v6777_v0, %v6705_v38  ;;  %v10874_v12 = vpop.f32.mrf.mxu1 }
 0x520   :  { %v9267_v4 = vpop.eup %9266  ;;  %v6779_v49 = vpop.f32.mrf.mxu0 }
 0x521   :  { %7410 = vst [vmem:[#allocation17 + $0x50] sm:$0xff] %v9267_v4  ;;  %9280 = vtanh.f32 %v6778_v34  ;;  %v6780_v48 = vadd.f32 %v6779_v49, %v6707_v41  ;;  %v10876_v42 = vpop.f32.mrf.mxu1 }
 0x522   :  { %v9269_v15 = vpop.eup %9268  ;;  %v6783_v3 = vpop.f32.mrf.mxu0 }
 0x523   :  { %7416 = vst [vmem:[#allocation17 + $0x80] sm:$0xff] %v9269_v15  ;;  %9282 = vtanh.f32 %v6780_v48  ;;  %v6784_v30 = vadd.f32 %v6783_v3, %v6711_v62  ;;  %v10878_v52 = vpop.f32.mrf.mxu1 }
 0x524   :  { %v9271_v31 = vpop.eup %9270  ;;  %v6785_v24 = vpop.f32.mrf.mxu0 }
 0x525   :  { %7417 = vst [vmem:[#allocation17 + $0x88] sm:$0xff] %v9271_v31  ;;  %9284 = vtanh.f32 %v6784_v30  ;;  %v6786_v28 = vadd.f32 %v6785_v24, %v6713_v53  ;;  %v10880_v51 = vpop.f32.mrf.mxu1 }
 0x526   :  { %v9273_v2 = vpop.eup %9272  ;;  %v6787_v22 = vpop.f32.mrf.mxu0 }
 0x527   :  { %7423 = vst [vmem:[#allocation17 + $0xb8] sm:$0xff] %v9273_v2  ;;  %9286 = vtanh.f32 %v6786_v28  ;;  %v6788_v27 = vadd.f32 %v6787_v22, %v6715_v8  ;;  %v10882_v45 = vpop.f32.mrf.mxu1 }
 0x528   :  { %v9275_v54 = vpop.eup %9274  ;;  %v6789_v14 = vpop.f32.mrf.mxu0 }
 0x529   :  { %7424 = vst [vmem:[#allocation17 + $0xc0] sm:$0xff] %v9275_v54  ;;  %9288 = vtanh.f32 %v6788_v27  ;;  %v6790_v10 = vadd.f32 %v6789_v14, %v6717_v11  ;;  %v10884_v56 = vpop.f32.mrf.mxu1 }
 0x52a   :  { %v9277_v60 = vpop.eup %9276 }
 0x52b   :  { %7430 = vst [vmem:[#allocation17 + $0xf0] sm:$0xff] %v9277_v60  ;;  %9290 = vtanh.f32 %v6790_v10 }
 0x52c   :  { %v9279_v40 = vpop.eup %9278 }
 0x52d   :  { %7431 = vst [vmem:[#allocation17 + $0xf8] sm:$0xff] %v9279_v40 }
 0x52e   :  { %v9281_v46 = vpop.eup %9280 }
 0x52f   :  { %7437 = vst [vmem:[#allocation17 + $0x128] sm:$0xff] %v9281_v46 }
 0x530   :  { %v9283_v5 = vpop.eup %9282 }
 0x531   :  { %7438 = vst [vmem:[#allocation17 + $0x130] sm:$0xff] %v9283_v5 }
 0x532   :  { %v9285_v7 = vpop.eup %9284 }
 0x533   :  { %7444 = vst [vmem:[#allocation17 + $0x160] sm:$0xff] %v9285_v7  ;;  %v10944_v7 = vld [vmem:[#allocation16] sm:$0xff] }
 0x534   :  { %v9287_v50 = vpop.eup %9286  ;;  %11252 = vst [vmem:[#allocation55_spill] sm:$0xff] %v10944_v7 }
 0x535   :  { %7445 = vst [vmem:[#allocation17 + $0x168] sm:$0xff] %v9287_v50  ;;  %v11253_v50 = vld [vmem:[#allocation24_spill] sm:$0xff] }
 0x536   :  { %v9289_v59 = vpop.eup %9288 }
 0x537   :  { %7451 = vst [vmem:[#allocation17 + $0x198] sm:$0xff] %v9289_v59  ;;  %v11254_v59 = vsub.s32 4, %v11253_v50 }
 0x538   :  { %v9291_v29 = vpop.eup %9290 }
 0x539   :  { %7452 = vst [vmem:[#allocation17 + $0x1a0] sm:$0xff] %v9291_v29  ;;  %v10949_v29 = vrot.slane %v10944_v7, %v11254_v59 }
 0x54b   :  { %v6899_v13 = vpop.f32.mrf.mxu0 }
 0x54c   :  { %v6972_v33 = vpop.f32.mrf.mxu1 }
 0x54d   :  { %v6901_v19 = vpop.f32.mrf.mxu0 }
 0x54e   :  { %v10886_v32 = vpop.f32.mrf.mxu1 }
 0x54f   :  { %v6903_v43 = vpop.f32.mrf.mxu0 }
 0x550   :  { %v10888_v16 = vpop.f32.mrf.mxu1 }
 0x551   :  { %v6905_v63 = vpop.f32.mrf.mxu0 }
 0x552   :  { %v10890_v57 = vpop.f32.mrf.mxu1 }
 0x553   :  { %v6909_v41 = vpop.f32.mrf.mxu0 }
 0x554   :  { %v10892_v26 = vpop.f32.mrf.mxu1 }
 0x555   :  { %v6911_v4 = vpop.f32.mrf.mxu0 }
 0x556   :  { %v10894_v38 = vpop.f32.mrf.mxu1 }
 0x557   :  { %v10912_v49 = vpop.f32.mrf.mxu0 }
 0x558   :  { %v10896_v44 = vpop.f32.mrf.mxu1 }
 0x559   :  { %v10918_v48 = vpop.f32.mrf.mxu0 }
 0x55a   :  { %v10898_v21 = vpop.f32.mrf.mxu1 }
 0x55b   :  { %v10920_v3 = vpop.f32.mrf.mxu0 }
 0x55c   :  { %v10900_v9 = vpop.f32.mrf.mxu1 }
 0x55d   :  { %v10924_v31 = vpop.f32.mrf.mxu0 }
 0x55e   :  { %v10902_v0 = vpop.f32.mrf.mxu1 }
 0x55f   :  { %v10928_v2 = vpop.f32.mrf.mxu0 }
 0x560   :  { %v10904_v1 = vpop.f32.mrf.mxu1 }
 0x561   :  { %v10932_v54 = vpop.f32.mrf.mxu0 }
 0x562   :  { %v10906_v34 = vpop.f32.mrf.mxu1 }
 0x563   :  { %v10938_v40 = vpop.f32.mrf.mxu0 }
 0x564   :  { %v10908_v61 = vpop.f32.mrf.mxu1 }
 0x566   :  { %v10910_v39 = vpop.f32.mrf.mxu1 }
 0x568   :  { %v10914_v62 = vpop.f32.mrf.mxu1 }
 0x56a   :  { %v10916_v58 = vpop.f32.mrf.mxu1 }
 0x56d   :  { %v8281_v15 = vpop.f32.mrf.mxu1 }
 0x56f   :  { %v8282_v53 = vpop.f32.mrf.mxu1 }
 0x570   :  { %v10922_v55 = vadd.f32 %v8282_v53, %v8281_v15  ;;  %v10951_v15 = vpop.f32.mrf.mxu0 }
 0x571   :  { %v8284_v30 = vpop.f32.mrf.mxu1 }
 0x572   :  { %11247 = vst [vmem:[#allocation52_spill] sm:$0xff] %v10922_v55 }
 0x573   :  { %v8285_v24 = vpop.f32.mrf.mxu1 }
 0x574   :  { %v10926_v8 = vadd.f32 %v8285_v24, %v8284_v30  ;;  %v11256_v30 = vsub.s32 5, %v11253_v50 }
 0x575   :  { %v8287_v28 = vpop.f32.mrf.mxu1 }
 0x576   :  { %11248 = vst [vmem:[#allocation49_spill] sm:$0xff] %v10926_v8  ;;  %v10958_v24 = vrot.slane %v10944_v7, %v11256_v30  ;;  %v6831_v8 = vadd.f32 %v10829_v35, %v10949_v29 }
 0x577   :  { %v8288_v22 = vpop.f32.mrf.mxu1 }
 0x578   :  { %v10930_v11 = vadd.f32 %v8288_v22, %v8287_v28  ;;  %v6827_v22 = vadd.f32 %v10807_v6, %v10949_v29  ;;  %v6829_v59 = vadd.f32 %v10819_v17, %v10958_v24  ;;  %v6833_v6 = vadd.f32 %v10840_v36, %v10958_v24 }
 0x579   :  { %v8290_v27 = vpop.f32.mrf.mxu1  ;;  %v6837_v17 = vadd.f32 %v10850_v20, %v10949_v29  ;;  %v6839_v35 = vadd.f32 %v10860_v23, %v10958_v24  ;;  %v6841_v20 = vadd.f32 %v10865_v37, %v10949_v29  ;;  %v6843_v23 = vadd.f32 %v10868_v47, %v10958_v24 }
 0x57a   :  { %11249 = vst [vmem:[#allocation54_spill] sm:$0xff] %v10930_v11  ;;  %v6902_v30 = vadd.f32 %v6901_v19, %v6829_v59  ;;  %v6847_v37 = vadd.f32 %v10870_v18, %v10949_v29 }
 0x57b   :  { %v8291_v14 = vpop.f32.mrf.mxu1 }
 0x57c   :  { %v10934_v10 = vadd.f32 %v8291_v14, %v8290_v27  ;;  %v10964_v27 = vpop.f32.mrf.mxu0 }
 0x57d   :  { %v10936_v60 = vpop.f32.mrf.mxu1 }
 0x57e   :  { %11250 = vst [vmem:[#allocation36_spill] sm:$0xff] %v10934_v10  ;;  %v6900_v10 = vadd.f32 %v6899_v13, %v6827_v22  ;;  %v10974_v55 = vpop.f32.mrf.mxu0  ;;  %v6975_v13 = vadd.f32 %v10886_v32, %v6902_v30  ;;  %v6906_v22 = vadd.f32 %v6905_v63, %v6833_v6  ;;  %v6912_v63 = vadd.f32 %v6911_v4, %v6839_v35 }
 0x57f   :  { %v10940_v46 = vpop.f32.mrf.mxu1  ;;  %v6920_v6 = vadd.f32 %v10920_v3, %v6847_v37 }
 0x580   :  { %v6979_v32 = vadd.f32 %v10890_v57, %v6906_v22  ;;  %v6985_v4 = vadd.f32 %v10894_v38, %v6912_v63  ;;  %v6851_v38 = vadd.f32 %v10874_v12, %v10949_v29 }
 0x581   :  { %v10942_v5 = vpop.f32.mrf.mxu1 }
 0x582   :  { %11251 = vst [vmem:[#allocation38_spill] sm:$0xff] %v10942_v5  ;;  %v6904_v5 = vadd.f32 %v6903_v43, %v6831_v8 }
 0x583   :  { %v10953_v53 = vpop.f32.mrf.mxu1 }
 0x584   :  { %11255 = vst [vmem:[#allocation39_spill] sm:$0xff] %v10953_v53  ;;  %v6973_v53 = vadd.f32 %v6972_v33, %v6900_v10  ;;  %v6977_v59 = vadd.f32 %v10888_v16, %v6904_v5 }
 0x585   :  { %v10960_v28 = vpop.f32.mrf.mxu1 }
 0x586   :  { %11257 = vst [vmem:[#allocation27_spill] sm:$0xff] %v10960_v28 }
 0x587   :  { %v10966_v14 = vpop.f32.mrf.mxu1 }
 0x588   :  { %11258 = vst [vmem:[#allocation28_spill] sm:$0xff] %v10966_v14 }
 0x589   :  { %v10970_v11 = vpop.f32.mrf.mxu1 }
 0x58a   :  { %11259 = vst [vmem:[#allocation29_spill] sm:$0xff] %v10970_v11 }
 0x58b   :  { %v10976_v28 = vpop.f32.mrf.mxu1 }
 0x58c   :  { %11260 = vst [vmem:[#allocation30_spill] sm:$0xff] %v10976_v28  ;;  %v7045_v14 = vpop.f32.mrf.mxu0  ;;  %v6910_v28 = vadd.f32 %v6909_v41, %v6837_v17 }
 0x58d   :  { %v7046_v11 = vadd.f32 %v7045_v14, %v6973_v53  ;;  %v10983_v7 = vpop.f32.mrf.mxu1  ;;  %v6916_v14 = vadd.f32 %v10918_v48, %v6843_v23 }
 0x58e   :  { %v7047_v19 = vpop.f32.mrf.mxu0  ;;  %v6983_v41 = vadd.f32 %v10892_v26, %v6910_v28  ;;  %v6849_v26 = vadd.f32 %v10872_v25, %v10958_v24 }
 0x58f   :  { %9292 = vtanh.f32 %v7046_v11  ;;  %v7048_v36 = vadd.f32 %v7047_v19, %v6975_v13  ;;  %v10988_v33 = vpop.f32.mrf.mxu1  ;;  %v6914_v11 = vadd.f32 %v10912_v49, %v6841_v20  ;;  %v6989_v13 = vadd.f32 %v10898_v21, %v6916_v14 }
 0x590   :  { %v7049_v43 = vpop.f32.mrf.mxu0  ;;  %v6922_v22 = vadd.f32 %v10924_v31, %v6849_v26  ;;  %v6993_v19 = vadd.f32 %v10900_v9, %v6920_v6  ;;  %v6857_v21 = vadd.f32 %v10878_v52, %v10949_v29 }
 0x591   :  { %9294 = vtanh.f32 %v7048_v36  ;;  %v7050_v8 = vadd.f32 %v7049_v43, %v6977_v59  ;;  %v10993_v10 = vpop.f32.mrf.mxu1  ;;  %v6987_v28 = vadd.f32 %v10896_v44, %v6914_v11  ;;  %v6853_v44 = vadd.f32 %v10876_v42, %v10958_v24 }
 0x592   :  { %v7051_v16 = vpop.f32.mrf.mxu0  ;;  %v6924_v59 = vadd.f32 %v10928_v2, %v6851_v38  ;;  %v6995_v43 = vadd.f32 %v10902_v0, %v6922_v22  ;;  %v6859_v2 = vadd.f32 %v10880_v51, %v10958_v24 }
 0x593   :  { %9296 = vtanh.f32 %v7050_v8  ;;  %v7052_v5 = vadd.f32 %v7051_v16, %v6979_v32  ;;  %v10999_v53 = vpop.f32.mrf.mxu1  ;;  %v6926_v32 = vadd.f32 %v10932_v54, %v6853_v44  ;;  %v6930_v16 = vadd.f32 %v10938_v40, %v6857_v21 }
 0x594   :  { %v7055_v57 = vpop.f32.mrf.mxu0  ;;  %v6997_v23 = vadd.f32 %v10904_v1, %v6924_v59  ;;  %v6932_v37 = vadd.f32 %v10951_v15, %v6859_v2 }
 0x595   :  { %9298 = vtanh.f32 %v7052_v5  ;;  %v7056_v30 = vadd.f32 %v7055_v57, %v6983_v41  ;;  %v11005_v47 = vpop.f32.mrf.mxu1  ;;  %v6861_v41 = vadd.f32 %v10882_v45, %v10949_v29  ;;  %v6999_v5 = vadd.f32 %v10906_v34, %v6926_v32 }
 0x596   :  { %v7057_v49 = vpop.f32.mrf.mxu0  ;;  %v6863_v57 = vadd.f32 %v10884_v56, %v10958_v24  ;;  %v7003_v14 = vadd.f32 %v10908_v61, %v6930_v16  ;;  %v7005_v26 = vadd.f32 %v10910_v39, %v6932_v37 }
 0x597   :  { %9300 = vtanh.f32 %v7056_v30  ;;  %v7058_v17 = vadd.f32 %v7057_v49, %v6985_v4  ;;  %v11011_v18 = vpop.f32.mrf.mxu1  ;;  %v6934_v30 = vadd.f32 %v10964_v27, %v6861_v41 }
 0x598   :  { %v7059_v48 = vpop.f32.mrf.mxu0  ;;  %v6936_v49 = vadd.f32 %v10974_v55, %v6863_v57 }
 0x599   :  { %9302 = vtanh.f32 %v7058_v17  ;;  %v7060_v35 = vadd.f32 %v7059_v48, %v6987_v28  ;;  %v11017_v25 = vpop.f32.mrf.mxu1  ;;  %v7007_v27 = vadd.f32 %v10914_v62, %v6934_v30  ;;  %v11263_v30 = vld [vmem:[#allocation38_spill] sm:$0xff] }
 0x59a   :  { %v7061_v3 = vpop.f32.mrf.mxu0  ;;  %v7009_v39 = vadd.f32 %v10916_v58, %v6936_v49 }
 0x59b   :  { %9304 = vtanh.f32 %v7060_v35  ;;  %v7062_v36 = vadd.f32 %v7061_v3, %v6989_v13  ;;  %v11023_v12 = vpop.f32.mrf.mxu1 }
 0x59c   :  { %v9293_v20 = vpop.eup %9292  ;;  %v7065_v31 = vpop.f32.mrf.mxu0 }
 0x59d   :  { %7404 = vst [vmem:[#allocation17 + $0x20] sm:$0xff] %v9293_v20  ;;  %9306 = vtanh.f32 %v7062_v36  ;;  %v7066_v42 = vadd.f32 %v7065_v31, %v6993_v19  ;;  %v11029_v63 = vpop.f32.mrf.mxu1 }
 0x59e   :  { %v9295_v9 = vpop.eup %9294  ;;  %v7067_v8 = vpop.f32.mrf.mxu0 }
 0x59f   :  { %7405 = vst [vmem:[#allocation17 + $0x28] sm:$0xff] %v9295_v9  ;;  %9308 = vtanh.f32 %v7066_v42  ;;  %v7068_v52 = vadd.f32 %v7067_v8, %v6995_v43  ;;  %v11035_v0 = vpop.f32.mrf.mxu1 }
 0x5a0   :  { %v9297_v54 = vpop.eup %9296  ;;  %v7069_v11 = vpop.f32.mrf.mxu0 }
 0x5a1   :  { %7411 = vst [vmem:[#allocation17 + $0x58] sm:$0xff] %v9297_v54  ;;  %9310 = vtanh.f32 %v7068_v52  ;;  %v7070_v51 = vadd.f32 %v7069_v11, %v6997_v23  ;;  %v11041_v1 = vpop.f32.mrf.mxu1  ;;  %v8295_v11 = vadd.f32 %v10940_v46, %v10936_v60  ;;  %v11265_v46 = vld [vmem:[#allocation27_spill] sm:$0xff] }
 0x5a2   :  { %v9299_v40 = vpop.eup %9298  ;;  %v7071_v4 = vpop.f32.mrf.mxu0 }
 0x5a3   :  { %7412 = vst [vmem:[#allocation17 + $0x60] sm:$0xff] %v9299_v40  ;;  %9312 = vtanh.f32 %v7070_v51  ;;  %v7072_v45 = vadd.f32 %v7071_v4, %v6999_v5  ;;  %v11047_v34 = vpop.f32.mrf.mxu1  ;;  %v11261_v51 = vsub.s32 6, %v11253_v50  ;;  %v11262_v40 = vld [vmem:[#allocation55_spill] sm:$0xff] }
 0x5a4   :  { %v9301_v29 = vpop.eup %9300  ;;  %v7075_v15 = vpop.f32.mrf.mxu0 }
 0x5a5   :  { %7418 = vst [vmem:[#allocation17 + $0x90] sm:$0xff] %v9301_v29  ;;  %9314 = vtanh.f32 %v7072_v45  ;;  %v7076_v28 = vadd.f32 %v7075_v15, %v7003_v14  ;;  %v11051_v56 = vpop.f32.mrf.mxu1  ;;  %v11074_v57 = vrot.slane %v11262_v40, %v11261_v51  ;;  %v11264_v45 = vld [vmem:[#allocation39_spill] sm:$0xff] }
 0x5a6   :  { %v9303_v24 = vpop.eup %9302  ;;  %v7077_v61 = vpop.f32.mrf.mxu0  ;;  %v8298_v29 = vadd.f32 %v11264_v45, %v11263_v30 }
 0x5a7   :  { %7419 = vst [vmem:[#allocation17 + $0x98] sm:$0xff] %v9303_v24  ;;  %9316 = vtanh.f32 %v7076_v28  ;;  %v7078_v6 = vadd.f32 %v7077_v61, %v7005_v26  ;;  %v11054_v17 = vpop.f32.mrf.mxu1  ;;  %v7135_v14 = vadd.f32 %v8295_v11, %v11074_v57  ;;  %v8375_v28 = vadd.f32 %v11035_v0, %v11029_v63  ;;  %v11266_v24 = vld [vmem:[#allocation28_spill] sm:$0xff]  ;;  %v11267_v63 = vld [vmem:[#allocation29_spill] sm:$0xff]  ;;  %v11268_v0 = vld [vmem:[#allocation30_spill] sm:$0xff] }
 0x5a8   :  { %v9305_v38 = vpop.eup %9304  ;;  %v7079_v48 = vpop.f32.mrf.mxu0  ;;  %v8301_v61 = vadd.f32 %v11266_v24, %v11265_v46 }
 0x5a9   :  { %7425 = vst [vmem:[#allocation17 + $0xc8] sm:$0xff] %v9305_v38  ;;  %9318 = vtanh.f32 %v7078_v6  ;;  %v7080_v55 = vadd.f32 %v7079_v48, %v7007_v27  ;;  %v11057_v13 = vpop.f32.mrf.mxu1  ;;  %v7138_v27 = vadd.f32 %v8298_v29, %v11074_v57 }
 0x5aa   :  { %v9307_v22 = vpop.eup %9306  ;;  %v7081_v35 = vpop.f32.mrf.mxu0 }
 0x5ab   :  { %7426 = vst [vmem:[#allocation17 + $0xd0] sm:$0xff] %v9307_v22  ;;  %9320 = vtanh.f32 %v7080_v55  ;;  %v7082_v44 = vadd.f32 %v7081_v35, %v7009_v39  ;;  %v11059_v3 = vpop.f32.mrf.mxu1  ;;  %v8378_v22 = vadd.f32 %v11047_v34, %v11041_v1  ;;  %v11269_v34 = vld [vmem:[#allocation52_spill] sm:$0xff] }
 0x5ac   :  { %v9309_v62 = vpop.eup %9308 }
 0x5ad   :  { %7432 = vst [vmem:[#allocation17 + $0x100] sm:$0xff] %v9309_v62  ;;  %9322 = vtanh.f32 %v7082_v44  ;;  %v8321_v19 = vpop.f32.mrf.mxu0  ;;  %v7143_v62 = vadd.f32 %v8301_v61, %v11074_v57  ;;  %v8366_v61 = vadd.f32 %v10999_v53, %v10993_v10  ;;  %v11272_v10 = vld [vmem:[#allocation36_spill] sm:$0xff] }
 0x5ae   :  { %v9311_v59 = vpop.eup %9310  ;;  %v8413_v20 = vpop.f32.mrf.mxu1  ;;  %v7130_v53 = vadd.f32 %v11272_v10, %v11074_v57 }
 0x5af   :  { %7433 = vst [vmem:[#allocation17 + $0x108] sm:$0xff] %v9311_v59  ;;  %v8322_v36 = vpop.f32.mrf.mxu0  ;;  %v8304_v59 = vadd.f32 %v11268_v0, %v11267_v63 }
 0x5b0   :  { %v9313_v58 = vpop.eup %9312  ;;  %v8414_v42 = vpop.f32.mrf.mxu1 }
 0x5b1   :  { %7439 = vst [vmem:[#allocation17 + $0x138] sm:$0xff] %v9313_v58  ;;  %v8324_v21 = vpop.f32.mrf.mxu0  ;;  %v8415_v6 = vadd.f32 %v8414_v42, %v8413_v20  ;;  %v8323_v20 = vadd.f32 %v8322_v36, %v8321_v19  ;;  %v7146_v51 = vadd.f32 %v8304_v59, %v11074_v57  ;;  %v11270_v36 = vld [vmem:[#allocation49_spill] sm:$0xff] }
 0x5b2   :  { %v9315_v31 = vpop.eup %9314  ;;  %v8416_v16 = vpop.f32.mrf.mxu1  ;;  %v7122_v45 = vadd.f32 %v11270_v36, %v11074_v57 }
 0x5b3   :  { %7440 = vst [vmem:[#allocation17 + $0x140] sm:$0xff] %v9315_v31  ;;  %v8325_v43 = vpop.f32.mrf.mxu0 }
 0x5b4   :  { %v9317_v32 = vpop.eup %9316  ;;  %v8417_v5 = vpop.f32.mrf.mxu1  ;;  %v8326_v40 = vadd.f32 %v8325_v43, %v8324_v21 }
 0x5b5   :  { %7446 = vst [vmem:[#allocation17 + $0x170] sm:$0xff] %v9317_v32  ;;  %v11061_v9 = vpop.f32.mrf.mxu0  ;;  %v8418_v31 = vadd.f32 %v8417_v5, %v8416_v16 }
 0x5b6   :  { %v9319_v2 = vpop.eup %9318  ;;  %v8419_v26 = vpop.f32.mrf.mxu1  ;;  %v7187_v21 = vadd.f32 %v8326_v40, %v7122_v45 }
 0x5b7   :  { %7447 = vst [vmem:[#allocation17 + $0x178] sm:$0xff] %v9319_v2  ;;  %v11063_v8 = vpop.f32.mrf.mxu0 }
 0x5b8   :  { %v9321_v23 = vpop.eup %9320  ;;  %v8420_v39 = vpop.f32.mrf.mxu1 }
 0x5b9   :  { %7453 = vst [vmem:[#allocation17 + $0x1a8] sm:$0xff] %v9321_v23  ;;  %v11065_v52 = vpop.f32.mrf.mxu0 }
 0x5ba   :  { %v9323_v54 = vpop.eup %9322  ;;  %v8422_v42 = vpop.f32.mrf.mxu1 }
 0x5bb   :  { %7454 = vst [vmem:[#allocation17 + $0x1b0] sm:$0xff] %v9323_v54  ;;  %v11067_v41 = vpop.f32.mrf.mxu0  ;;  %v8381_v54 = vadd.f32 %v11054_v17, %v11051_v56  ;;  %v8384_v56 = vadd.f32 %v11059_v3, %v11057_v13 }
 0x5bc   :  { %v8423_v19 = vpop.f32.mrf.mxu1 }
 0x5bd   :  { %v8333_v37 = vpop.f32.mrf.mxu0  ;;  %v8424_v43 = vadd.f32 %v8423_v19, %v8422_v42 }
 0x5bf   :  { %v8334_v4 = vpop.f32.mrf.mxu0 }
 0x5c0   :  { %v8335_v15 = vadd.f32 %v8334_v4, %v8333_v37  ;;  %v7119_v37 = vadd.f32 %v11269_v34, %v11074_v57 }
 0x5c1   :  { %v8336_v49 = vpop.f32.mrf.mxu0 }
 0x5c2   :  { %v7200_v60 = vadd.f32 %v8335_v15, %v7135_v14  ;;  %v8421_v14 = vadd.f32 %v8420_v39, %v8419_v26  ;;  %v7184_v30 = vadd.f32 %v8323_v20, %v7119_v37  ;;  %v8332_v39 = vadd.f32 %v11067_v41, %v11065_v52 }
 0x5c3   :  { %v8337_v50 = vpop.f32.mrf.mxu0  ;;  %v8372_v52 = vadd.f32 %v11023_v12, %v11017_v25 }
 0x5c4   :  { %v7265_v38 = vadd.f32 %v8375_v28, %v7200_v60  ;;  %v8338_v48 = vadd.f32 %v8337_v50, %v8336_v49  ;;  %v8363_v49 = vadd.f32 %v10988_v33, %v10983_v7  ;;  %v8329_v60 = vadd.f32 %v11063_v8, %v11061_v9  ;;  %v11271_v50 = vld [vmem:[#allocation54_spill] sm:$0xff] }
 0x5c5   :  { %v8339_v55 = vpop.f32.mrf.mxu0  ;;  %v7252_v7 = vadd.f32 %v8366_v61, %v7187_v21 }
 0x5c6   :  { %v7330_v35 = vadd.f32 %v8415_v6, %v7265_v38  ;;  %v7203_v44 = vadd.f32 %v8338_v48, %v7138_v27  ;;  %v7249_v46 = vadd.f32 %v8363_v49, %v7184_v30  ;;  %v7127_v27 = vadd.f32 %v11271_v50, %v11074_v57 }
 0x5c7   :  { %v8340_v58 = vpop.f32.mrf.mxu0 }
 0x5c8   :  { %9324 = vtanh.f32 %v7330_v35  ;;  %v7268_v32 = vadd.f32 %v8378_v22, %v7203_v44  ;;  %v8341_v2 = vadd.f32 %v8340_v58, %v8339_v55  ;;  %v7192_v48 = vadd.f32 %v8329_v60, %v7127_v27 }
 0x5c9   :  { %v8342_v23 = vpop.f32.mrf.mxu0  ;;  %v8369_v55 = vadd.f32 %v11011_v18, %v11005_v47 }
 0x5ca   :  { %v7333_v11 = vadd.f32 %v8418_v31, %v7268_v32  ;;  %v7208_v1 = vadd.f32 %v8341_v2, %v7143_v62  ;;  %v7195_v62 = vadd.f32 %v8332_v39, %v7130_v53 }
 0x5cb   :  { %v8343_v4 = vpop.f32.mrf.mxu0  ;;  %v7257_v63 = vadd.f32 %v8369_v55, %v7192_v48 }
 0x5cc   :  { %9326 = vtanh.f32 %v7333_v11  ;;  %v7273_v16 = vadd.f32 %v8381_v54, %v7208_v1  ;;  %v8344_v5 = vadd.f32 %v8343_v4, %v8342_v23  ;;  %v7260_v57 = vadd.f32 %v8372_v52, %v7195_v62 }
 0x5ce   :  { %v7338_v17 = vadd.f32 %v8421_v14, %v7273_v16  ;;  %v7211_v29 = vadd.f32 %v8344_v5, %v7146_v51  ;;  %v8401_v15 = vpop.f32.mrf.mxu0 }
 0x5d0   :  { %9328 = vtanh.f32 %v7338_v17  ;;  %v7276_v26 = vadd.f32 %v8384_v56, %v7211_v29  ;;  %v8402_v28 = vpop.f32.mrf.mxu0 }
 0x5d1   :  { %v8403_v24 = vadd.f32 %v8402_v28, %v8401_v15 }
 0x5d2   :  { %v7341_v13 = vadd.f32 %v8424_v43, %v7276_v26  ;;  %v8404_v3 = vpop.f32.mrf.mxu0 }
 0x5d3   :  { %v7314_v6 = vadd.f32 %v8403_v24, %v7249_v46 }
 0x5d4   :  { %9330 = vtanh.f32 %v7341_v13  ;;  %v8405_v33 = vpop.f32.mrf.mxu0 }
 0x5d5   :  { %v9325_v38 = vpop.eup %9324  ;;  %9332 = vtanh.f32 %v7314_v6  ;;  %v8406_v9 = vadd.f32 %v8405_v33, %v8404_v3 }
 0x5d6   :  { %7434 = vst [vmem:[#allocation17 + $0x110] sm:$0xff] %v9325_v38  ;;  %v8407_v8 = vpop.f32.mrf.mxu0 }
 0x5d7   :  { %v7317_v22 = vadd.f32 %v8406_v9, %v7252_v7 }
 0x5d8   :  { %v8408_v35 = vpop.f32.mrf.mxu0 }
 0x5d9   :  { %v9327_v44 = vpop.eup %9326  ;;  %9334 = vtanh.f32 %v7317_v22  ;;  %v8409_v0 = vadd.f32 %v8408_v35, %v8407_v8 }
 0x5da   :  { %7441 = vst [vmem:[#allocation17 + $0x148] sm:$0xff] %v9327_v44  ;;  %v8410_v59 = vpop.f32.mrf.mxu0 }
 0x5db   :  { %v7322_v41 = vadd.f32 %v8409_v0, %v7257_v63 }
 0x5dc   :  { %v8411_v58 = vpop.f32.mrf.mxu0 }
 0x5dd   :  { %v9329_v31 = vpop.eup %9328  ;;  %9336 = vtanh.f32 %v7322_v41  ;;  %v8412_v32 = vadd.f32 %v8411_v58, %v8410_v59 }
 0x5de   :  { %7448 = vst [vmem:[#allocation17 + $0x180] sm:$0xff] %v9329_v31 }
 0x5df   :  { %v7325_v47 = vadd.f32 %v8412_v32, %v7260_v57 }
 0x5e1   :  { %v9331_v18 = vpop.eup %9330  ;;  %9338 = vtanh.f32 %v7325_v47 }
 0x5e2   :  { %v9333_v2 = vpop.eup %9332  ;;  %7455 = vst [vmem:[#allocation17 + $0x1b8] sm:$0xff] %v9331_v18 }
 0x5e3   :  { %7406 = vst [vmem:[#allocation17 + $0x30] sm:$0xff] %v9333_v2 }
 0x5e6   :  { %v9335_v20 = vpop.eup %9334 }
 0x5e7   :  { %7413 = vst [vmem:[#allocation17 + $0x68] sm:$0xff] %v9335_v20 }
 0x5ea   :  { %v9337_v42 = vpop.eup %9336 }
 0x5eb   :  { %7420 = vst [vmem:[#allocation17 + $0xa0] sm:$0xff] %v9337_v42 }
 0x5ee   :  { %v9339_v25 = vpop.eup %9338 }
 0x5ef   :  { %7427 = vst [vmem:[#allocation17 + $0xd8] sm:$0xff] %v9339_v25 }
 0x5f0   :  { %9533 = shalt.err (!%p9530_p7)
}
 0x5f1   :  { %s9575_s15 = smov 896   ;;  %s9576_s5 = smov 56  }
 0x5f2   :  { %7467 = dma.vmem_to_hbm [thread:$0]  %s7462_s8, 7168, %s11126_s9, [#allocation4], %s9575_s15, %s9575_s15, %s9576_s5  }
 0x5f3   :  { %9552 = dma.done.wait [#allocation4], 7168  }
 0x5f4   :  { %9553 = vsyncadd [#allocation4], 4294960128 }
 0x5f5   :  { %7471 = vsyncpa [#allocation3], 1 }
 0x5f6   :  { %7472 = vsyncpa [#allocation6], 1 }
 0x5f7   :  { %7473 = vsyncpa [#allocation9], 1 }
 0x5f8   :  { %7474 = vsyncpa [#allocation12], 1 }
 0x5f9   :  { %7475 = vsyncpa [#allocation15], 1 }
 0x5fa   :  { %7476 = vsyncpa [#allocation4], 1 }

</bundles_post_ra>
